<compile_context>
chip_gen: v7x
topology: tpu7x:2x2x1
jax: 0.10.0
libtpu: 0.0.40
codegen_flags: <defaults>
</compile_context>

<pallas_src>
import functools
import jax
import jax.numpy as jnp
from jax import lax
from jax.experimental import pallas as pl
from jax.experimental.pallas import tpu as pltpu

# ----------------------------- model dims (small) -----------------------------
N_BATCH = 2      # batch
C_IN    = 6      # skeleton input channels
T_LEN   = 16     # frames / encoder sequence length
V_JNT   = 22     # joints (SMPL layout)
C_GCN   = 64     # STA-GCN output channels
D_MODEL = 128    # "t5_channel" (768 in the real model)
N_HEAD  = 4
D_HEAD  = D_MODEL // N_HEAD
D_FF    = 256
VOCAB   = 384
L_DEC   = 8      # decoder sequence length
VT      = V_JNT * T_LEN          # 352 joint-major rows (multiple of 8)
NEG_INF = -1e9
EPS     = 1e-6
BF16    = jnp.bfloat16


# ------------------------------ in-kernel helpers ------------------------------
def _rmsnorm(x, w):
    """T5 LayerNorm (RMSNorm, no bias, no mean subtraction). x:(L,D) f32, w:(1,D)."""
    var = jnp.mean(x * x, axis=-1, keepdims=True)
    return x * lax.rsqrt(var + EPS) * w


def _attention(q, k, v, bias, wo):
    """Multi-head attention + output projection.

    q:(Lq,D)  k,v:(Lk,D) f32, bias broadcastable to (Lq,Lk), wo:(D,D) bf16.
    Per-head scores/softmax in an unrolled 4-step loop; the per-head outputs
    are concatenated so the output projection is a single K=128 MXU matmul.
    """
    outs = []
    for hh in range(N_HEAD):                                   # unrolled
        sl = slice(hh * D_HEAD, (hh + 1) * D_HEAD)
        q_h = q[:, sl].astype(BF16)
        k_h = k[:, sl].astype(BF16)
        v_h = v[:, sl].astype(BF16)
        # T5 attention: no 1/sqrt(d) scaling of scores.
        s = lax.dot_general(q_h, k_h, (((1,), (1,)), ((), ())),
                            preferred_element_type=jnp.float32) + bias
        m = jnp.max(s, axis=-1, keepdims=True)
        p = jnp.exp(s - m)
        p = p * pl.reciprocal(jnp.sum(p, axis=-1, keepdims=True), approx=True)
        outs.append(jnp.dot(p.astype(BF16), v_h,
                            preferred_element_type=jnp.float32))        # (Lq, dh)
    o_all = jnp.concatenate(outs, axis=-1).astype(BF16)                 # (Lq, D)
    return jnp.dot(o_all, wo, preferred_element_type=jnp.float32)       # (Lq, D)


def _self_attn(x, lnw, wqkv, wo, bias):
    h = _rmsnorm(x, lnw).astype(BF16)
    qkv = jnp.dot(h, wqkv, preferred_element_type=jnp.float32)          # (L, 3D)
    return x + _attention(qkv[:, :D_MODEL], qkv[:, D_MODEL:2 * D_MODEL],
                          qkv[:, 2 * D_MODEL:], bias, wo)


def _cross_attn(x, enc, lnw, wq, wkv, wo, bias):
    h = _rmsnorm(x, lnw).astype(BF16)
    q = jnp.dot(h, wq, preferred_element_type=jnp.float32)              # (Lq, D)
    kv = jnp.dot(enc.astype(BF16), wkv, preferred_element_type=jnp.float32)
    return x + _attention(q, kv[:, :D_MODEL], kv[:, D_MODEL:], bias, wo)


def _ffn(x, lnw, wi, wo):
    h = _rmsnorm(x, lnw).astype(BF16)
    h1 = jnp.maximum(jnp.dot(h, wi, preferred_element_type=jnp.float32), 0.0)
    return x + jnp.dot(h1.astype(BF16), wo, preferred_element_type=jnp.float32)


# --------------------------- the single fused kernel ---------------------------
def _fused_forward_kernel(
        ids_ref, lab_ref,                                   # scalar prefetch (SMEM)
        x_ref, mask_ref, abig_ref, wg_ref, bg_ref, wt_ref, bt_ref,
        emb_ref, embt_ref, ln_ref,
        enc_wqkv_ref, enc_wo_ref, enc_wi_ref, enc_woff_ref,
        dec_swqkv_ref, dec_swo_ref, dec_cwq_ref, dec_ckv_ref, dec_cwo_ref,
        dec_wi_ref, dec_woff_ref,
        logits_ref, idx_ref, loss_ref):
    b = pl.program_id(0)
    ln = ln_ref[...]                                        # (8, D) packed LN weights

    # --------- STA-GCN (simplified) + Transformation, frame-batched ---------
    # x rows are joint-major: row v*T + t == (joint v, frame t).  One
    # block-diagonal kron(adj, I_T) matmul replaces 16 per-frame (22,22) ones.
    xt = x_ref[0]                                                        # (VT, C)
    h = jnp.dot(xt.astype(BF16), wg_ref[...],
                preferred_element_type=jnp.float32) + bg_ref[...]        # (VT, CG)
    y = jnp.maximum(jnp.dot(abig_ref[...], h.astype(BF16),
                            preferred_element_type=jnp.float32), 0.0)    # (VT, CG)
    f = jnp.dot(y.astype(BF16), wt_ref[...],
                preferred_element_type=jnp.float32) + bt_ref[...]        # (VT, D)
    # TODO(synk): full STA-GCN temporal convs / attention branches / residual
    #             stack are omitted.

    # Joint max-pool + argmax (Transformation): joint v is rows [v*T,(v+1)*T).
    pooled = f[0:T_LEN, :]                                               # (T, D)
    amax = jnp.zeros((T_LEN, D_MODEL), jnp.int32)
    for v in range(1, V_JNT):                       # unrolled, VPU-only, no concat
        cur = f[v * T_LEN:(v + 1) * T_LEN, :]
        upd = cur > pooled
        amax = jnp.where(upd, v, amax)
        pooled = jnp.maximum(pooled, cur)
    idx_ref[0] = amax                                                    # (T, D)

    # ------------------------ attention masks (in-kernel) -------------------
    mask = mask_ref[0]                               # (1, T) f32, 1 = valid
    enc_bias = (1.0 - mask) * NEG_INF                # broadcasts over query rows
    ri = lax.broadcasted_iota(jnp.int32, (L_DEC, L_DEC), 0)
    ci = lax.broadcasted_iota(jnp.int32, (L_DEC, L_DEC), 1)
    causal_bias = jnp.where(ri >= ci, 0.0, NEG_INF)
    # TODO(synk): T5 relative-position attention bias omitted.

    # ------------------------------ encoder (1 layer) -----------------------
    xe = pooled                                      # transform_embedding (T, D)
    xe = _self_attn(xe, ln[0:1, :], enc_wqkv_ref[...], enc_wo_ref[...], enc_bias)
    xe = _ffn(xe, ln[1:2, :], enc_wi_ref[...], enc_woff_ref[...])

    # ------------------------------ decoder (1 layer) -----------------------
    # Embedding gather: ids from SMEM drive dynamic row slices of VMEM emb.
    rows = [emb_ref[pl.ds(ids_ref[b, l], 1), :] for l in range(L_DEC)]
    xd = jnp.concatenate(rows, axis=0)                                   # (L, D)

    xd = _self_attn(xd, ln[2:3, :], dec_swqkv_ref[...], dec_swo_ref[...],
                    causal_bias)
    xd = _cross_attn(xd, xe, ln[3:4, :], dec_cwq_ref[...], dec_ckv_ref[...],
                     dec_cwo_ref[...], enc_bias)
    xd = _ffn(xd, ln[4:5, :], dec_wi_ref[...], dec_woff_ref[...])

    # -------------------- final RMSNorm + tied LM head + CE -----------------
    hf = _rmsnorm(xd, ln[5:6, :]) * (D_MODEL ** -0.5)   # T5 tied-head scaling
    logits = jnp.dot(hf.astype(BF16), embt_ref[...],
                     preferred_element_type=jnp.float32)                 # (L, VOCAB)
    logits_ref[0] = logits

    m = jnp.max(logits, axis=-1, keepdims=True)
    lse = m + jnp.log(jnp.sum(jnp.exp(logits - m), axis=-1, keepdims=True))
    row_iota = lax.broadcasted_iota(jnp.int32, (L_DEC, 1), 0)
    lab_col = jnp.zeros((L_DEC, 1), jnp.int32)
    for l in range(L_DEC):                                  # build label column
        lab_col = jnp.where(row_iota == l, lab_ref[b, l], lab_col)
    voc_iota = lax.broadcasted_iota(jnp.int32, (L_DEC, VOCAB), 1)
    tgt = jnp.sum(jnp.where(voc_iota == lab_col, logits, 0.0),
                  axis=-1, keepdims=True)                                # (L, 1)
    # Per-token CE, broadcast to 128 lanes for a lane-dense store.
    loss_ref[0] = jnp.broadcast_to(lse - tgt, (L_DEC, 128))


# ------------------------------- BlockSpec maps --------------------------------
def _im_batch3(b, ids, labs):      # per-batch 3-D blocks
    return (b, 0, 0)


def _im_const2(b, ids, labs):      # shared 2-D weight blocks
    return (0, 0)


# --------------------------------- forward -------------------------------------
def model_forward(params, input_embedding, input_embedding_mask,
                  decoder_input_ids, labels):
    N = input_embedding.shape[0]

    # NCTV -> joint-major (N, V*T, C) so the kernel pools joints with static
    # contiguous slices (no in-kernel transpose/reshape).
    x_vt = jnp.transpose(input_embedding, (0, 3, 2, 1)).reshape(N, VT, C_IN)
    mask_f = input_embedding_mask.astype(jnp.float32).reshape(N, 1, T_LEN)

    grid_spec = pltpu.PrefetchScalarGridSpec(
        num_scalar_prefetch=2,                       # decoder_input_ids, labels
        grid=(N,),
        in_specs=[
            pl.BlockSpec((1, VT, C_IN), _im_batch3),             # x (joint-major)
            pl.BlockSpec((1, 1, T_LEN), _im_batch3),             # padding mask
            pl.BlockSpec((VT, VT), _im_const2),                  # kron(adj, I_T)
            pl.BlockSpec((C_IN, C_GCN), _im_const2),             # w_gcn
            pl.BlockSpec((1, C_GCN), _im_const2),                # b_gcn
            pl.BlockSpec((C_GCN, D_MODEL), _im_const2),          # w_trans
            pl.BlockSpec((1, D_MODEL), _im_const2),              # b_trans
            pl.BlockSpec((VOCAB, D_MODEL), _im_const2),          # emb (f32)
            pl.BlockSpec((D_MODEL, VOCAB), _im_const2),          # emb.T (bf16)
            pl.BlockSpec((8, D_MODEL), _im_const2),              # packed LN weights
            pl.BlockSpec((D_MODEL, 3 * D_MODEL), _im_const2),    # enc_wqkv
            pl.BlockSpec((D_MODEL, D_MODEL), _im_const2),        # enc_wo
            pl.BlockSpec((D_MODEL, D_FF), _im_const2),           # enc_wi
            pl.BlockSpec((D_FF, D_MODEL), _im_const2),           # enc_wo_ff
            pl.BlockSpec((D_MODEL, 3 * D_MODEL), _im_const2),    # dec_s_wqkv
            pl.BlockSpec((D_MODEL, D_MODEL), _im_const2),        # dec_s_wo
            pl.BlockSpec((D_MODEL, D_MODEL), _im_const2),        # dec_c_wq
            pl.BlockSpec((D_MODEL, 2 * D_MODEL), _im_const2),    # dec_c_wkv
            pl.BlockSpec((D_MODEL, D_MODEL), _im_const2),        # dec_c_wo
            pl.BlockSpec((D_MODEL, D_FF), _im_const2),           # dec_wi
            pl.BlockSpec((D_FF, D_MODEL), _im_const2),           # dec_wo_ff
        ],
        out_specs=(
            pl.BlockSpec((1, L_DEC, VOCAB), _im_batch3),         # logits
            pl.BlockSpec((1, T_LEN, D_MODEL), _im_batch3),       # max_indices
            pl.BlockSpec((1, L_DEC, 128), _im_batch3),           # per-token CE
        ),
    )

    logits, max_indices, loss_tok = pl.pallas_call(
        _fused_forward_kernel,
        grid_spec=grid_spec,
        out_shape=(jax.ShapeDtypeStruct((N, L_DEC, VOCAB), jnp.float32),
                   jax.ShapeDtypeStruct((N, T_LEN, D_MODEL), jnp.int32),
                   jax.ShapeDtypeStruct((N, L_DEC, 128), jnp.float32)),
        compiler_params=pltpu.CompilerParams(
            dimension_semantics=("parallel",)),      # one sample per TC on v7x
    )(decoder_input_ids.astype(jnp.int32), labels.astype(jnp.int32),
      x_vt, mask_f,
      params["a_big"], params["w_gcn"], params["b_gcn"],
      params["w_trans"], params["b_trans"],
      params["emb"], params["emb_t"], params["ln_all"],
      params["enc_wqkv"], params["enc_wo"], params["enc_wi"], params["enc_wo_ff"],
      params["dec_s_wqkv"], params["dec_s_wo"],
      params["dec_c_wq"], params["dec_c_wkv"], params["dec_c_wo"],
      params["dec_wi"], params["dec_wo_ff"])

    # TODO(synk): no ignore_index handling for padded labels (all labels valid).
    loss = jnp.sum(loss_tok[:, :, 0]) / (N * L_DEC)
    return loss, logits, max_indices


# ------------------------------ parameter init ---------------------------------
def build_adjacency(V):
    adj = jnp.eye(V)
    idx = jnp.arange(V - 1)
    adj = adj.at[idx, idx + 1].set(1.0)
    adj = adj.at[idx + 1, idx].set(1.0)           # chain graph + self loops
    deg = jnp.sum(adj, axis=-1)
    d = 1.0 / jnp.sqrt(deg)
    return (adj * d[:, None] * d[None, :]).astype(jnp.float32)


def init_params(key):
    keys = jax.random.split(key, 32)
    ki = iter(keys)

    def n(shape, dtype=jnp.float32):
        return (jax.random.normal(next(ki), shape, jnp.float32) * 0.02).astype(dtype)

    adj = build_adjacency(V_JNT)
    # Block-diagonal (per-frame) adjacency in joint-major row order.
    a_big = jnp.kron(adj, jnp.eye(T_LEN, dtype=jnp.float32)).astype(BF16)
    emb = n((VOCAB, D_MODEL))
    p = {
        "a_big": a_big,
        "w_gcn": n((C_IN, C_GCN), BF16), "b_gcn": n((1, C_GCN)),
        "w_trans": n((C_GCN, D_MODEL), BF16), "b_trans": n((1, D_MODEL)),
        "emb": emb,
        "emb_t": emb.T.astype(BF16),              # tied LM head, pre-transposed
        # rows: enc_ln1, enc_ln2, dec_ln1, dec_ln2, dec_ln3, dec_final_ln, pad, pad
        "ln_all": jnp.ones((8, D_MODEL), jnp.float32),
        # encoder layer
        "enc_wqkv": n((D_MODEL, 3 * D_MODEL), BF16),
        "enc_wo": n((D_MODEL, D_MODEL), BF16),
        "enc_wi": n((D_MODEL, D_FF), BF16), "enc_wo_ff": n((D_FF, D_MODEL), BF16),
        # decoder layer
        "dec_s_wqkv": n((D_MODEL, 3 * D_MODEL), BF16),
        "dec_s_wo": n((D_MODEL, D_MODEL), BF16),
        "dec_c_wq": n((D_MODEL, D_MODEL), BF16),
        "dec_c_wkv": n((D_MODEL, 2 * D_MODEL), BF16),
        "dec_c_wo": n((D_MODEL, D_MODEL), BF16),
        "dec_wi": n((D_MODEL, D_FF), BF16), "dec_wo_ff": n((D_FF, D_MODEL), BF16),
    }
    return p


# ------------------------------------ main --------------------------------------
if __name__ == "__main__":
    key = jax.random.PRNGKey(0)
    k_par, k_inp, k_dec, k_lab = jax.random.split(key, 4)

    params = init_params(k_par)

    # inputs matching the module's forward kwargs (synthetic, small)
    input_embedding = jax.random.normal(
        k_inp, (N_BATCH, C_IN, T_LEN, V_JNT), jnp.float32)       # NCTV skeleton
    input_embedding_mask = jnp.ones((N_BATCH, T_LEN), jnp.int32)
    input_embedding_mask = input_embedding_mask.at[1, 12:].set(0)  # ragged batch
    decoder_input_ids = jax.random.randint(k_dec, (N_BATCH, L_DEC), 0, VOCAB)
    labels = jax.random.randint(k_lab, (N_BATCH, L_DEC), 0, VOCAB)

    fwd = jax.jit(functools.partial(model_forward, params))
    loss, logits, max_indices = fwd(input_embedding, input_embedding_mask,
                                    decoder_input_ids, labels)
    jax.block_until_ready((loss, logits, max_indices))

    assert logits.shape == (N_BATCH, L_DEC, VOCAB)
    assert max_indices.shape == (N_BATCH, T_LEN, D_MODEL)
    assert jnp.isfinite(loss)
    print("KERNEL_OK")
</pallas_src>

<mosaic_0001>
module attributes {stable_mosaic.version = 11 : i64} {
  func.func @_fused_forward_kernel(%arg0: i32, %arg1: memref<2x8xi32, #tpu.memory_space<smem>>, %arg2: memref<2x8xi32, #tpu.memory_space<smem>>, %arg3: memref<1x352x6xf32, #tpu.memory_space<vmem>>, %arg4: memref<1x1x16xf32, #tpu.memory_space<vmem>>, %arg5: memref<352x352xbf16, #tpu.memory_space<vmem>>, %arg6: memref<6x64xbf16, #tpu.memory_space<vmem>>, %arg7: memref<1x64xf32, #tpu.memory_space<vmem>>, %arg8: memref<64x128xbf16, #tpu.memory_space<vmem>>, %arg9: memref<1x128xf32, #tpu.memory_space<vmem>>, %arg10: memref<384x128xf32, #tpu.memory_space<vmem>>, %arg11: memref<128x384xbf16, #tpu.memory_space<vmem>>, %arg12: memref<8x128xf32, #tpu.memory_space<vmem>>, %arg13: memref<128x384xbf16, #tpu.memory_space<vmem>>, %arg14: memref<128x128xbf16, #tpu.memory_space<vmem>>, %arg15: memref<128x256xbf16, #tpu.memory_space<vmem>>, %arg16: memref<256x128xbf16, #tpu.memory_space<vmem>>, %arg17: memref<128x384xbf16, #tpu.memory_space<vmem>>, %arg18: memref<128x128xbf16, #tpu.memory_space<vmem>>, %arg19: memref<128x128xbf16, #tpu.memory_space<vmem>>, %arg20: memref<128x256xbf16, #tpu.memory_space<vmem>>, %arg21: memref<128x128xbf16, #tpu.memory_space<vmem>>, %arg22: memref<128x256xbf16, #tpu.memory_space<vmem>>, %arg23: memref<256x128xbf16, #tpu.memory_space<vmem>>, %arg24: memref<1x8x384xf32, #tpu.memory_space<vmem>>, %arg25: memref<1x16x128xi32, #tpu.memory_space<vmem>>, %arg26: memref<1x8x128xf32, #tpu.memory_space<vmem>>) attributes {dimension_semantics = [#tpu.dimension_semantics<parallel>], iteration_bounds = array<i64: 2>, scalar_prefetch = 2 : i64, scratch_operands = 0 : i64, tpu.core_type = #tpu.core_type<tc>, window_params = [{transform_indices = @transform_0, window_bounds = array<i64: 1, 352, 6>}, {transform_indices = @transform_1, window_bounds = array<i64: 1, 1, 16>}, {pipeline_mode = #tpu.pipeline_mode<synchronous>, transform_indices = @transform_2, window_bounds = array<i64: 352, 352>}, {pipeline_mode = #tpu.pipeline_mode<synchronous>, transform_indices = @transform_3, window_bounds = array<i64: 6, 64>}, {pipeline_mode = #tpu.pipeline_mode<synchronous>, transform_indices = @transform_4, window_bounds = array<i64: 1, 64>}, {pipeline_mode = #tpu.pipeline_mode<synchronous>, transform_indices = @transform_5, window_bounds = array<i64: 64, 128>}, {pipeline_mode = #tpu.pipeline_mode<synchronous>, transform_indices = @transform_6, window_bounds = array<i64: 1, 128>}, {pipeline_mode = #tpu.pipeline_mode<synchronous>, transform_indices = @transform_7, window_bounds = array<i64: 384, 128>}, {pipeline_mode = #tpu.pipeline_mode<synchronous>, transform_indices = @transform_8, window_bounds = array<i64: 128, 384>}, {pipeline_mode = #tpu.pipeline_mode<synchronous>, transform_indices = @transform_9, window_bounds = array<i64: 8, 128>}, {pipeline_mode = #tpu.pipeline_mode<synchronous>, transform_indices = @transform_10, window_bounds = array<i64: 128, 384>}, {pipeline_mode = #tpu.pipeline_mode<synchronous>, transform_indices = @transform_11, window_bounds = array<i64: 128, 128>}, {pipeline_mode = #tpu.pipeline_mode<synchronous>, transform_indices = @transform_12, window_bounds = array<i64: 128, 256>}, {pipeline_mode = #tpu.pipeline_mode<synchronous>, transform_indices = @transform_13, window_bounds = array<i64: 256, 128>}, {pipeline_mode = #tpu.pipeline_mode<synchronous>, transform_indices = @transform_14, window_bounds = array<i64: 128, 384>}, {pipeline_mode = #tpu.pipeline_mode<synchronous>, transform_indices = @transform_15, window_bounds = array<i64: 128, 128>}, {pipeline_mode = #tpu.pipeline_mode<synchronous>, transform_indices = @transform_16, window_bounds = array<i64: 128, 128>}, {pipeline_mode = #tpu.pipeline_mode<synchronous>, transform_indices = @transform_17, window_bounds = array<i64: 128, 256>}, {pipeline_mode = #tpu.pipeline_mode<synchronous>, transform_indices = @transform_18, window_bounds = array<i64: 128, 128>}, {pipeline_mode = #tpu.pipeline_mode<synchronous>, transform_indices = @transform_19, window_bounds = array<i64: 128, 256>}, {pipeline_mode = #tpu.pipeline_mode<synchronous>, transform_indices = @transform_20, window_bounds = array<i64: 256, 128>}, {transform_indices = @transform_21, window_bounds = array<i64: 1, 8, 384>}, {transform_indices = @transform_22, window_bounds = array<i64: 1, 16, 128>}, {transform_indices = @transform_23, window_bounds = array<i64: 1, 8, 128>}]} {
    %c0 = arith.constant 0 : index
    %c0_0 = arith.constant 0 : index
    %0 = vector.load %arg12[%c0, %c0_0] : memref<8x128xf32, #tpu.memory_space<vmem>>, vector<8x128xf32>
    %c0_1 = arith.constant 0 : index
    %c0_2 = arith.constant 0 : index
    %c0_3 = arith.constant 0 : index
    %1 = vector.load %arg3[%c0_1, %c0_2, %c0_3] : memref<1x352x6xf32, #tpu.memory_space<vmem>>, vector<1x352x6xf32>
    %2 = vector.shape_cast %1 : vector<1x352x6xf32> to vector<352x6xf32>
    %3 = arith.truncf %2 : vector<352x6xf32> to vector<352x6xbf16>
    %c0_4 = arith.constant 0 : index
    %c0_5 = arith.constant 0 : index
    %4 = vector.load %arg6[%c0_4, %c0_5] : memref<6x64xbf16, #tpu.memory_space<vmem>>, vector<6x64xbf16>
    %cst = arith.constant dense<0.000000e+00> : vector<352x64xf32>
    %5 = tpu.matmul %3, %4, %cst {dimension_numbers = #tpu.dot_dimension_numbers<[1], [0], [0], [1], [0, 0, 1, 1], [], []>} : vector<352x6xbf16>, vector<6x64xbf16>, vector<352x64xf32> -> vector<352x64xf32>
    %c0_6 = arith.constant 0 : index
    %c0_7 = arith.constant 0 : index
    %6 = vector.load %arg7[%c0_6, %c0_7] : memref<1x64xf32, #tpu.memory_space<vmem>>, vector<1x64xf32>
    %7 = vector.broadcast %6 : vector<1x64xf32> to vector<352x64xf32>
    %8 = arith.addf %5, %7 : vector<352x64xf32>
    %c0_8 = arith.constant 0 : index
    %c0_9 = arith.constant 0 : index
    %9 = vector.load %arg5[%c0_8, %c0_9] : memref<352x352xbf16, #tpu.memory_space<vmem>>, vector<352x352xbf16>
    %10 = arith.truncf %8 : vector<352x64xf32> to vector<352x64xbf16>
    %cst_10 = arith.constant dense<0.000000e+00> : vector<352x64xf32>
    %11 = tpu.matmul %9, %10, %cst_10 {dimension_numbers = #tpu.dot_dimension_numbers<[1], [0], [0], [1], [0, 0, 1, 1], [], []>} : vector<352x352xbf16>, vector<352x64xbf16>, vector<352x64xf32> -> vector<352x64xf32>
    %cst_11 = arith.constant 0.000000e+00 : f32
    %12 = vector.broadcast %cst_11 : f32 to vector<352x64xf32>
    %13 = arith.maximumf %11, %12 : vector<352x64xf32>
    %14 = arith.truncf %13 : vector<352x64xf32> to vector<352x64xbf16>
    %c0_12 = arith.constant 0 : index
    %c0_13 = arith.constant 0 : index
    %15 = vector.load %arg8[%c0_12, %c0_13] : memref<64x128xbf16, #tpu.memory_space<vmem>>, vector<64x128xbf16>
    %cst_14 = arith.constant dense<0.000000e+00> : vector<352x128xf32>
    %16 = tpu.matmul %14, %15, %cst_14 {dimension_numbers = #tpu.dot_dimension_numbers<[1], [0], [0], [1], [0, 0, 1, 1], [], []>} : vector<352x64xbf16>, vector<64x128xbf16>, vector<352x128xf32> -> vector<352x128xf32>
    %c0_15 = arith.constant 0 : index
    %c0_16 = arith.constant 0 : index
    %17 = vector.load %arg9[%c0_15, %c0_16] : memref<1x128xf32, #tpu.memory_space<vmem>>, vector<1x128xf32>
    %18 = vector.broadcast %17 : vector<1x128xf32> to vector<352x128xf32>
    %19 = arith.addf %16, %18 : vector<352x128xf32>
    %20 = vector.extract_strided_slice %19 {offsets = [0, 0], sizes = [16, 128], strides = [1, 1]} : vector<352x128xf32> to vector<16x128xf32>
    %c0_i32 = arith.constant 0 : i32
    %21 = vector.broadcast %c0_i32 : i32 to vector<16x128xi32>
    %22 = vector.extract_strided_slice %19 {offsets = [16, 0], sizes = [16, 128], strides = [1, 1]} : vector<352x128xf32> to vector<16x128xf32>
    %23 = arith.cmpf ogt, %22, %20 : vector<16x128xf32>
    %c1_i32 = arith.constant 1 : i32
    %24 = vector.broadcast %c1_i32 : i32 to vector<16x128xi32>
    %25 = arith.select %23, %24, %21 : vector<16x128xi1>, vector<16x128xi32>
    %26 = arith.maximumf %20, %22 : vector<16x128xf32>
    %27 = vector.extract_strided_slice %19 {offsets = [32, 0], sizes = [16, 128], strides = [1, 1]} : vector<352x128xf32> to vector<16x128xf32>
    %28 = arith.cmpf ogt, %27, %26 : vector<16x128xf32>
    %c2_i32 = arith.constant 2 : i32
    %29 = vector.broadcast %c2_i32 : i32 to vector<16x128xi32>
    %30 = arith.select %28, %29, %25 : vector<16x128xi1>, vector<16x128xi32>
    %31 = arith.maximumf %26, %27 : vector<16x128xf32>
    %32 = vector.extract_strided_slice %19 {offsets = [48, 0], sizes = [16, 128], strides = [1, 1]} : vector<352x128xf32> to vector<16x128xf32>
    %33 = arith.cmpf ogt, %32, %31 : vector<16x128xf32>
    %c3_i32 = arith.constant 3 : i32
    %34 = vector.broadcast %c3_i32 : i32 to vector<16x128xi32>
    %35 = arith.select %33, %34, %30 : vector<16x128xi1>, vector<16x128xi32>
    %36 = arith.maximumf %31, %32 : vector<16x128xf32>
    %37 = vector.extract_strided_slice %19 {offsets = [64, 0], sizes = [16, 128], strides = [1, 1]} : vector<352x128xf32> to vector<16x128xf32>
    %38 = arith.cmpf ogt, %37, %36 : vector<16x128xf32>
    %c4_i32 = arith.constant 4 : i32
    %39 = vector.broadcast %c4_i32 : i32 to vector<16x128xi32>
    %40 = arith.select %38, %39, %35 : vector<16x128xi1>, vector<16x128xi32>
    %41 = arith.maximumf %36, %37 : vector<16x128xf32>
    %42 = vector.extract_strided_slice %19 {offsets = [80, 0], sizes = [16, 128], strides = [1, 1]} : vector<352x128xf32> to vector<16x128xf32>
    %43 = arith.cmpf ogt, %42, %41 : vector<16x128xf32>
    %c5_i32 = arith.constant 5 : i32
    %44 = vector.broadcast %c5_i32 : i32 to vector<16x128xi32>
    %45 = arith.select %43, %44, %40 : vector<16x128xi1>, vector<16x128xi32>
    %46 = arith.maximumf %41, %42 : vector<16x128xf32>
    %47 = vector.extract_strided_slice %19 {offsets = [96, 0], sizes = [16, 128], strides = [1, 1]} : vector<352x128xf32> to vector<16x128xf32>
    %48 = arith.cmpf ogt, %47, %46 : vector<16x128xf32>
    %c6_i32 = arith.constant 6 : i32
    %49 = vector.broadcast %c6_i32 : i32 to vector<16x128xi32>
    %50 = arith.select %48, %49, %45 : vector<16x128xi1>, vector<16x128xi32>
    %51 = arith.maximumf %46, %47 : vector<16x128xf32>
    %52 = vector.extract_strided_slice %19 {offsets = [112, 0], sizes = [16, 128], strides = [1, 1]} : vector<352x128xf32> to vector<16x128xf32>
    %53 = arith.cmpf ogt, %52, %51 : vector<16x128xf32>
    %c7_i32 = arith.constant 7 : i32
    %54 = vector.broadcast %c7_i32 : i32 to vector<16x128xi32>
    %55 = arith.select %53, %54, %50 : vector<16x128xi1>, vector<16x128xi32>
    %56 = arith.maximumf %51, %52 : vector<16x128xf32>
    %57 = vector.extract_strided_slice %19 {offsets = [128, 0], sizes = [16, 128], strides = [1, 1]} : vector<352x128xf32> to vector<16x128xf32>
    %58 = arith.cmpf ogt, %57, %56 : vector<16x128xf32>
    %c8_i32 = arith.constant 8 : i32
    %59 = vector.broadcast %c8_i32 : i32 to vector<16x128xi32>
    %60 = arith.select %58, %59, %55 : vector<16x128xi1>, vector<16x128xi32>
    %61 = arith.maximumf %56, %57 : vector<16x128xf32>
    %62 = vector.extract_strided_slice %19 {offsets = [144, 0], sizes = [16, 128], strides = [1, 1]} : vector<352x128xf32> to vector<16x128xf32>
    %63 = arith.cmpf ogt, %62, %61 : vector<16x128xf32>
    %c9_i32 = arith.constant 9 : i32
    %64 = vector.broadcast %c9_i32 : i32 to vector<16x128xi32>
    %65 = arith.select %63, %64, %60 : vector<16x128xi1>, vector<16x128xi32>
    %66 = arith.maximumf %61, %62 : vector<16x128xf32>
    %67 = vector.extract_strided_slice %19 {offsets = [160, 0], sizes = [16, 128], strides = [1, 1]} : vector<352x128xf32> to vector<16x128xf32>
    %68 = arith.cmpf ogt, %67, %66 : vector<16x128xf32>
    %c10_i32 = arith.constant 10 : i32
    %69 = vector.broadcast %c10_i32 : i32 to vector<16x128xi32>
    %70 = arith.select %68, %69, %65 : vector<16x128xi1>, vector<16x128xi32>
    %71 = arith.maximumf %66, %67 : vector<16x128xf32>
    %72 = vector.extract_strided_slice %19 {offsets = [176, 0], sizes = [16, 128], strides = [1, 1]} : vector<352x128xf32> to vector<16x128xf32>
    %73 = arith.cmpf ogt, %72, %71 : vector<16x128xf32>
    %c11_i32 = arith.constant 11 : i32
    %74 = vector.broadcast %c11_i32 : i32 to vector<16x128xi32>
    %75 = arith.select %73, %74, %70 : vector<16x128xi1>, vector<16x128xi32>
    %76 = arith.maximumf %71, %72 : vector<16x128xf32>
    %77 = vector.extract_strided_slice %19 {offsets = [192, 0], sizes = [16, 128], strides = [1, 1]} : vector<352x128xf32> to vector<16x128xf32>
    %78 = arith.cmpf ogt, %77, %76 : vector<16x128xf32>
    %c12_i32 = arith.constant 12 : i32
    %79 = vector.broadcast %c12_i32 : i32 to vector<16x128xi32>
    %80 = arith.select %78, %79, %75 : vector<16x128xi1>, vector<16x128xi32>
    %81 = arith.maximumf %76, %77 : vector<16x128xf32>
    %82 = vector.extract_strided_slice %19 {offsets = [208, 0], sizes = [16, 128], strides = [1, 1]} : vector<352x128xf32> to vector<16x128xf32>
    %83 = arith.cmpf ogt, %82, %81 : vector<16x128xf32>
    %c13_i32 = arith.constant 13 : i32
    %84 = vector.broadcast %c13_i32 : i32 to vector<16x128xi32>
    %85 = arith.select %83, %84, %80 : vector<16x128xi1>, vector<16x128xi32>
    %86 = arith.maximumf %81, %82 : vector<16x128xf32>
    %87 = vector.extract_strided_slice %19 {offsets = [224, 0], sizes = [16, 128], strides = [1, 1]} : vector<352x128xf32> to vector<16x128xf32>
    %88 = arith.cmpf ogt, %87, %86 : vector<16x128xf32>
    %c14_i32 = arith.constant 14 : i32
    %89 = vector.broadcast %c14_i32 : i32 to vector<16x128xi32>
    %90 = arith.select %88, %89, %85 : vector<16x128xi1>, vector<16x128xi32>
    %91 = arith.maximumf %86, %87 : vector<16x128xf32>
    %92 = vector.extract_strided_slice %19 {offsets = [240, 0], sizes = [16, 128], strides = [1, 1]} : vector<352x128xf32> to vector<16x128xf32>
    %93 = arith.cmpf ogt, %92, %91 : vector<16x128xf32>
    %c15_i32 = arith.constant 15 : i32
    %94 = vector.broadcast %c15_i32 : i32 to vector<16x128xi32>
    %95 = arith.select %93, %94, %90 : vector<16x128xi1>, vector<16x128xi32>
    %96 = arith.maximumf %91, %92 : vector<16x128xf32>
    %97 = vector.extract_strided_slice %19 {offsets = [256, 0], sizes = [16, 128], strides = [1, 1]} : vector<352x128xf32> to vector<16x128xf32>
    %98 = arith.cmpf ogt, %97, %96 : vector<16x128xf32>
    %c16_i32 = arith.constant 16 : i32
    %99 = vector.broadcast %c16_i32 : i32 to vector<16x128xi32>
    %100 = arith.select %98, %99, %95 : vector<16x128xi1>, vector<16x128xi32>
    %101 = arith.maximumf %96, %97 : vector<16x128xf32>
    %102 = vector.extract_strided_slice %19 {offsets = [272, 0], sizes = [16, 128], strides = [1, 1]} : vector<352x128xf32> to vector<16x128xf32>
    %103 = arith.cmpf ogt, %102, %101 : vector<16x128xf32>
    %c17_i32 = arith.constant 17 : i32
    %104 = vector.broadcast %c17_i32 : i32 to vector<16x128xi32>
    %105 = arith.select %103, %104, %100 : vector<16x128xi1>, vector<16x128xi32>
    %106 = arith.maximumf %101, %102 : vector<16x128xf32>
    %107 = vector.extract_strided_slice %19 {offsets = [288, 0], sizes = [16, 128], strides = [1, 1]} : vector<352x128xf32> to vector<16x128xf32>
    %108 = arith.cmpf ogt, %107, %106 : vector<16x128xf32>
    %c18_i32 = arith.constant 18 : i32
    %109 = vector.broadcast %c18_i32 : i32 to vector<16x128xi32>
    %110 = arith.select %108, %109, %105 : vector<16x128xi1>, vector<16x128xi32>
    %111 = arith.maximumf %106, %107 : vector<16x128xf32>
    %112 = vector.extract_strided_slice %19 {offsets = [304, 0], sizes = [16, 128], strides = [1, 1]} : vector<352x128xf32> to vector<16x128xf32>
    %113 = arith.cmpf ogt, %112, %111 : vector<16x128xf32>
    %c19_i32 = arith.constant 19 : i32
    %114 = vector.broadcast %c19_i32 : i32 to vector<16x128xi32>
    %115 = arith.select %113, %114, %110 : vector<16x128xi1>, vector<16x128xi32>
    %116 = arith.maximumf %111, %112 : vector<16x128xf32>
    %117 = vector.extract_strided_slice %19 {offsets = [320, 0], sizes = [16, 128], strides = [1, 1]} : vector<352x128xf32> to vector<16x128xf32>
    %118 = arith.cmpf ogt, %117, %116 : vector<16x128xf32>
    %c20_i32 = arith.constant 20 : i32
    %119 = vector.broadcast %c20_i32 : i32 to vector<16x128xi32>
    %120 = arith.select %118, %119, %115 : vector<16x128xi1>, vector<16x128xi32>
    %121 = arith.maximumf %116, %117 : vector<16x128xf32>
    %122 = vector.extract_strided_slice %19 {offsets = [336, 0], sizes = [16, 128], strides = [1, 1]} : vector<352x128xf32> to vector<16x128xf32>
    %123 = arith.cmpf ogt, %122, %121 : vector<16x128xf32>
    %c21_i32 = arith.constant 21 : i32
    %124 = vector.broadcast %c21_i32 : i32 to vector<16x128xi32>
    %125 = arith.select %123, %124, %120 : vector<16x128xi1>, vector<16x128xi32>
    %126 = arith.maximumf %121, %122 : vector<16x128xf32>
    %c0_17 = arith.constant 0 : index
    %c0_18 = arith.constant 0 : index
    %c0_19 = arith.constant 0 : index
    %127 = vector.load %arg25[%c0_17, %c0_18, %c0_19] : memref<1x16x128xi32, #tpu.memory_space<vmem>>, vector<1x16x128xi32>
    %128 = vector.shape_cast %127 : vector<1x16x128xi32> to vector<16x128xi32>
    %129 = vector.shape_cast %125 : vector<16x128xi32> to vector<1x16x128xi32>
    tpu.vector_store %arg25[%c0_17, %c0_18, %c0_19], %129 {strides = array<i32>} : memref<1x16x128xi32, #tpu.memory_space<vmem>>, vector<1x16x128xi32>,
    %c0_20 = arith.constant 0 : index
    %c0_21 = arith.constant 0 : index
    %c0_22 = arith.constant 0 : index
    %130 = vector.load %arg4[%c0_20, %c0_21, %c0_22] : memref<1x1x16xf32, #tpu.memory_space<vmem>>, vector<1x1x16xf32>
    %131 = vector.shape_cast %130 : vector<1x1x16xf32> to vector<1x16xf32>
    %cst_23 = arith.constant 1.000000e+00 : f32
    %132 = vector.broadcast %cst_23 : f32 to vector<1x16xf32>
    %133 = arith.subf %132, %131 : vector<1x16xf32>
    %cst_24 = arith.constant -1.000000e+09 : f32
    %134 = vector.broadcast %cst_24 : f32 to vector<1x16xf32>
    %135 = arith.mulf %133, %134 : vector<1x16xf32>
    %136 = tpu.iota {dimensions = array<i32: 0>} : vector<8x8xi32>
    %137 = tpu.iota {dimensions = array<i32: 1>} : vector<8x8xi32>
    %138 = arith.cmpi sge, %136, %137 : vector<8x8xi32>
    %cst_25 = arith.constant 0.000000e+00 : f32
    %cst_26 = arith.constant -1.000000e+09 : f32
    %139 = vector.broadcast %cst_25 : f32 to vector<8x8xf32>
    %140 = vector.broadcast %cst_26 : f32 to vector<8x8xf32>
    %141 = arith.select %138, %139, %140 : vector<8x8xi1>, vector<8x8xf32>
    %142 = vector.extract_strided_slice %0 {offsets = [0, 0], sizes = [1, 128], strides = [1, 1]} : vector<8x128xf32> to vector<1x128xf32>
    %c0_27 = arith.constant 0 : index
    %c0_28 = arith.constant 0 : index
    %143 = vector.load %arg13[%c0_27, %c0_28] : memref<128x384xbf16, #tpu.memory_space<vmem>>, vector<128x384xbf16>
    %c0_29 = arith.constant 0 : index
    %c0_30 = arith.constant 0 : index
    %144 = vector.load %arg14[%c0_29, %c0_30] : memref<128x128xbf16, #tpu.memory_space<vmem>>, vector<128x128xbf16>
    %145 = arith.mulf %126, %126 : vector<16x128xf32>
    %cst_31 = arith.constant dense<0.000000e+00> : vector<16xf32>
    %146 = vector.multi_reduction <add>, %145, %cst_31 [1] : vector<16x128xf32> to vector<16xf32>
    %147 = vector.shape_cast %146 : vector<16xf32> to vector<16x1xf32>
    %cst_32 = arith.constant 1.280000e+02 : f32
    %148 = vector.broadcast %cst_32 : f32 to vector<16x1xf32>
    %149 = arith.divf %147, %148 : vector<16x1xf32>
    %cst_33 = arith.constant 9.99999997E-7 : f32
    %150 = vector.broadcast %cst_33 : f32 to vector<16x1xf32>
    %151 = arith.addf %149, %150 : vector<16x1xf32>
    %152 = math.rsqrt %151 : vector<16x1xf32>
    %153 = vector.broadcast %152 : vector<16x1xf32> to vector<16x128xf32>
    %154 = arith.mulf %126, %153 : vector<16x128xf32>
    %155 = vector.broadcast %142 : vector<1x128xf32> to vector<16x128xf32>
    %156 = arith.mulf %154, %155 : vector<16x128xf32>
    %157 = arith.truncf %156 : vector<16x128xf32> to vector<16x128xbf16>
    %cst_34 = arith.constant dense<0.000000e+00> : vector<16x384xf32>
    %158 = tpu.matmul %157, %143, %cst_34 {dimension_numbers = #tpu.dot_dimension_numbers<[1], [0], [0], [1], [0, 0, 1, 1], [], []>} : vector<16x128xbf16>, vector<128x384xbf16>, vector<16x384xf32> -> vector<16x384xf32>
    %159 = vector.extract_strided_slice %158 {offsets = [0, 0], sizes = [16, 128], strides = [1, 1]} : vector<16x384xf32> to vector<16x128xf32>
    %160 = vector.extract_strided_slice %158 {offsets = [0, 128], sizes = [16, 128], strides = [1, 1]} : vector<16x384xf32> to vector<16x128xf32>
    %161 = vector.extract_strided_slice %158 {offsets = [0, 256], sizes = [16, 128], strides = [1, 1]} : vector<16x384xf32> to vector<16x128xf32>
    %162 = vector.extract_strided_slice %159 {offsets = [0, 0], sizes = [16, 32], strides = [1, 1]} : vector<16x128xf32> to vector<16x32xf32>
    %163 = arith.truncf %162 : vector<16x32xf32> to vector<16x32xbf16>
    %164 = vector.extract_strided_slice %160 {offsets = [0, 0], sizes = [16, 32], strides = [1, 1]} : vector<16x128xf32> to vector<16x32xf32>
    %165 = arith.truncf %164 : vector<16x32xf32> to vector<16x32xbf16>
    %166 = vector.extract_strided_slice %161 {offsets = [0, 0], sizes = [16, 32], strides = [1, 1]} : vector<16x128xf32> to vector<16x32xf32>
    %167 = arith.truncf %166 : vector<16x32xf32> to vector<16x32xbf16>
    %cst_35 = arith.constant dense<0.000000e+00> : vector<16x16xf32>
    %168 = tpu.matmul %163, %165, %cst_35 {dimension_numbers = #tpu.dot_dimension_numbers<[1], [1], [0], [0], [0, 0, 1, 0], [], []>} : vector<16x32xbf16>, vector<16x32xbf16>, vector<16x16xf32> -> vector<16x16xf32>
    %169 = vector.broadcast %135 : vector<1x16xf32> to vector<16x16xf32>
    %170 = arith.addf %168, %169 : vector<16x16xf32>
    %cst_36 = arith.constant dense<0xFF800000> : vector<16xf32>
    %171 = vector.multi_reduction <maximumf>, %170, %cst_36 [1] : vector<16x16xf32> to vector<16xf32>
    %172 = vector.shape_cast %171 : vector<16xf32> to vector<16x1xf32>
    %173 = vector.broadcast %172 : vector<16x1xf32> to vector<16x16xf32>
    %174 = arith.subf %170, %173 : vector<16x16xf32>
    %175 = math.exp %174 : vector<16x16xf32>
    %cst_37 = arith.constant dense<0.000000e+00> : vector<16xf32>
    %176 = vector.multi_reduction <add>, %175, %cst_37 [1] : vector<16x16xf32> to vector<16xf32>
    %177 = vector.shape_cast %176 : vector<16xf32> to vector<16x1xf32>
    %178 = tpu.reciprocal %177 {approx = true} : vector<16x1xf32> -> vector<16x1xf32>
    %179 = vector.broadcast %178 : vector<16x1xf32> to vector<16x16xf32>
    %180 = arith.mulf %175, %179 : vector<16x16xf32>
    %181 = arith.truncf %180 : vector<16x16xf32> to vector<16x16xbf16>
    %cst_38 = arith.constant dense<0.000000e+00> : vector<16x32xf32>
    %182 = tpu.matmul %181, %167, %cst_38 {dimension_numbers = #tpu.dot_dimension_numbers<[1], [0], [0], [1], [0, 0, 1, 1], [], []>} : vector<16x16xbf16>, vector<16x32xbf16>, vector<16x32xf32> -> vector<16x32xf32>
    %183 = vector.extract_strided_slice %159 {offsets = [0, 32], sizes = [16, 32], strides = [1, 1]} : vector<16x128xf32> to vector<16x32xf32>
    %184 = arith.truncf %183 : vector<16x32xf32> to vector<16x32xbf16>
    %185 = vector.extract_strided_slice %160 {offsets = [0, 32], sizes = [16, 32], strides = [1, 1]} : vector<16x128xf32> to vector<16x32xf32>
    %186 = arith.truncf %185 : vector<16x32xf32> to vector<16x32xbf16>
    %187 = vector.extract_strided_slice %161 {offsets = [0, 32], sizes = [16, 32], strides = [1, 1]} : vector<16x128xf32> to vector<16x32xf32>
    %188 = arith.truncf %187 : vector<16x32xf32> to vector<16x32xbf16>
    %cst_39 = arith.constant dense<0.000000e+00> : vector<16x16xf32>
    %189 = tpu.matmul %184, %186, %cst_39 {dimension_numbers = #tpu.dot_dimension_numbers<[1], [1], [0], [0], [0, 0, 1, 0], [], []>} : vector<16x32xbf16>, vector<16x32xbf16>, vector<16x16xf32> -> vector<16x16xf32>
    %190 = vector.broadcast %135 : vector<1x16xf32> to vector<16x16xf32>
    %191 = arith.addf %189, %190 : vector<16x16xf32>
    %cst_40 = arith.constant dense<0xFF800000> : vector<16xf32>
    %192 = vector.multi_reduction <maximumf>, %191, %cst_40 [1] : vector<16x16xf32> to vector<16xf32>
    %193 = vector.shape_cast %192 : vector<16xf32> to vector<16x1xf32>
    %194 = vector.broadcast %193 : vector<16x1xf32> to vector<16x16xf32>
    %195 = arith.subf %191, %194 : vector<16x16xf32>
    %196 = math.exp %195 : vector<16x16xf32>
    %cst_41 = arith.constant dense<0.000000e+00> : vector<16xf32>
    %197 = vector.multi_reduction <add>, %196, %cst_41 [1] : vector<16x16xf32> to vector<16xf32>
    %198 = vector.shape_cast %197 : vector<16xf32> to vector<16x1xf32>
    %199 = tpu.reciprocal %198 {approx = true} : vector<16x1xf32> -> vector<16x1xf32>
    %200 = vector.broadcast %199 : vector<16x1xf32> to vector<16x16xf32>
    %201 = arith.mulf %196, %200 : vector<16x16xf32>
    %202 = arith.truncf %201 : vector<16x16xf32> to vector<16x16xbf16>
    %cst_42 = arith.constant dense<0.000000e+00> : vector<16x32xf32>
    %203 = tpu.matmul %202, %188, %cst_42 {dimension_numbers = #tpu.dot_dimension_numbers<[1], [0], [0], [1], [0, 0, 1, 1], [], []>} : vector<16x16xbf16>, vector<16x32xbf16>, vector<16x32xf32> -> vector<16x32xf32>
    %204 = vector.extract_strided_slice %159 {offsets = [0, 64], sizes = [16, 32], strides = [1, 1]} : vector<16x128xf32> to vector<16x32xf32>
    %205 = arith.truncf %204 : vector<16x32xf32> to vector<16x32xbf16>
    %206 = vector.extract_strided_slice %160 {offsets = [0, 64], sizes = [16, 32], strides = [1, 1]} : vector<16x128xf32> to vector<16x32xf32>
    %207 = arith.truncf %206 : vector<16x32xf32> to vector<16x32xbf16>
    %208 = vector.extract_strided_slice %161 {offsets = [0, 64], sizes = [16, 32], strides = [1, 1]} : vector<16x128xf32> to vector<16x32xf32>
    %209 = arith.truncf %208 : vector<16x32xf32> to vector<16x32xbf16>
    %cst_43 = arith.constant dense<0.000000e+00> : vector<16x16xf32>
    %210 = tpu.matmul %205, %207, %cst_43 {dimension_numbers = #tpu.dot_dimension_numbers<[1], [1], [0], [0], [0, 0, 1, 0], [], []>} : vector<16x32xbf16>, vector<16x32xbf16>, vector<16x16xf32> -> vector<16x16xf32>
    %211 = vector.broadcast %135 : vector<1x16xf32> to vector<16x16xf32>
    %212 = arith.addf %210, %211 : vector<16x16xf32>
    %cst_44 = arith.constant dense<0xFF800000> : vector<16xf32>
    %213 = vector.multi_reduction <maximumf>, %212, %cst_44 [1] : vector<16x16xf32> to vector<16xf32>
    %214 = vector.shape_cast %213 : vector<16xf32> to vector<16x1xf32>
    %215 = vector.broadcast %214 : vector<16x1xf32> to vector<16x16xf32>
    %216 = arith.subf %212, %215 : vector<16x16xf32>
    %217 = math.exp %216 : vector<16x16xf32>
    %cst_45 = arith.constant dense<0.000000e+00> : vector<16xf32>
    %218 = vector.multi_reduction <add>, %217, %cst_45 [1] : vector<16x16xf32> to vector<16xf32>
    %219 = vector.shape_cast %218 : vector<16xf32> to vector<16x1xf32>
    %220 = tpu.reciprocal %219 {approx = true} : vector<16x1xf32> -> vector<16x1xf32>
    %221 = vector.broadcast %220 : vector<16x1xf32> to vector<16x16xf32>
    %222 = arith.mulf %217, %221 : vector<16x16xf32>
    %223 = arith.truncf %222 : vector<16x16xf32> to vector<16x16xbf16>
    %cst_46 = arith.constant dense<0.000000e+00> : vector<16x32xf32>
    %224 = tpu.matmul %223, %209, %cst_46 {dimension_numbers = #tpu.dot_dimension_numbers<[1], [0], [0], [1], [0, 0, 1, 1], [], []>} : vector<16x16xbf16>, vector<16x32xbf16>, vector<16x32xf32> -> vector<16x32xf32>
    %225 = vector.extract_strided_slice %159 {offsets = [0, 96], sizes = [16, 32], strides = [1, 1]} : vector<16x128xf32> to vector<16x32xf32>
    %226 = arith.truncf %225 : vector<16x32xf32> to vector<16x32xbf16>
    %227 = vector.extract_strided_slice %160 {offsets = [0, 96], sizes = [16, 32], strides = [1, 1]} : vector<16x128xf32> to vector<16x32xf32>
    %228 = arith.truncf %227 : vector<16x32xf32> to vector<16x32xbf16>
    %229 = vector.extract_strided_slice %161 {offsets = [0, 96], sizes = [16, 32], strides = [1, 1]} : vector<16x128xf32> to vector<16x32xf32>
    %230 = arith.truncf %229 : vector<16x32xf32> to vector<16x32xbf16>
    %cst_47 = arith.constant dense<0.000000e+00> : vector<16x16xf32>
    %231 = tpu.matmul %226, %228, %cst_47 {dimension_numbers = #tpu.dot_dimension_numbers<[1], [1], [0], [0], [0, 0, 1, 0], [], []>} : vector<16x32xbf16>, vector<16x32xbf16>, vector<16x16xf32> -> vector<16x16xf32>
    %232 = vector.broadcast %135 : vector<1x16xf32> to vector<16x16xf32>
    %233 = arith.addf %231, %232 : vector<16x16xf32>
    %cst_48 = arith.constant dense<0xFF800000> : vector<16xf32>
    %234 = vector.multi_reduction <maximumf>, %233, %cst_48 [1] : vector<16x16xf32> to vector<16xf32>
    %235 = vector.shape_cast %234 : vector<16xf32> to vector<16x1xf32>
    %236 = vector.broadcast %235 : vector<16x1xf32> to vector<16x16xf32>
    %237 = arith.subf %233, %236 : vector<16x16xf32>
    %238 = math.exp %237 : vector<16x16xf32>
    %cst_49 = arith.constant dense<0.000000e+00> : vector<16xf32>
    %239 = vector.multi_reduction <add>, %238, %cst_49 [1] : vector<16x16xf32> to vector<16xf32>
    %240 = vector.shape_cast %239 : vector<16xf32> to vector<16x1xf32>
    %241 = tpu.reciprocal %240 {approx = true} : vector<16x1xf32> -> vector<16x1xf32>
    %242 = vector.broadcast %241 : vector<16x1xf32> to vector<16x16xf32>
    %243 = arith.mulf %238, %242 : vector<16x16xf32>
    %244 = arith.truncf %243 : vector<16x16xf32> to vector<16x16xbf16>
    %cst_50 = arith.constant dense<0.000000e+00> : vector<16x32xf32>
    %245 = tpu.matmul %244, %230, %cst_50 {dimension_numbers = #tpu.dot_dimension_numbers<[1], [0], [0], [1], [0, 0, 1, 1], [], []>} : vector<16x16xbf16>, vector<16x32xbf16>, vector<16x32xf32> -> vector<16x32xf32>
    %246 = tpu.concatenate %182, %203, %224, %245 in 1 : vector<16x32xf32>, vector<16x32xf32>, vector<16x32xf32>, vector<16x32xf32> -> vector<16x128xf32>
    %247 = arith.truncf %246 : vector<16x128xf32> to vector<16x128xbf16>
    %cst_51 = arith.constant dense<0.000000e+00> : vector<16x128xf32>
    %248 = tpu.matmul %247, %144, %cst_51 {dimension_numbers = #tpu.dot_dimension_numbers<[1], [0], [0], [1], [0, 0, 1, 1], [], []>} : vector<16x128xbf16>, vector<128x128xbf16>, vector<16x128xf32> -> vector<16x128xf32>
    %249 = arith.addf %126, %248 : vector<16x128xf32>
    %250 = vector.extract_strided_slice %0 {offsets = [1, 0], sizes = [1, 128], strides = [1, 1]} : vector<8x128xf32> to vector<1x128xf32>
    %c0_52 = arith.constant 0 : index
    %c0_53 = arith.constant 0 : index
    %251 = vector.load %arg15[%c0_52, %c0_53] : memref<128x256xbf16, #tpu.memory_space<vmem>>, vector<128x256xbf16>
    %c0_54 = arith.constant 0 : index
    %c0_55 = arith.constant 0 : index
    %252 = vector.load %arg16[%c0_54, %c0_55] : memref<256x128xbf16, #tpu.memory_space<vmem>>, vector<256x128xbf16>
    %253 = arith.mulf %249, %249 : vector<16x128xf32>
    %cst_56 = arith.constant dense<0.000000e+00> : vector<16xf32>
    %254 = vector.multi_reduction <add>, %253, %cst_56 [1] : vector<16x128xf32> to vector<16xf32>
    %255 = vector.shape_cast %254 : vector<16xf32> to vector<16x1xf32>
    %cst_57 = arith.constant 1.280000e+02 : f32
    %256 = vector.broadcast %cst_57 : f32 to vector<16x1xf32>
    %257 = arith.divf %255, %256 : vector<16x1xf32>
    %cst_58 = arith.constant 9.99999997E-7 : f32
    %258 = vector.broadcast %cst_58 : f32 to vector<16x1xf32>
    %259 = arith.addf %257, %258 : vector<16x1xf32>
    %260 = math.rsqrt %259 : vector<16x1xf32>
    %261 = vector.broadcast %260 : vector<16x1xf32> to vector<16x128xf32>
    %262 = arith.mulf %249, %261 : vector<16x128xf32>
    %263 = vector.broadcast %250 : vector<1x128xf32> to vector<16x128xf32>
    %264 = arith.mulf %262, %263 : vector<16x128xf32>
    %265 = arith.truncf %264 : vector<16x128xf32> to vector<16x128xbf16>
    %cst_59 = arith.constant dense<0.000000e+00> : vector<16x256xf32>
    %266 = tpu.matmul %265, %251, %cst_59 {dimension_numbers = #tpu.dot_dimension_numbers<[1], [0], [0], [1], [0, 0, 1, 1], [], []>} : vector<16x128xbf16>, vector<128x256xbf16>, vector<16x256xf32> -> vector<16x256xf32>
    %cst_60 = arith.constant 0.000000e+00 : f32
    %267 = vector.broadcast %cst_60 : f32 to vector<16x256xf32>
    %268 = arith.maximumf %266, %267 : vector<16x256xf32>
    %269 = arith.truncf %268 : vector<16x256xf32> to vector<16x256xbf16>
    %cst_61 = arith.constant dense<0.000000e+00> : vector<16x128xf32>
    %270 = tpu.matmul %269, %252, %cst_61 {dimension_numbers = #tpu.dot_dimension_numbers<[1], [0], [0], [1], [0, 0, 1, 1], [], []>} : vector<16x256xbf16>, vector<256x128xbf16>, vector<16x128xf32> -> vector<16x128xf32>
    %271 = arith.addf %249, %270 : vector<16x128xf32>
    %272 = arith.index_cast %arg0 : i32 to index
    %c0_62 = arith.constant 0 : index
    %273 = memref.load %arg1[%272, %c0_62] : memref<2x8xi32, #tpu.memory_space<smem>>
    %274 = arith.index_cast %273 : i32 to index
    %c0_63 = arith.constant 0 : index
    %275 = vector.load %arg10[%274, %c0_63] : memref<384x128xf32, #tpu.memory_space<vmem>>, vector<1x128xf32>
    %276 = arith.index_cast %arg0 : i32 to index
    %c1 = arith.constant 1 : index
    %277 = memref.load %arg1[%276, %c1] : memref<2x8xi32, #tpu.memory_space<smem>>
    %278 = arith.index_cast %277 : i32 to index
    %c0_64 = arith.constant 0 : index
    %279 = vector.load %arg10[%278, %c0_64] : memref<384x128xf32, #tpu.memory_space<vmem>>, vector<1x128xf32>
    %280 = arith.index_cast %arg0 : i32 to index
    %c2 = arith.constant 2 : index
    %281 = memref.load %arg1[%280, %c2] : memref<2x8xi32, #tpu.memory_space<smem>>
    %282 = arith.index_cast %281 : i32 to index
    %c0_65 = arith.constant 0 : index
    %283 = vector.load %arg10[%282, %c0_65] : memref<384x128xf32, #tpu.memory_space<vmem>>, vector<1x128xf32>
    %284 = arith.index_cast %arg0 : i32 to index
    %c3 = arith.constant 3 : index
    %285 = memref.load %arg1[%284, %c3] : memref<2x8xi32, #tpu.memory_space<smem>>
    %286 = arith.index_cast %285 : i32 to index
    %c0_66 = arith.constant 0 : index
    %287 = vector.load %arg10[%286, %c0_66] : memref<384x128xf32, #tpu.memory_space<vmem>>, vector<1x128xf32>
    %288 = arith.index_cast %arg0 : i32 to index
    %c4 = arith.constant 4 : index
    %289 = memref.load %arg1[%288, %c4] : memref<2x8xi32, #tpu.memory_space<smem>>
    %290 = arith.index_cast %289 : i32 to index
    %c0_67 = arith.constant 0 : index
    %291 = vector.load %arg10[%290, %c0_67] : memref<384x128xf32, #tpu.memory_space<vmem>>, vector<1x128xf32>
    %292 = arith.index_cast %arg0 : i32 to index
    %c5 = arith.constant 5 : index
    %293 = memref.load %arg1[%292, %c5] : memref<2x8xi32, #tpu.memory_space<smem>>
    %294 = arith.index_cast %293 : i32 to index
    %c0_68 = arith.constant 0 : index
    %295 = vector.load %arg10[%294, %c0_68] : memref<384x128xf32, #tpu.memory_space<vmem>>, vector<1x128xf32>
    %296 = arith.index_cast %arg0 : i32 to index
    %c6 = arith.constant 6 : index
    %297 = memref.load %arg1[%296, %c6] : memref<2x8xi32, #tpu.memory_space<smem>>
    %298 = arith.index_cast %297 : i32 to index
    %c0_69 = arith.constant 0 : index
    %299 = vector.load %arg10[%298, %c0_69] : memref<384x128xf32, #tpu.memory_space<vmem>>, vector<1x128xf32>
    %300 = arith.index_cast %arg0 : i32 to index
    %c7 = arith.constant 7 : index
    %301 = memref.load %arg1[%300, %c7] : memref<2x8xi32, #tpu.memory_space<smem>>
    %302 = arith.index_cast %301 : i32 to index
    %c0_70 = arith.constant 0 : index
    %303 = vector.load %arg10[%302, %c0_70] : memref<384x128xf32, #tpu.memory_space<vmem>>, vector<1x128xf32>
    %304 = tpu.concatenate %275, %279, %283, %287, %291, %295, %299, %303 in 0 : vector<1x128xf32>, vector<1x128xf32>, vector<1x128xf32>, vector<1x128xf32>, vector<1x128xf32>, vector<1x128xf32>, vector<1x128xf32>, vector<1x128xf32> -> vector<8x128xf32>
    %305 = vector.extract_strided_slice %0 {offsets = [2, 0], sizes = [1, 128], strides = [1, 1]} : vector<8x128xf32> to vector<1x128xf32>
    %c0_71 = arith.constant 0 : index
    %c0_72 = arith.constant 0 : index
    %306 = vector.load %arg17[%c0_71, %c0_72] : memref<128x384xbf16, #tpu.memory_space<vmem>>, vector<128x384xbf16>
    %c0_73 = arith.constant 0 : index
    %c0_74 = arith.constant 0 : index
    %307 = vector.load %arg18[%c0_73, %c0_74] : memref<128x128xbf16, #tpu.memory_space<vmem>>, vector<128x128xbf16>
    %308 = arith.mulf %304, %304 : vector<8x128xf32>
    %cst_75 = arith.constant dense<0.000000e+00> : vector<8xf32>
    %309 = vector.multi_reduction <add>, %308, %cst_75 [1] : vector<8x128xf32> to vector<8xf32>
    %310 = vector.shape_cast %309 : vector<8xf32> to vector<8x1xf32>
    %cst_76 = arith.constant 1.280000e+02 : f32
    %311 = vector.broadcast %cst_76 : f32 to vector<8x1xf32>
    %312 = arith.divf %310, %311 : vector<8x1xf32>
    %cst_77 = arith.constant 9.99999997E-7 : f32
    %313 = vector.broadcast %cst_77 : f32 to vector<8x1xf32>
    %314 = arith.addf %312, %313 : vector<8x1xf32>
    %315 = math.rsqrt %314 : vector<8x1xf32>
    %316 = vector.broadcast %315 : vector<8x1xf32> to vector<8x128xf32>
    %317 = arith.mulf %304, %316 : vector<8x128xf32>
    %318 = vector.broadcast %305 : vector<1x128xf32> to vector<8x128xf32>
    %319 = arith.mulf %317, %318 : vector<8x128xf32>
    %320 = arith.truncf %319 : vector<8x128xf32> to vector<8x128xbf16>
    %cst_78 = arith.constant dense<0.000000e+00> : vector<8x384xf32>
    %321 = tpu.matmul %320, %306, %cst_78 {dimension_numbers = #tpu.dot_dimension_numbers<[1], [0], [0], [1], [0, 0, 1, 1], [], []>} : vector<8x128xbf16>, vector<128x384xbf16>, vector<8x384xf32> -> vector<8x384xf32>
    %322 = vector.extract_strided_slice %321 {offsets = [0, 0], sizes = [8, 128], strides = [1, 1]} : vector<8x384xf32> to vector<8x128xf32>
    %323 = vector.extract_strided_slice %321 {offsets = [0, 128], sizes = [8, 128], strides = [1, 1]} : vector<8x384xf32> to vector<8x128xf32>
    %324 = vector.extract_strided_slice %321 {offsets = [0, 256], sizes = [8, 128], strides = [1, 1]} : vector<8x384xf32> to vector<8x128xf32>
    %325 = vector.extract_strided_slice %322 {offsets = [0, 0], sizes = [8, 32], strides = [1, 1]} : vector<8x128xf32> to vector<8x32xf32>
    %326 = arith.truncf %325 : vector<8x32xf32> to vector<8x32xbf16>
    %327 = vector.extract_strided_slice %323 {offsets = [0, 0], sizes = [8, 32], strides = [1, 1]} : vector<8x128xf32> to vector<8x32xf32>
    %328 = arith.truncf %327 : vector<8x32xf32> to vector<8x32xbf16>
    %329 = vector.extract_strided_slice %324 {offsets = [0, 0], sizes = [8, 32], strides = [1, 1]} : vector<8x128xf32> to vector<8x32xf32>
    %330 = arith.truncf %329 : vector<8x32xf32> to vector<8x32xbf16>
    %cst_79 = arith.constant dense<0.000000e+00> : vector<8x8xf32>
    %331 = tpu.matmul %326, %328, %cst_79 {dimension_numbers = #tpu.dot_dimension_numbers<[1], [1], [0], [0], [0, 0, 1, 0], [], []>} : vector<8x32xbf16>, vector<8x32xbf16>, vector<8x8xf32> -> vector<8x8xf32>
    %332 = arith.addf %331, %141 : vector<8x8xf32>
    %cst_80 = arith.constant dense<0xFF800000> : vector<8xf32>
    %333 = vector.multi_reduction <maximumf>, %332, %cst_80 [1] : vector<8x8xf32> to vector<8xf32>
    %334 = vector.shape_cast %333 : vector<8xf32> to vector<8x1xf32>
    %335 = vector.broadcast %334 : vector<8x1xf32> to vector<8x8xf32>
    %336 = arith.subf %332, %335 : vector<8x8xf32>
    %337 = math.exp %336 : vector<8x8xf32>
    %cst_81 = arith.constant dense<0.000000e+00> : vector<8xf32>
    %338 = vector.multi_reduction <add>, %337, %cst_81 [1] : vector<8x8xf32> to vector<8xf32>
    %339 = vector.shape_cast %338 : vector<8xf32> to vector<8x1xf32>
    %340 = tpu.reciprocal %339 {approx = true} : vector<8x1xf32> -> vector<8x1xf32>
    %341 = vector.broadcast %340 : vector<8x1xf32> to vector<8x8xf32>
    %342 = arith.mulf %337, %341 : vector<8x8xf32>
    %343 = arith.truncf %342 : vector<8x8xf32> to vector<8x8xbf16>
    %cst_82 = arith.constant dense<0.000000e+00> : vector<8x32xf32>
    %344 = tpu.matmul %343, %330, %cst_82 {dimension_numbers = #tpu.dot_dimension_numbers<[1], [0], [0], [1], [0, 0, 1, 1], [], []>} : vector<8x8xbf16>, vector<8x32xbf16>, vector<8x32xf32> -> vector<8x32xf32>
    %345 = vector.extract_strided_slice %322 {offsets = [0, 32], sizes = [8, 32], strides = [1, 1]} : vector<8x128xf32> to vector<8x32xf32>
    %346 = arith.truncf %345 : vector<8x32xf32> to vector<8x32xbf16>
    %347 = vector.extract_strided_slice %323 {offsets = [0, 32], sizes = [8, 32], strides = [1, 1]} : vector<8x128xf32> to vector<8x32xf32>
    %348 = arith.truncf %347 : vector<8x32xf32> to vector<8x32xbf16>
    %349 = vector.extract_strided_slice %324 {offsets = [0, 32], sizes = [8, 32], strides = [1, 1]} : vector<8x128xf32> to vector<8x32xf32>
    %350 = arith.truncf %349 : vector<8x32xf32> to vector<8x32xbf16>
    %cst_83 = arith.constant dense<0.000000e+00> : vector<8x8xf32>
    %351 = tpu.matmul %346, %348, %cst_83 {dimension_numbers = #tpu.dot_dimension_numbers<[1], [1], [0], [0], [0, 0, 1, 0], [], []>} : vector<8x32xbf16>, vector<8x32xbf16>, vector<8x8xf32> -> vector<8x8xf32>
    %352 = arith.addf %351, %141 : vector<8x8xf32>
    %cst_84 = arith.constant dense<0xFF800000> : vector<8xf32>
    %353 = vector.multi_reduction <maximumf>, %352, %cst_84 [1] : vector<8x8xf32> to vector<8xf32>
    %354 = vector.shape_cast %353 : vector<8xf32> to vector<8x1xf32>
    %355 = vector.broadcast %354 : vector<8x1xf32> to vector<8x8xf32>
    %356 = arith.subf %352, %355 : vector<8x8xf32>
    %357 = math.exp %356 : vector<8x8xf32>
    %cst_85 = arith.constant dense<0.000000e+00> : vector<8xf32>
    %358 = vector.multi_reduction <add>, %357, %cst_85 [1] : vector<8x8xf32> to vector<8xf32>
    %359 = vector.shape_cast %358 : vector<8xf32> to vector<8x1xf32>
    %360 = tpu.reciprocal %359 {approx = true} : vector<8x1xf32> -> vector<8x1xf32>
    %361 = vector.broadcast %360 : vector<8x1xf32> to vector<8x8xf32>
    %362 = arith.mulf %357, %361 : vector<8x8xf32>
    %363 = arith.truncf %362 : vector<8x8xf32> to vector<8x8xbf16>
    %cst_86 = arith.constant dense<0.000000e+00> : vector<8x32xf32>
    %364 = tpu.matmul %363, %350, %cst_86 {dimension_numbers = #tpu.dot_dimension_numbers<[1], [0], [0], [1], [0, 0, 1, 1], [], []>} : vector<8x8xbf16>, vector<8x32xbf16>, vector<8x32xf32> -> vector<8x32xf32>
    %365 = vector.extract_strided_slice %322 {offsets = [0, 64], sizes = [8, 32], strides = [1, 1]} : vector<8x128xf32> to vector<8x32xf32>
    %366 = arith.truncf %365 : vector<8x32xf32> to vector<8x32xbf16>
    %367 = vector.extract_strided_slice %323 {offsets = [0, 64], sizes = [8, 32], strides = [1, 1]} : vector<8x128xf32> to vector<8x32xf32>
    %368 = arith.truncf %367 : vector<8x32xf32> to vector<8x32xbf16>
    %369 = vector.extract_strided_slice %324 {offsets = [0, 64], sizes = [8, 32], strides = [1, 1]} : vector<8x128xf32> to vector<8x32xf32>
    %370 = arith.truncf %369 : vector<8x32xf32> to vector<8x32xbf16>
    %cst_87 = arith.constant dense<0.000000e+00> : vector<8x8xf32>
    %371 = tpu.matmul %366, %368, %cst_87 {dimension_numbers = #tpu.dot_dimension_numbers<[1], [1], [0], [0], [0, 0, 1, 0], [], []>} : vector<8x32xbf16>, vector<8x32xbf16>, vector<8x8xf32> -> vector<8x8xf32>
    %372 = arith.addf %371, %141 : vector<8x8xf32>
    %cst_88 = arith.constant dense<0xFF800000> : vector<8xf32>
    %373 = vector.multi_reduction <maximumf>, %372, %cst_88 [1] : vector<8x8xf32> to vector<8xf32>
    %374 = vector.shape_cast %373 : vector<8xf32> to vector<8x1xf32>
    %375 = vector.broadcast %374 : vector<8x1xf32> to vector<8x8xf32>
    %376 = arith.subf %372, %375 : vector<8x8xf32>
    %377 = math.exp %376 : vector<8x8xf32>
    %cst_89 = arith.constant dense<0.000000e+00> : vector<8xf32>
    %378 = vector.multi_reduction <add>, %377, %cst_89 [1] : vector<8x8xf32> to vector<8xf32>
    %379 = vector.shape_cast %378 : vector<8xf32> to vector<8x1xf32>
    %380 = tpu.reciprocal %379 {approx = true} : vector<8x1xf32> -> vector<8x1xf32>
    %381 = vector.broadcast %380 : vector<8x1xf32> to vector<8x8xf32>
    %382 = arith.mulf %377, %381 : vector<8x8xf32>
    %383 = arith.truncf %382 : vector<8x8xf32> to vector<8x8xbf16>
    %cst_90 = arith.constant dense<0.000000e+00> : vector<8x32xf32>
    %384 = tpu.matmul %383, %370, %cst_90 {dimension_numbers = #tpu.dot_dimension_numbers<[1], [0], [0], [1], [0, 0, 1, 1], [], []>} : vector<8x8xbf16>, vector<8x32xbf16>, vector<8x32xf32> -> vector<8x32xf32>
    %385 = vector.extract_strided_slice %322 {offsets = [0, 96], sizes = [8, 32], strides = [1, 1]} : vector<8x128xf32> to vector<8x32xf32>
    %386 = arith.truncf %385 : vector<8x32xf32> to vector<8x32xbf16>
    %387 = vector.extract_strided_slice %323 {offsets = [0, 96], sizes = [8, 32], strides = [1, 1]} : vector<8x128xf32> to vector<8x32xf32>
    %388 = arith.truncf %387 : vector<8x32xf32> to vector<8x32xbf16>
    %389 = vector.extract_strided_slice %324 {offsets = [0, 96], sizes = [8, 32], strides = [1, 1]} : vector<8x128xf32> to vector<8x32xf32>
    %390 = arith.truncf %389 : vector<8x32xf32> to vector<8x32xbf16>
    %cst_91 = arith.constant dense<0.000000e+00> : vector<8x8xf32>
    %391 = tpu.matmul %386, %388, %cst_91 {dimension_numbers = #tpu.dot_dimension_numbers<[1], [1], [0], [0], [0, 0, 1, 0], [], []>} : vector<8x32xbf16>, vector<8x32xbf16>, vector<8x8xf32> -> vector<8x8xf32>
    %392 = arith.addf %391, %141 : vector<8x8xf32>
    %cst_92 = arith.constant dense<0xFF800000> : vector<8xf32>
    %393 = vector.multi_reduction <maximumf>, %392, %cst_92 [1] : vector<8x8xf32> to vector<8xf32>
    %394 = vector.shape_cast %393 : vector<8xf32> to vector<8x1xf32>
    %395 = vector.broadcast %394 : vector<8x1xf32> to vector<8x8xf32>
    %396 = arith.subf %392, %395 : vector<8x8xf32>
    %397 = math.exp %396 : vector<8x8xf32>
    %cst_93 = arith.constant dense<0.000000e+00> : vector<8xf32>
    %398 = vector.multi_reduction <add>, %397, %cst_93 [1] : vector<8x8xf32> to vector<8xf32>
    %399 = vector.shape_cast %398 : vector<8xf32> to vector<8x1xf32>
    %400 = tpu.reciprocal %399 {approx = true} : vector<8x1xf32> -> vector<8x1xf32>
    %401 = vector.broadcast %400 : vector<8x1xf32> to vector<8x8xf32>
    %402 = arith.mulf %397, %401 : vector<8x8xf32>
    %403 = arith.truncf %402 : vector<8x8xf32> to vector<8x8xbf16>
    %cst_94 = arith.constant dense<0.000000e+00> : vector<8x32xf32>
    %404 = tpu.matmul %403, %390, %cst_94 {dimension_numbers = #tpu.dot_dimension_numbers<[1], [0], [0], [1], [0, 0, 1, 1], [], []>} : vector<8x8xbf16>, vector<8x32xbf16>, vector<8x32xf32> -> vector<8x32xf32>
    %405 = tpu.concatenate %344, %364, %384, %404 in 1 : vector<8x32xf32>, vector<8x32xf32>, vector<8x32xf32>, vector<8x32xf32> -> vector<8x128xf32>
    %406 = arith.truncf %405 : vector<8x128xf32> to vector<8x128xbf16>
    %cst_95 = arith.constant dense<0.000000e+00> : vector<8x128xf32>
    %407 = tpu.matmul %406, %307, %cst_95 {dimension_numbers = #tpu.dot_dimension_numbers<[1], [0], [0], [1], [0, 0, 1, 1], [], []>} : vector<8x128xbf16>, vector<128x128xbf16>, vector<8x128xf32> -> vector<8x128xf32>
    %408 = arith.addf %304, %407 : vector<8x128xf32>
    %409 = vector.extract_strided_slice %0 {offsets = [3, 0], sizes = [1, 128], strides = [1, 1]} : vector<8x128xf32> to vector<1x128xf32>
    %c0_96 = arith.constant 0 : index
    %c0_97 = arith.constant 0 : index
    %410 = vector.load %arg19[%c0_96, %c0_97] : memref<128x128xbf16, #tpu.memory_space<vmem>>, vector<128x128xbf16>
    %c0_98 = arith.constant 0 : index
    %c0_99 = arith.constant 0 : index
    %411 = vector.load %arg20[%c0_98, %c0_99] : memref<128x256xbf16, #tpu.memory_space<vmem>>, vector<128x256xbf16>
    %c0_100 = arith.constant 0 : index
    %c0_101 = arith.constant 0 : index
    %412 = vector.load %arg21[%c0_100, %c0_101] : memref<128x128xbf16, #tpu.memory_space<vmem>>, vector<128x128xbf16>
    %413 = arith.mulf %408, %408 : vector<8x128xf32>
    %cst_102 = arith.constant dense<0.000000e+00> : vector<8xf32>
    %414 = vector.multi_reduction <add>, %413, %cst_102 [1] : vector<8x128xf32> to vector<8xf32>
    %415 = vector.shape_cast %414 : vector<8xf32> to vector<8x1xf32>
    %cst_103 = arith.constant 1.280000e+02 : f32
    %416 = vector.broadcast %cst_103 : f32 to vector<8x1xf32>
    %417 = arith.divf %415, %416 : vector<8x1xf32>
    %cst_104 = arith.constant 9.99999997E-7 : f32
    %418 = vector.broadcast %cst_104 : f32 to vector<8x1xf32>
    %419 = arith.addf %417, %418 : vector<8x1xf32>
    %420 = math.rsqrt %419 : vector<8x1xf32>
    %421 = vector.broadcast %420 : vector<8x1xf32> to vector<8x128xf32>
    %422 = arith.mulf %408, %421 : vector<8x128xf32>
    %423 = vector.broadcast %409 : vector<1x128xf32> to vector<8x128xf32>
    %424 = arith.mulf %422, %423 : vector<8x128xf32>
    %425 = arith.truncf %424 : vector<8x128xf32> to vector<8x128xbf16>
    %cst_105 = arith.constant dense<0.000000e+00> : vector<8x128xf32>
    %426 = tpu.matmul %425, %410, %cst_105 {dimension_numbers = #tpu.dot_dimension_numbers<[1], [0], [0], [1], [0, 0, 1, 1], [], []>} : vector<8x128xbf16>, vector<128x128xbf16>, vector<8x128xf32> -> vector<8x128xf32>
    %427 = arith.truncf %271 : vector<16x128xf32> to vector<16x128xbf16>
    %cst_106 = arith.constant dense<0.000000e+00> : vector<16x256xf32>
    %428 = tpu.matmul %427, %411, %cst_106 {dimension_numbers = #tpu.dot_dimension_numbers<[1], [0], [0], [1], [0, 0, 1, 1], [], []>} : vector<16x128xbf16>, vector<128x256xbf16>, vector<16x256xf32> -> vector<16x256xf32>
    %429 = vector.extract_strided_slice %428 {offsets = [0, 0], sizes = [16, 128], strides = [1, 1]} : vector<16x256xf32> to vector<16x128xf32>
    %430 = vector.extract_strided_slice %428 {offsets = [0, 128], sizes = [16, 128], strides = [1, 1]} : vector<16x256xf32> to vector<16x128xf32>
    %431 = vector.extract_strided_slice %426 {offsets = [0, 0], sizes = [8, 32], strides = [1, 1]} : vector<8x128xf32> to vector<8x32xf32>
    %432 = arith.truncf %431 : vector<8x32xf32> to vector<8x32xbf16>
    %433 = vector.extract_strided_slice %429 {offsets = [0, 0], sizes = [16, 32], strides = [1, 1]} : vector<16x128xf32> to vector<16x32xf32>
    %434 = arith.truncf %433 : vector<16x32xf32> to vector<16x32xbf16>
    %435 = vector.extract_strided_slice %430 {offsets = [0, 0], sizes = [16, 32], strides = [1, 1]} : vector<16x128xf32> to vector<16x32xf32>
    %436 = arith.truncf %435 : vector<16x32xf32> to vector<16x32xbf16>
    %cst_107 = arith.constant dense<0.000000e+00> : vector<8x16xf32>
    %437 = tpu.matmul %432, %434, %cst_107 {dimension_numbers = #tpu.dot_dimension_numbers<[1], [1], [0], [0], [0, 0, 1, 0], [], []>} : vector<8x32xbf16>, vector<16x32xbf16>, vector<8x16xf32> -> vector<8x16xf32>
    %438 = vector.broadcast %135 : vector<1x16xf32> to vector<8x16xf32>
    %439 = arith.addf %437, %438 : vector<8x16xf32>
    %cst_108 = arith.constant dense<0xFF800000> : vector<8xf32>
    %440 = vector.multi_reduction <maximumf>, %439, %cst_108 [1] : vector<8x16xf32> to vector<8xf32>
    %441 = vector.shape_cast %440 : vector<8xf32> to vector<8x1xf32>
    %442 = vector.broadcast %441 : vector<8x1xf32> to vector<8x16xf32>
    %443 = arith.subf %439, %442 : vector<8x16xf32>
    %444 = math.exp %443 : vector<8x16xf32>
    %cst_109 = arith.constant dense<0.000000e+00> : vector<8xf32>
    %445 = vector.multi_reduction <add>, %444, %cst_109 [1] : vector<8x16xf32> to vector<8xf32>
    %446 = vector.shape_cast %445 : vector<8xf32> to vector<8x1xf32>
    %447 = tpu.reciprocal %446 {approx = true} : vector<8x1xf32> -> vector<8x1xf32>
    %448 = vector.broadcast %447 : vector<8x1xf32> to vector<8x16xf32>
    %449 = arith.mulf %444, %448 : vector<8x16xf32>
    %450 = arith.truncf %449 : vector<8x16xf32> to vector<8x16xbf16>
    %cst_110 = arith.constant dense<0.000000e+00> : vector<8x32xf32>
    %451 = tpu.matmul %450, %436, %cst_110 {dimension_numbers = #tpu.dot_dimension_numbers<[1], [0], [0], [1], [0, 0, 1, 1], [], []>} : vector<8x16xbf16>, vector<16x32xbf16>, vector<8x32xf32> -> vector<8x32xf32>
    %452 = vector.extract_strided_slice %426 {offsets = [0, 32], sizes = [8, 32], strides = [1, 1]} : vector<8x128xf32> to vector<8x32xf32>
    %453 = arith.truncf %452 : vector<8x32xf32> to vector<8x32xbf16>
    %454 = vector.extract_strided_slice %429 {offsets = [0, 32], sizes = [16, 32], strides = [1, 1]} : vector<16x128xf32> to vector<16x32xf32>
    %455 = arith.truncf %454 : vector<16x32xf32> to vector<16x32xbf16>
    %456 = vector.extract_strided_slice %430 {offsets = [0, 32], sizes = [16, 32], strides = [1, 1]} : vector<16x128xf32> to vector<16x32xf32>
    %457 = arith.truncf %456 : vector<16x32xf32> to vector<16x32xbf16>
    %cst_111 = arith.constant dense<0.000000e+00> : vector<8x16xf32>
    %458 = tpu.matmul %453, %455, %cst_111 {dimension_numbers = #tpu.dot_dimension_numbers<[1], [1], [0], [0], [0, 0, 1, 0], [], []>} : vector<8x32xbf16>, vector<16x32xbf16>, vector<8x16xf32> -> vector<8x16xf32>
    %459 = vector.broadcast %135 : vector<1x16xf32> to vector<8x16xf32>
    %460 = arith.addf %458, %459 : vector<8x16xf32>
    %cst_112 = arith.constant dense<0xFF800000> : vector<8xf32>
    %461 = vector.multi_reduction <maximumf>, %460, %cst_112 [1] : vector<8x16xf32> to vector<8xf32>
    %462 = vector.shape_cast %461 : vector<8xf32> to vector<8x1xf32>
    %463 = vector.broadcast %462 : vector<8x1xf32> to vector<8x16xf32>
    %464 = arith.subf %460, %463 : vector<8x16xf32>
    %465 = math.exp %464 : vector<8x16xf32>
    %cst_113 = arith.constant dense<0.000000e+00> : vector<8xf32>
    %466 = vector.multi_reduction <add>, %465, %cst_113 [1] : vector<8x16xf32> to vector<8xf32>
    %467 = vector.shape_cast %466 : vector<8xf32> to vector<8x1xf32>
    %468 = tpu.reciprocal %467 {approx = true} : vector<8x1xf32> -> vector<8x1xf32>
    %469 = vector.broadcast %468 : vector<8x1xf32> to vector<8x16xf32>
    %470 = arith.mulf %465, %469 : vector<8x16xf32>
    %471 = arith.truncf %470 : vector<8x16xf32> to vector<8x16xbf16>
    %cst_114 = arith.constant dense<0.000000e+00> : vector<8x32xf32>
    %472 = tpu.matmul %471, %457, %cst_114 {dimension_numbers = #tpu.dot_dimension_numbers<[1], [0], [0], [1], [0, 0, 1, 1], [], []>} : vector<8x16xbf16>, vector<16x32xbf16>, vector<8x32xf32> -> vector<8x32xf32>
    %473 = vector.extract_strided_slice %426 {offsets = [0, 64], sizes = [8, 32], strides = [1, 1]} : vector<8x128xf32> to vector<8x32xf32>
    %474 = arith.truncf %473 : vector<8x32xf32> to vector<8x32xbf16>
    %475 = vector.extract_strided_slice %429 {offsets = [0, 64], sizes = [16, 32], strides = [1, 1]} : vector<16x128xf32> to vector<16x32xf32>
    %476 = arith.truncf %475 : vector<16x32xf32> to vector<16x32xbf16>
    %477 = vector.extract_strided_slice %430 {offsets = [0, 64], sizes = [16, 32], strides = [1, 1]} : vector<16x128xf32> to vector<16x32xf32>
    %478 = arith.truncf %477 : vector<16x32xf32> to vector<16x32xbf16>
    %cst_115 = arith.constant dense<0.000000e+00> : vector<8x16xf32>
    %479 = tpu.matmul %474, %476, %cst_115 {dimension_numbers = #tpu.dot_dimension_numbers<[1], [1], [0], [0], [0, 0, 1, 0], [], []>} : vector<8x32xbf16>, vector<16x32xbf16>, vector<8x16xf32> -> vector<8x16xf32>
    %480 = vector.broadcast %135 : vector<1x16xf32> to vector<8x16xf32>
    %481 = arith.addf %479, %480 : vector<8x16xf32>
    %cst_116 = arith.constant dense<0xFF800000> : vector<8xf32>
    %482 = vector.multi_reduction <maximumf>, %481, %cst_116 [1] : vector<8x16xf32> to vector<8xf32>
    %483 = vector.shape_cast %482 : vector<8xf32> to vector<8x1xf32>
    %484 = vector.broadcast %483 : vector<8x1xf32> to vector<8x16xf32>
    %485 = arith.subf %481, %484 : vector<8x16xf32>
    %486 = math.exp %485 : vector<8x16xf32>
    %cst_117 = arith.constant dense<0.000000e+00> : vector<8xf32>
    %487 = vector.multi_reduction <add>, %486, %cst_117 [1] : vector<8x16xf32> to vector<8xf32>
    %488 = vector.shape_cast %487 : vector<8xf32> to vector<8x1xf32>
    %489 = tpu.reciprocal %488 {approx = true} : vector<8x1xf32> -> vector<8x1xf32>
    %490 = vector.broadcast %489 : vector<8x1xf32> to vector<8x16xf32>
    %491 = arith.mulf %486, %490 : vector<8x16xf32>
    %492 = arith.truncf %491 : vector<8x16xf32> to vector<8x16xbf16>
    %cst_118 = arith.constant dense<0.000000e+00> : vector<8x32xf32>
    %493 = tpu.matmul %492, %478, %cst_118 {dimension_numbers = #tpu.dot_dimension_numbers<[1], [0], [0], [1], [0, 0, 1, 1], [], []>} : vector<8x16xbf16>, vector<16x32xbf16>, vector<8x32xf32> -> vector<8x32xf32>
    %494 = vector.extract_strided_slice %426 {offsets = [0, 96], sizes = [8, 32], strides = [1, 1]} : vector<8x128xf32> to vector<8x32xf32>
    %495 = arith.truncf %494 : vector<8x32xf32> to vector<8x32xbf16>
    %496 = vector.extract_strided_slice %429 {offsets = [0, 96], sizes = [16, 32], strides = [1, 1]} : vector<16x128xf32> to vector<16x32xf32>
    %497 = arith.truncf %496 : vector<16x32xf32> to vector<16x32xbf16>
    %498 = vector.extract_strided_slice %430 {offsets = [0, 96], sizes = [16, 32], strides = [1, 1]} : vector<16x128xf32> to vector<16x32xf32>
    %499 = arith.truncf %498 : vector<16x32xf32> to vector<16x32xbf16>
    %cst_119 = arith.constant dense<0.000000e+00> : vector<8x16xf32>
    %500 = tpu.matmul %495, %497, %cst_119 {dimension_numbers = #tpu.dot_dimension_numbers<[1], [1], [0], [0], [0, 0, 1, 0], [], []>} : vector<8x32xbf16>, vector<16x32xbf16>, vector<8x16xf32> -> vector<8x16xf32>
    %501 = vector.broadcast %135 : vector<1x16xf32> to vector<8x16xf32>
    %502 = arith.addf %500, %501 : vector<8x16xf32>
    %cst_120 = arith.constant dense<0xFF800000> : vector<8xf32>
    %503 = vector.multi_reduction <maximumf>, %502, %cst_120 [1] : vector<8x16xf32> to vector<8xf32>
    %504 = vector.shape_cast %503 : vector<8xf32> to vector<8x1xf32>
    %505 = vector.broadcast %504 : vector<8x1xf32> to vector<8x16xf32>
    %506 = arith.subf %502, %505 : vector<8x16xf32>
    %507 = math.exp %506 : vector<8x16xf32>
    %cst_121 = arith.constant dense<0.000000e+00> : vector<8xf32>
    %508 = vector.multi_reduction <add>, %507, %cst_121 [1] : vector<8x16xf32> to vector<8xf32>
    %509 = vector.shape_cast %508 : vector<8xf32> to vector<8x1xf32>
    %510 = tpu.reciprocal %509 {approx = true} : vector<8x1xf32> -> vector<8x1xf32>
    %511 = vector.broadcast %510 : vector<8x1xf32> to vector<8x16xf32>
    %512 = arith.mulf %507, %511 : vector<8x16xf32>
    %513 = arith.truncf %512 : vector<8x16xf32> to vector<8x16xbf16>
    %cst_122 = arith.constant dense<0.000000e+00> : vector<8x32xf32>
    %514 = tpu.matmul %513, %499, %cst_122 {dimension_numbers = #tpu.dot_dimension_numbers<[1], [0], [0], [1], [0, 0, 1, 1], [], []>} : vector<8x16xbf16>, vector<16x32xbf16>, vector<8x32xf32> -> vector<8x32xf32>
    %515 = tpu.concatenate %451, %472, %493, %514 in 1 : vector<8x32xf32>, vector<8x32xf32>, vector<8x32xf32>, vector<8x32xf32> -> vector<8x128xf32>
    %516 = arith.truncf %515 : vector<8x128xf32> to vector<8x128xbf16>
    %cst_123 = arith.constant dense<0.000000e+00> : vector<8x128xf32>
    %517 = tpu.matmul %516, %412, %cst_123 {dimension_numbers = #tpu.dot_dimension_numbers<[1], [0], [0], [1], [0, 0, 1, 1], [], []>} : vector<8x128xbf16>, vector<128x128xbf16>, vector<8x128xf32> -> vector<8x128xf32>
    %518 = arith.addf %408, %517 : vector<8x128xf32>
    %519 = vector.extract_strided_slice %0 {offsets = [4, 0], sizes = [1, 128], strides = [1, 1]} : vector<8x128xf32> to vector<1x128xf32>
    %c0_124 = arith.constant 0 : index
    %c0_125 = arith.constant 0 : index
    %520 = vector.load %arg22[%c0_124, %c0_125] : memref<128x256xbf16, #tpu.memory_space<vmem>>, vector<128x256xbf16>
    %c0_126 = arith.constant 0 : index
    %c0_127 = arith.constant 0 : index
    %521 = vector.load %arg23[%c0_126, %c0_127] : memref<256x128xbf16, #tpu.memory_space<vmem>>, vector<256x128xbf16>
    %522 = arith.mulf %518, %518 : vector<8x128xf32>
    %cst_128 = arith.constant dense<0.000000e+00> : vector<8xf32>
    %523 = vector.multi_reduction <add>, %522, %cst_128 [1] : vector<8x128xf32> to vector<8xf32>
    %524 = vector.shape_cast %523 : vector<8xf32> to vector<8x1xf32>
    %cst_129 = arith.constant 1.280000e+02 : f32
    %525 = vector.broadcast %cst_129 : f32 to vector<8x1xf32>
    %526 = arith.divf %524, %525 : vector<8x1xf32>
    %cst_130 = arith.constant 9.99999997E-7 : f32
    %527 = vector.broadcast %cst_130 : f32 to vector<8x1xf32>
    %528 = arith.addf %526, %527 : vector<8x1xf32>
    %529 = math.rsqrt %528 : vector<8x1xf32>
    %530 = vector.broadcast %529 : vector<8x1xf32> to vector<8x128xf32>
    %531 = arith.mulf %518, %530 : vector<8x128xf32>
    %532 = vector.broadcast %519 : vector<1x128xf32> to vector<8x128xf32>
    %533 = arith.mulf %531, %532 : vector<8x128xf32>
    %534 = arith.truncf %533 : vector<8x128xf32> to vector<8x128xbf16>
    %cst_131 = arith.constant dense<0.000000e+00> : vector<8x256xf32>
    %535 = tpu.matmul %534, %520, %cst_131 {dimension_numbers = #tpu.dot_dimension_numbers<[1], [0], [0], [1], [0, 0, 1, 1], [], []>} : vector<8x128xbf16>, vector<128x256xbf16>, vector<8x256xf32> -> vector<8x256xf32>
    %cst_132 = arith.constant 0.000000e+00 : f32
    %536 = vector.broadcast %cst_132 : f32 to vector<8x256xf32>
    %537 = arith.maximumf %535, %536 : vector<8x256xf32>
    %538 = arith.truncf %537 : vector<8x256xf32> to vector<8x256xbf16>
    %cst_133 = arith.constant dense<0.000000e+00> : vector<8x128xf32>
    %539 = tpu.matmul %538, %521, %cst_133 {dimension_numbers = #tpu.dot_dimension_numbers<[1], [0], [0], [1], [0, 0, 1, 1], [], []>} : vector<8x256xbf16>, vector<256x128xbf16>, vector<8x128xf32> -> vector<8x128xf32>
    %540 = arith.addf %518, %539 : vector<8x128xf32>
    %541 = vector.extract_strided_slice %0 {offsets = [5, 0], sizes = [1, 128], strides = [1, 1]} : vector<8x128xf32> to vector<1x128xf32>
    %542 = arith.mulf %540, %540 : vector<8x128xf32>
    %cst_134 = arith.constant dense<0.000000e+00> : vector<8xf32>
    %543 = vector.multi_reduction <add>, %542, %cst_134 [1] : vector<8x128xf32> to vector<8xf32>
    %544 = vector.shape_cast %543 : vector<8xf32> to vector<8x1xf32>
    %cst_135 = arith.constant 1.280000e+02 : f32
    %545 = vector.broadcast %cst_135 : f32 to vector<8x1xf32>
    %546 = arith.divf %544, %545 : vector<8x1xf32>
    %cst_136 = arith.constant 9.99999997E-7 : f32
    %547 = vector.broadcast %cst_136 : f32 to vector<8x1xf32>
    %548 = arith.addf %546, %547 : vector<8x1xf32>
    %549 = math.rsqrt %548 : vector<8x1xf32>
    %550 = vector.broadcast %549 : vector<8x1xf32> to vector<8x128xf32>
    %551 = arith.mulf %540, %550 : vector<8x128xf32>
    %552 = vector.broadcast %541 : vector<1x128xf32> to vector<8x128xf32>
    %553 = arith.mulf %551, %552 : vector<8x128xf32>
    %cst_137 = arith.constant 0.0883883461 : f32
    %554 = vector.broadcast %cst_137 : f32 to vector<8x128xf32>
    %555 = arith.mulf %553, %554 : vector<8x128xf32>
    %556 = arith.truncf %555 : vector<8x128xf32> to vector<8x128xbf16>
    %c0_138 = arith.constant 0 : index
    %c0_139 = arith.constant 0 : index
    %557 = vector.load %arg11[%c0_138, %c0_139] : memref<128x384xbf16, #tpu.memory_space<vmem>>, vector<128x384xbf16>
    %cst_140 = arith.constant dense<0.000000e+00> : vector<8x384xf32>
    %558 = tpu.matmul %556, %557, %cst_140 {dimension_numbers = #tpu.dot_dimension_numbers<[1], [0], [0], [1], [0, 0, 1, 1], [], []>} : vector<8x128xbf16>, vector<128x384xbf16>, vector<8x384xf32> -> vector<8x384xf32>
    %c0_141 = arith.constant 0 : index
    %c0_142 = arith.constant 0 : index
    %c0_143 = arith.constant 0 : index
    %559 = vector.load %arg24[%c0_141, %c0_142, %c0_143] : memref<1x8x384xf32, #tpu.memory_space<vmem>>, vector<1x8x384xf32>
    %560 = vector.shape_cast %559 : vector<1x8x384xf32> to vector<8x384xf32>
    %561 = vector.shape_cast %558 : vector<8x384xf32> to vector<1x8x384xf32>
    tpu.vector_store %arg24[%c0_141, %c0_142, %c0_143], %561 {strides = array<i32>} : memref<1x8x384xf32, #tpu.memory_space<vmem>>, vector<1x8x384xf32>,
    %cst_144 = arith.constant dense<0xFF800000> : vector<8xf32>
    %562 = vector.multi_reduction <maximumf>, %558, %cst_144 [1] : vector<8x384xf32> to vector<8xf32>
    %563 = vector.shape_cast %562 : vector<8xf32> to vector<8x1xf32>
    %564 = vector.broadcast %563 : vector<8x1xf32> to vector<8x384xf32>
    %565 = arith.subf %558, %564 : vector<8x384xf32>
    %566 = math.exp %565 : vector<8x384xf32>
    %cst_145 = arith.constant dense<0.000000e+00> : vector<8xf32>
    %567 = vector.multi_reduction <add>, %566, %cst_145 [1] : vector<8x384xf32> to vector<8xf32>
    %568 = vector.shape_cast %567 : vector<8xf32> to vector<8x1xf32>
    %569 = math.log %568 : vector<8x1xf32>
    %570 = arith.addf %563, %569 : vector<8x1xf32>
    %571 = tpu.iota {dimensions = array<i32: 0>} : vector<8x1xi32>
    %c0_i32_146 = arith.constant 0 : i32
    %572 = vector.broadcast %c0_i32_146 : i32 to vector<8x1xi32>
    %c0_i32_147 = arith.constant 0 : i32
    %573 = vector.broadcast %c0_i32_147 : i32 to vector<8x1xi32>
    %574 = arith.cmpi eq, %571, %573 : vector<8x1xi32>
    %575 = arith.index_cast %arg0 : i32 to index
    %c0_148 = arith.constant 0 : index
    %576 = memref.load %arg2[%575, %c0_148] : memref<2x8xi32, #tpu.memory_space<smem>>
    %577 = vector.broadcast %576 : i32 to vector<8x1xi32>
    %578 = arith.select %574, %577, %572 : vector<8x1xi1>, vector<8x1xi32>
    %c1_i32_149 = arith.constant 1 : i32
    %579 = vector.broadcast %c1_i32_149 : i32 to vector<8x1xi32>
    %580 = arith.cmpi eq, %571, %579 : vector<8x1xi32>
    %581 = arith.index_cast %arg0 : i32 to index
    %c1_150 = arith.constant 1 : index
    %582 = memref.load %arg2[%581, %c1_150] : memref<2x8xi32, #tpu.memory_space<smem>>
    %583 = vector.broadcast %582 : i32 to vector<8x1xi32>
    %584 = arith.select %580, %583, %578 : vector<8x1xi1>, vector<8x1xi32>
    %c2_i32_151 = arith.constant 2 : i32
    %585 = vector.broadcast %c2_i32_151 : i32 to vector<8x1xi32>
    %586 = arith.cmpi eq, %571, %585 : vector<8x1xi32>
    %587 = arith.index_cast %arg0 : i32 to index
    %c2_152 = arith.constant 2 : index
    %588 = memref.load %arg2[%587, %c2_152] : memref<2x8xi32, #tpu.memory_space<smem>>
    %589 = vector.broadcast %588 : i32 to vector<8x1xi32>
    %590 = arith.select %586, %589, %584 : vector<8x1xi1>, vector<8x1xi32>
    %c3_i32_153 = arith.constant 3 : i32
    %591 = vector.broadcast %c3_i32_153 : i32 to vector<8x1xi32>
    %592 = arith.cmpi eq, %571, %591 : vector<8x1xi32>
    %593 = arith.index_cast %arg0 : i32 to index
    %c3_154 = arith.constant 3 : index
    %594 = memref.load %arg2[%593, %c3_154] : memref<2x8xi32, #tpu.memory_space<smem>>
    %595 = vector.broadcast %594 : i32 to vector<8x1xi32>
    %596 = arith.select %592, %595, %590 : vector<8x1xi1>, vector<8x1xi32>
    %c4_i32_155 = arith.constant 4 : i32
    %597 = vector.broadcast %c4_i32_155 : i32 to vector<8x1xi32>
    %598 = arith.cmpi eq, %571, %597 : vector<8x1xi32>
    %599 = arith.index_cast %arg0 : i32 to index
    %c4_156 = arith.constant 4 : index
    %600 = memref.load %arg2[%599, %c4_156] : memref<2x8xi32, #tpu.memory_space<smem>>
    %601 = vector.broadcast %600 : i32 to vector<8x1xi32>
    %602 = arith.select %598, %601, %596 : vector<8x1xi1>, vector<8x1xi32>
    %c5_i32_157 = arith.constant 5 : i32
    %603 = vector.broadcast %c5_i32_157 : i32 to vector<8x1xi32>
    %604 = arith.cmpi eq, %571, %603 : vector<8x1xi32>
    %605 = arith.index_cast %arg0 : i32 to index
    %c5_158 = arith.constant 5 : index
    %606 = memref.load %arg2[%605, %c5_158] : memref<2x8xi32, #tpu.memory_space<smem>>
    %607 = vector.broadcast %606 : i32 to vector<8x1xi32>
    %608 = arith.select %604, %607, %602 : vector<8x1xi1>, vector<8x1xi32>
    %c6_i32_159 = arith.constant 6 : i32
    %609 = vector.broadcast %c6_i32_159 : i32 to vector<8x1xi32>
    %610 = arith.cmpi eq, %571, %609 : vector<8x1xi32>
    %611 = arith.index_cast %arg0 : i32 to index
    %c6_160 = arith.constant 6 : index
    %612 = memref.load %arg2[%611, %c6_160] : memref<2x8xi32, #tpu.memory_space<smem>>
    %613 = vector.broadcast %612 : i32 to vector<8x1xi32>
    %614 = arith.select %610, %613, %608 : vector<8x1xi1>, vector<8x1xi32>
    %c7_i32_161 = arith.constant 7 : i32
    %615 = vector.broadcast %c7_i32_161 : i32 to vector<8x1xi32>
    %616 = arith.cmpi eq, %571, %615 : vector<8x1xi32>
    %617 = arith.index_cast %arg0 : i32 to index
    %c7_162 = arith.constant 7 : index
    %618 = memref.load %arg2[%617, %c7_162] : memref<2x8xi32, #tpu.memory_space<smem>>
    %619 = vector.broadcast %618 : i32 to vector<8x1xi32>
    %620 = arith.select %616, %619, %614 : vector<8x1xi1>, vector<8x1xi32>
    %621 = tpu.iota {dimensions = array<i32: 1>} : vector<8x384xi32>
    %622 = vector.broadcast %620 : vector<8x1xi32> to vector<8x384xi32>
    %623 = arith.cmpi eq, %621, %622 : vector<8x384xi32>
    %cst_163 = arith.constant 0.000000e+00 : f32
    %624 = vector.broadcast %cst_163 : f32 to vector<8x384xf32>
    %625 = arith.select %623, %558, %624 : vector<8x384xi1>, vector<8x384xf32>
    %cst_164 = arith.constant dense<0.000000e+00> : vector<8xf32>
    %626 = vector.multi_reduction <add>, %625, %cst_164 [1] : vector<8x384xf32> to vector<8xf32>
    %627 = vector.shape_cast %626 : vector<8xf32> to vector<8x1xf32>
    %628 = arith.subf %570, %627 : vector<8x1xf32>
    %629 = vector.shape_cast %628 : vector<8x1xf32> to vector<8x1xf32>
    %630 = vector.broadcast %629 : vector<8x1xf32> to vector<8x128xf32>
    %c0_165 = arith.constant 0 : index
    %c0_166 = arith.constant 0 : index
    %c0_167 = arith.constant 0 : index
    %631 = vector.load %arg26[%c0_165, %c0_166, %c0_167] : memref<1x8x128xf32, #tpu.memory_space<vmem>>, vector<1x8x128xf32>
    %632 = vector.shape_cast %631 : vector<1x8x128xf32> to vector<8x128xf32>
    %633 = vector.shape_cast %630 : vector<8x128xf32> to vector<1x8x128xf32>
    tpu.vector_store %arg26[%c0_165, %c0_166, %c0_167], %633 {strides = array<i32>} : memref<1x8x128xf32, #tpu.memory_space<vmem>>, vector<1x8x128xf32>,
    return
  }
  func.func @transform_0(%arg0: i32, %arg1: memref<2x8xi32, #tpu.memory_space<smem>>, %arg2: memref<2x8xi32, #tpu.memory_space<smem>>) -> (i32, i32, i32) {
    %c0_i32 = arith.constant 0 : i32
    %c0_i32_0 = arith.constant 0 : i32
    %c0_i32_1 = arith.constant 0 : i32
    return %arg0, %c0_i32, %c0_i32_0 : i32, i32, i32
  }
  func.func @transform_1(%arg0: i32, %arg1: memref<2x8xi32, #tpu.memory_space<smem>>, %arg2: memref<2x8xi32, #tpu.memory_space<smem>>) -> (i32, i32, i32) {
    %c0_i32 = arith.constant 0 : i32
    %c0_i32_0 = arith.constant 0 : i32
    %c0_i32_1 = arith.constant 0 : i32
    return %arg0, %c0_i32, %c0_i32_0 : i32, i32, i32
  }
  func.func @transform_2(%arg0: i32, %arg1: memref<2x8xi32, #tpu.memory_space<smem>>, %arg2: memref<2x8xi32, #tpu.memory_space<smem>>) -> (i32, i32) {
    %c0_i32 = arith.constant 0 : i32
    %c0_i32_0 = arith.constant 0 : i32
    %c0_i32_1 = arith.constant 0 : i32
    return %c0_i32, %c0_i32_0 : i32, i32
  }
  func.func @transform_3(%arg0: i32, %arg1: memref<2x8xi32, #tpu.memory_space<smem>>, %arg2: memref<2x8xi32, #tpu.memory_space<smem>>) -> (i32, i32) {
    %c0_i32 = arith.constant 0 : i32
    %c0_i32_0 = arith.constant 0 : i32
    %c0_i32_1 = arith.constant 0 : i32
    return %c0_i32, %c0_i32_0 : i32, i32
  }
  func.func @transform_4(%arg0: i32, %arg1: memref<2x8xi32, #tpu.memory_space<smem>>, %arg2: memref<2x8xi32, #tpu.memory_space<smem>>) -> (i32, i32) {
    %c0_i32 = arith.constant 0 : i32
    %c0_i32_0 = arith.constant 0 : i32
    %c0_i32_1 = arith.constant 0 : i32
    return %c0_i32, %c0_i32_0 : i32, i32
  }
  func.func @transform_5(%arg0: i32, %arg1: memref<2x8xi32, #tpu.memory_space<smem>>, %arg2: memref<2x8xi32, #tpu.memory_space<smem>>) -> (i32, i32) {
    %c0_i32 = arith.constant 0 : i32
    %c0_i32_0 = arith.constant 0 : i32
    %c0_i32_1 = arith.constant 0 : i32
    return %c0_i32, %c0_i32_0 : i32, i32
  }
  func.func @transform_6(%arg0: i32, %arg1: memref<2x8xi32, #tpu.memory_space<smem>>, %arg2: memref<2x8xi32, #tpu.memory_space<smem>>) -> (i32, i32) {
    %c0_i32 = arith.constant 0 : i32
    %c0_i32_0 = arith.constant 0 : i32
    %c0_i32_1 = arith.constant 0 : i32
    return %c0_i32, %c0_i32_0 : i32, i32
  }
  func.func @transform_7(%arg0: i32, %arg1: memref<2x8xi32, #tpu.memory_space<smem>>, %arg2: memref<2x8xi32, #tpu.memory_space<smem>>) -> (i32, i32) {
    %c0_i32 = arith.constant 0 : i32
    %c0_i32_0 = arith.constant 0 : i32
    %c0_i32_1 = arith.constant 0 : i32
    return %c0_i32, %c0_i32_0 : i32, i32
  }
  func.func @transform_8(%arg0: i32, %arg1: memref<2x8xi32, #tpu.memory_space<smem>>, %arg2: memref<2x8xi32, #tpu.memory_space<smem>>) -> (i32, i32) {
    %c0_i32 = arith.constant 0 : i32
    %c0_i32_0 = arith.constant 0 : i32
    %c0_i32_1 = arith.constant 0 : i32
    return %c0_i32, %c0_i32_0 : i32, i32
  }
  func.func @transform_9(%arg0: i32, %arg1: memref<2x8xi32, #tpu.memory_space<smem>>, %arg2: memref<2x8xi32, #tpu.memory_space<smem>>) -> (i32, i32) {
    %c0_i32 = arith.constant 0 : i32
    %c0_i32_0 = arith.constant 0 : i32
    %c0_i32_1 = arith.constant 0 : i32
    return %c0_i32, %c0_i32_0 : i32, i32
  }
  func.func @transform_10(%arg0: i32, %arg1: memref<2x8xi32, #tpu.memory_space<smem>>, %arg2: memref<2x8xi32, #tpu.memory_space<smem>>) -> (i32, i32) {
    %c0_i32 = arith.constant 0 : i32
    %c0_i32_0 = arith.constant 0 : i32
    %c0_i32_1 = arith.constant 0 : i32
    return %c0_i32, %c0_i32_0 : i32, i32
  }
  func.func @transform_11(%arg0: i32, %arg1: memref<2x8xi32, #tpu.memory_space<smem>>, %arg2: memref<2x8xi32, #tpu.memory_space<smem>>) -> (i32, i32) {
    %c0_i32 = arith.constant 0 : i32
    %c0_i32_0 = arith.constant 0 : i32
    %c0_i32_1 = arith.constant 0 : i32
    return %c0_i32, %c0_i32_0 : i32, i32
  }
  func.func @transform_12(%arg0: i32, %arg1: memref<2x8xi32, #tpu.memory_space<smem>>, %arg2: memref<2x8xi32, #tpu.memory_space<smem>>) -> (i32, i32) {
    %c0_i32 = arith.constant 0 : i32
    %c0_i32_0 = arith.constant 0 : i32
    %c0_i32_1 = arith.constant 0 : i32
    return %c0_i32, %c0_i32_0 : i32, i32
  }
  func.func @transform_13(%arg0: i32, %arg1: memref<2x8xi32, #tpu.memory_space<smem>>, %arg2: memref<2x8xi32, #tpu.memory_space<smem>>) -> (i32, i32) {
    %c0_i32 = arith.constant 0 : i32
    %c0_i32_0 = arith.constant 0 : i32
    %c0_i32_1 = arith.constant 0 : i32
    return %c0_i32, %c0_i32_0 : i32, i32
  }
  func.func @transform_14(%arg0: i32, %arg1: memref<2x8xi32, #tpu.memory_space<smem>>, %arg2: memref<2x8xi32, #tpu.memory_space<smem>>) -> (i32, i32) {
    %c0_i32 = arith.constant 0 : i32
    %c0_i32_0 = arith.constant 0 : i32
    %c0_i32_1 = arith.constant 0 : i32
    return %c0_i32, %c0_i32_0 : i32, i32
  }
  func.func @transform_15(%arg0: i32, %arg1: memref<2x8xi32, #tpu.memory_space<smem>>, %arg2: memref<2x8xi32, #tpu.memory_space<smem>>) -> (i32, i32) {
    %c0_i32 = arith.constant 0 : i32
    %c0_i32_0 = arith.constant 0 : i32
    %c0_i32_1 = arith.constant 0 : i32
    return %c0_i32, %c0_i32_0 : i32, i32
  }
  func.func @transform_16(%arg0: i32, %arg1: memref<2x8xi32, #tpu.memory_space<smem>>, %arg2: memref<2x8xi32, #tpu.memory_space<smem>>) -> (i32, i32) {
    %c0_i32 = arith.constant 0 : i32
    %c0_i32_0 = arith.constant 0 : i32
    %c0_i32_1 = arith.constant 0 : i32
    return %c0_i32, %c0_i32_0 : i32, i32
  }
  func.func @transform_17(%arg0: i32, %arg1: memref<2x8xi32, #tpu.memory_space<smem>>, %arg2: memref<2x8xi32, #tpu.memory_space<smem>>) -> (i32, i32) {
    %c0_i32 = arith.constant 0 : i32
    %c0_i32_0 = arith.constant 0 : i32
    %c0_i32_1 = arith.constant 0 : i32
    return %c0_i32, %c0_i32_0 : i32, i32
  }
  func.func @transform_18(%arg0: i32, %arg1: memref<2x8xi32, #tpu.memory_space<smem>>, %arg2: memref<2x8xi32, #tpu.memory_space<smem>>) -> (i32, i32) {
    %c0_i32 = arith.constant 0 : i32
    %c0_i32_0 = arith.constant 0 : i32
    %c0_i32_1 = arith.constant 0 : i32
    return %c0_i32, %c0_i32_0 : i32, i32
  }
  func.func @transform_19(%arg0: i32, %arg1: memref<2x8xi32, #tpu.memory_space<smem>>, %arg2: memref<2x8xi32, #tpu.memory_space<smem>>) -> (i32, i32) {
    %c0_i32 = arith.constant 0 : i32
    %c0_i32_0 = arith.constant 0 : i32
    %c0_i32_1 = arith.constant 0 : i32
    return %c0_i32, %c0_i32_0 : i32, i32
  }
  func.func @transform_20(%arg0: i32, %arg1: memref<2x8xi32, #tpu.memory_space<smem>>, %arg2: memref<2x8xi32, #tpu.memory_space<smem>>) -> (i32, i32) {
    %c0_i32 = arith.constant 0 : i32
    %c0_i32_0 = arith.constant 0 : i32
    %c0_i32_1 = arith.constant 0 : i32
    return %c0_i32, %c0_i32_0 : i32, i32
  }
  func.func @transform_21(%arg0: i32, %arg1: memref<2x8xi32, #tpu.memory_space<smem>>, %arg2: memref<2x8xi32, #tpu.memory_space<smem>>) -> (i32, i32, i32) {
    %c0_i32 = arith.constant 0 : i32
    %c0_i32_0 = arith.constant 0 : i32
    %c0_i32_1 = arith.constant 0 : i32
    return %arg0, %c0_i32, %c0_i32_0 : i32, i32, i32
  }
  func.func @transform_22(%arg0: i32, %arg1: memref<2x8xi32, #tpu.memory_space<smem>>, %arg2: memref<2x8xi32, #tpu.memory_space<smem>>) -> (i32, i32, i32) {
    %c0_i32 = arith.constant 0 : i32
    %c0_i32_0 = arith.constant 0 : i32
    %c0_i32_1 = arith.constant 0 : i32
    return %arg0, %c0_i32, %c0_i32_0 : i32, i32, i32
  }
  func.func @transform_23(%arg0: i32, %arg1: memref<2x8xi32, #tpu.memory_space<smem>>, %arg2: memref<2x8xi32, #tpu.memory_space<smem>>) -> (i32, i32, i32) {
    %c0_i32 = arith.constant 0 : i32
    %c0_i32_0 = arith.constant 0 : i32
    %c0_i32_1 = arith.constant 0 : i32
    return %arg0, %c0_i32, %c0_i32_0 : i32, i32, i32
  }
}

</mosaic_0001>

<bundles_post_ra>
// kernel: model_forward.1
= control target key start
LH: loop header
LB: loop body
LE: loop exit
PB: predicated region body
PF: predicated region fallthrough
CT: control target
= control target key end

     0   :  { %s9839_s0 = inlined_call_operand.vmem [shape: s32[2,8], index: 0, kind: input, shape index: {}]   ;;  %s9840_s2 = inlined_call_operand.vmem [shape: f32[2,352,6], index: 2, kind: input, shape index: {}]   ;;  %s9841_s3 = inlined_call_operand.vmem [shape: f32[2,1,16], index: 3, kind: input, shape index: {}]   ;;  %s9842_s4 = inlined_call_operand.vmem [shape: bf16[352,352], index: 4, kind: input, shape index: {}]   ;;  %s9843_s5 = inlined_call_operand.vmem [shape: bf16[6,64], index: 5, kind: input, shape index: {}]   ;;  %s9844_s6 = inlined_call_operand.vmem [shape: f32[1,64], index: 6, kind: input, shape index: {}]   ;;  %s9845_s7 = inlined_call_operand.vmem [shape: bf16[64,128], index: 7, kind: input, shape index: {}]   ;;  %s9846_s8 = inlined_call_operand.vmem [shape: f32[1,128], index: 8, kind: input, shape index: {}]   ;;  %s9847_s9 = inlined_call_operand.vmem [shape: f32[384,128], index: 9, kind: input, shape index: {}]   ;;  %s9848_s10 = inlined_call_operand.vmem [shape: bf16[128,384], index: 10, kind: input, shape index: {}]   ;;  %s9849_s11 = inlined_call_operand.vmem [shape: f32[8,128], index: 11, kind: input, shape index: {}]   ;;  %s9850_s12 = inlined_call_operand.vmem [shape: bf16[128,384], index: 12, kind: input, shape index: {}]   ;;  %s9851_s13 = inlined_call_operand.vmem [shape: bf16[128,128], index: 13, kind: input, shape index: {}]   ;;  %s9852_s14 = inlined_call_operand.vmem [shape: bf16[128,256], index: 14, kind: input, shape index: {}]   ;;  %s9853_s15 = inlined_call_operand.vmem [shape: bf16[256,128], index: 15, kind: input, shape index: {}]   ;;  %s9854_s16 = inlined_call_operand.vmem [shape: bf16[128,384], index: 16, kind: input, shape index: {}]   ;;  %s9855_s17 = inlined_call_operand.vmem [shape: bf16[128,128], index: 17, kind: input, shape index: {}]   ;;  %s9856_s18 = inlined_call_operand.vmem [shape: bf16[128,128], index: 18, kind: input, shape index: {}]   ;;  %s9857_s19 = inlined_call_operand.vmem [shape: bf16[128,256], index: 19, kind: input, shape index: {}]   ;;  %s9858_s20 = inlined_call_operand.vmem [shape: bf16[128,128], index: 20, kind: input, shape index: {}]   ;;  %s9859_s21 = inlined_call_operand.vmem [shape: bf16[128,256], index: 21, kind: input, shape index: {}]   ;;  %s9860_s22 = inlined_call_operand.vmem [shape: bf16[256,128], index: 22, kind: input, shape index: {}]   ;;  %s9861_s23 = inlined_call_operand.hbm [shape: f32[2,8,384], index: 23, kind: output, shape index: {0}]   ;;  %s9862_s24 = inlined_call_operand.hbm [shape: s32[2,16,128], index: 24, kind: output, shape index: {1}]   ;;  %s9863_s25 = inlined_call_operand.vmem [shape: f32[2,8,128], index: 25, kind: output, shape index: {2}]   ;;  %s9864_s1 = inlined_call_operand.vmem [shape: s32[2,8], index: 1, kind: input, shape index: {}]  }
   0x1   :  { %9896 = sst [smem:[#allocation23_spill]] %s9839_s0 }
   0x2   :  { %9897 = sst [smem:[#allocation24_spill]] %s9840_s2 }
   0x3   :  { %9898 = sst [smem:[#allocation25_spill]] %s9841_s3 }
   0x4   :  { %9899 = sst [smem:[#allocation26_spill]] %s9842_s4  ;;  %s35_s4 = sshll.u32 %s9864_s1, 4  ;;  %s36_s4 = int_to_ptr.vmem [resolvable:$true] %s35_s4 }
   0x5   :  { %9900 = sst [smem:[#allocation27_spill]] %s9843_s5 }
   0x6   :  { %9901 = sst [smem:[#allocation28_spill]] %s9844_s6 }
   0x7   :  { %9902 = sst [smem:[#allocation29_spill]] %s9845_s7  ;;  %s9912_s7 = sld [smem:[#allocation23_spill]] }
   0x8   :  { %9903 = sst [smem:[#allocation30_spill]] %s9846_s8 }
   0x9   :  { %9904 = sst [smem:[#allocation31_spill]] %s9847_s9 }
   0xa   :  { %9905 = sst [smem:[#allocation32_spill]] %s9848_s10 }
   0xb   :  { %9906 = sst [smem:[#allocation33_spill]] %s9850_s12 }
   0xc   :  { %9907 = sst [smem:[#allocation34_spill]] %s9851_s13 }
   0xd   :  { %9908 = sst [smem:[#allocation35_spill]] %s9858_s20  ;;  %s31_s20 = sshll.u32 %s9912_s7, 4  ;;  %s32_s20 = int_to_ptr.vmem [resolvable:$true] %s31_s20 }
   0xe   :  { %9909 = sst [smem:[#allocation36_spill]] %s9861_s23  ;;  %s7821_s26 = scalar_lea.vmem %s32_s20, 32 }
   0xf   :  { %9910 = sst [smem:[#allocation37_spill]] %s9862_s24  ;;  %p7822_p0 = scmp.ne.s32.totalorder %s32_s20, %s7821_s26 }
  0x10   :  { %9911 = sst [smem:[#allocation38_spill]] %s9863_s25  ;;  %p7826_p1 = scmp.lt.s32.totalorder %s32_s20, %s32_s20 }
  0x11   :  { %p7827_p2 = scmp.lt.s32.totalorder %s7821_s26, %s7821_s26 }
  0x13   :  { %p7828_p3 = por %p7827_p2, %p7826_p1 }
  0x15   :  { %p7829_p4 = pnand %p7828_p3, %p7822_p0 }
  0x17   :  { %7832 = shalt.err (!%p7829_p4)  }
  0x18   :  { %s7943_s2 = smov [#allocation3]   ;;  %s7833_s9 = scalar_lea.vmem %s36_s4, 32 }
  0x19   :  { %34 = dma.vmem_to_smem %s32_s20, 32, %s7943_s2, [#allocation2] }
  0x1a   :  { %p7834_p5 = scmp.ne.s32.totalorder %s36_s4, %s7833_s9  ;;  %p7838_p6 = scmp.lt.s32.totalorder %s36_s4, %s36_s4 }
  0x1b   :  { %p7839_p7 = scmp.lt.s32.totalorder %s7833_s9, %s7833_s9 }
  0x1d   :  { %p7840_p8 = por %p7839_p7, %p7838_p6 }
  0x1f   :  { %p7841_p9 = pnand %p7840_p8, %p7834_p5 }
  0x21   :  { %7844 = shalt.err (!%p7841_p9)  }
  0x22   :  { %s7944_s27 = smov [#allocation4]  }
  0x23   :  { %38 = dma.vmem_to_smem %s36_s4, 32, %s7944_s27, [#allocation2] }
  0x24   :  { %7917 = dma.done.wait [#allocation2], 64 }
  0x25   :  { %7918 = vsyncadd [#allocation2], 4294967232 }
  0x26   :  { %40 = sfence }
  0x27   :  { %41 = vsyncpa [#allocation6], 0 }
  0x28   :  { %43 = vsyncpa [#allocation6 + $0x1], 0 }
  0x29   :  { %44 = vsyncpa [#allocation8], 0 }
  0x2a   :  { %46 = vsyncpa [#allocation8 + $0x1], 0  ;;  %s8092_s1 = smov 0   ;;  %s8094_s5 = smov 0  }
  0x2b   :  { %s8096_s20 = smov 0   ;;  %s8098_s28 = smov 0  }
  0x2c LB: > { %9913 = sst [smem:[#allocation12_spill]] %s7929_s1  ;;  %s8113_s10 = sadd.s32 4294967295, %s7941_s28   ;;  %s7941_s28 = sphi %s8098_s28, %s9954_s28   ;;  %s7937_s20 = sphi %s8096_s20, %s9957_s20   ;;  %s7933_s5 = sphi %s8094_s5, %s9956_s5   ;;  %s7929_s1 = sphi %s8092_s1, %s9955_s1  }
  0x2d   : > { %9914 = sst [smem:[#allocation13_spill]] %s7933_s5  ;;  %s6300_s6 = sadd.s32 4294967294, %s7941_s28  }
  0x2e   : > { %9915 = sst [smem:[#allocation14_spill]] %s7937_s20  ;;  %s8117_s0 = sadd.s32 1, %s7941_s28  }
  0x2f   : > { %9916 = sst [smem:[#allocation15_spill]] %s7941_s28  ;;  %s510_s29 = sadd.s32 1, %s7937_s20 }
  0x30   : > { %9917 = sst [smem:[#allocation16_spill]] %s8113_s10  ;;  %s507_s3 = ssub.s32 %s7941_s28, %s8117_s0 }
  0x31   : > { %9918 = sst [smem:[#allocation17_spill]] %s8117_s0  ;;  %p520_p10 = scmp.ne.s32.totalorder %s7937_s20, %s7933_s5 }
  0x32   : > { %p508_p11 = scmp.eq.s32.totalorder %s507_s3, 0  ;;  %p521_p12 = scmp.eq.s32.totalorder %s8113_s10, 1 }
  0x33   : > { %p526_p13 = scmp.ne.s32.totalorder %s7933_s5, %s7929_s1  ;;  %p527_p0 = scmp.eq.s32.totalorder %s6300_s6, 1 }
  0x34   : > { %s8128_s7 = scalar_select %p508_p11, %s7937_s20, %s510_s29  }
  0x35   : > { %p8130_p1 = por %p521_p12, %p520_p10  ;;  %p8134_p2 = por %p527_p0, %p526_p13 }
  0x36   : > { %9919 = sst [smem:[#allocation18_spill]] %s8128_s7  ;;  %p6303_p3 = scmp.ge.s32.totalorder %s7941_s28, 1 }
  0x37   : > { %s9920_s30 = scalar_select %p8130_p1, 1, 0 }
  0x38   : > { %s9922_s8 = scalar_select %p8134_p2, 1, 0 }
  0x39   : > { %9921 = sst [smem:[#allocation19_spill]] %s9920_s30  ;;  %p668_p4 = scmp.lt.s32.totalorder %s7941_s28, 3 }
  0x3a   : > { %9923 = sst [smem:[#allocation20_spill]] %s9922_s8 }
  0x3b   : > { %p669_p5 = pnand %p6303_p3, %p668_p4 }
  0x3d   : > { %672 = sbr.rel (%p669_p5) target bundleno = 8381 (0x20bd), region = 104 }
  0x44   : > { %s9924_s2 = sld [smem:[#allocation27_spill]]  ;;  %vm899_vm0 = vcmask 1042432   ;;  %p744_p6 = scmp.lt.s32.totalorder %s8113_s10, 1  ;;  %vm832_vm1 = vcmask 48128   ;;  %vm1552_vm2 = vcmask 785408   ;;  %vm2142_vm3 = vcmask 523264  }
  0x45   : > { %s9926_s3 = sld [smem:[#allocation24_spill]]  ;;  %s9928_s7 = sld [smem:[#allocation28_spill]] }
  0x46   : > { %s8148_s9 = scalar_select %p744_p6, %s8113_s10, 1 }
  0x47   : > { %s9929_s0 = sld [smem:[#allocation29_spill]]  ;;  %s9930_s20 = sld [smem:[#allocation30_spill]] }
  0x48   : > { %9925 = sst [smem:[#allocation21_spill]] %s8148_s9  ;;  %s7336_s27 = smul.u32 352, %s8148_s9 }
  0x49   : > { %s9931_s12 = sld [smem:[#allocation33_spill]]  ;;  %s8719_s8 = sand.u32 1, %s7933_s5  }
  0x4a   : > { %v824_v0 = vld [vmem:[%s9924_s2] sm:$0x7]  ;;  %s9933_s29 = sld [smem:[#allocation25_spill]]  ;;  %s9881_s1 = smov 96  }
  0x4b   : > { %7333 = vmatprep.subr.msk.bf16.mxu0 %vm899_vm0, %v824_v0  ;;  %7334 = vmatprep.subr.msk.bf16.mxu1 %vm899_vm0, %v824_v0  ;;  %v901_v1 = vsel %vm899_vm0, %v824_v0, 0  ;;  %s8154_s4 = scalar_lea.vmem %s9926_s3, %s7336_s27  ;;  %s9927_s27 = sld [smem:[#allocation26_spill]] }
  0x4c   : > { %6894 = vmatpush3.bf16.msra.mxu0 %v901_v1  ;;  %7332 = vmatpush3.bf16.msra.mxu1 %v901_v1  ;;  %v758_v2 = vld [vmem:[%s8154_s4] sm:$0xff]  ;;  %v759_v3 = vld [vmem:[%s8154_s4 + $0x8] sm:$0xff]  ;;  %v760_v7 = vld [vmem:[%s8154_s4 + $0x10] sm:$0xff]  ;;  %s9934_s13 = sld [smem:[#allocation34_spill]]  ;;  %s8970_s6 = sshll.u32 %s8113_s10, 7 }
  0x4d   : > { %v770_v4 = vld [vmem:[%s8154_s4 + $0x60] sm:$0xff]  ;;  %v802_v5 = vpack.c.bf16 %v759_v3, %v758_v2  ;;  %v771_v6 = vld [vmem:[%s8154_s4 + $0x68] sm:$0xff]  ;;  %v761_v8 = vld [vmem:[%s8154_s4 + $0x18] sm:$0xff]  ;;  %s3803_s26 = sadd.s32 4, %s8970_s6  ;;  %s3807_s25 = sadd.s32 5, %s8970_s6 }
  0x4e   : > { %v808_v9 = vpack.c.bf16 %v771_v6, %v770_v4  ;;  %v803_v10 = vpack.c.bf16 %v761_v8, %v760_v7  ;;  %v772_v11 = vld [vmem:[%s8154_s4 + $0x70] sm:$0xff]  ;;  %v773_v12 = vld [vmem:[%s8154_s4 + $0x78] sm:$0xff]  ;;  %v762_v13 = vld [vmem:[%s8154_s4 + $0x20] sm:$0xff]  ;;  %v7945_v4 = vmov 0   ;;  %s3804_s28 = sld [smem:[#allocation3 + %s3803_s26]]  ;;  %s3811_s10 = sadd.s32 6, %s8970_s6 }
  0x4f   : > { %6895 = vmatprep.mubr.msk.bf16.mxu0 %vm832_vm1, %v802_v5  ;;  %v809_v14 = vpack.c.bf16 %v773_v12, %v772_v11  ;;  %v763_v15 = vld [vmem:[%s8154_s4 + $0x28] sm:$0xff]  ;;  %v774_v16 = vld [vmem:[%s8154_s4 + $0x80] sm:$0xff]  ;;  %v764_v20 = vld [vmem:[%s8154_s4 + $0x30] sm:$0xff]  ;;  %1619 = vmatprep.subr.bf16.mxu1 %v7945_v4  ;;  %s3812_s24 = sld [smem:[#allocation3 + %s3811_s10]] }
  0x50   : > { %v775_v17 = vld [vmem:[%s8154_s4 + $0x88] sm:$0xff]  ;;  %6907 = vmatprep.mubr.msk.bf16.mxu1 %vm832_vm1, %v808_v9  ;;  %6896 = vmatmul.mubr.msk.bf16.vlgmr.msra.gmra.mrb[0].mxu0 %vm832_vm1, %v803_v10  ;;  %v804_v18 = vpack.c.bf16 %v763_v15, %v762_v13  ;;  %v765_v21 = vld [vmem:[%s8154_s4 + $0x38] sm:$0xff]  ;;  %v776_v22 = vld [vmem:[%s8154_s4 + $0x90] sm:$0xff]  ;;  %s751_s3 = scalar_lea.vmem %s9933_s29, %s8148_s9  ;;  %s3788_s29 = sld [smem:[#allocation3 + %s8970_s6]] }
  0x51   : > { %v810_v19 = vpack.c.bf16 %v775_v17, %v774_v16  ;;  %6908 = vmatmul.mubr.msk.bf16.vlgmr.msra.gmra.mrb[0].mxu1 %vm832_vm1, %v809_v14  ;;  %v777_v23 = vld [vmem:[%s8154_s4 + $0x98] sm:$0xff]  ;;  %v766_v24 = vld [vmem:[%s8154_s4 + $0x40] sm:$0xff]  ;;  %v767_v25 = vld [vmem:[%s8154_s4 + $0x48] sm:$0xff]  ;;  %v805_v28 = vpack.c.bf16 %v765_v21, %v764_v20  ;;  %s3815_s9 = sadd.s32 7, %s8970_s6 }
  0x52   : > { %6899 = vmatprep.mubr.msk.bf16.mxu0 %vm832_vm1, %v804_v18  ;;  %v778_v26 = vld [vmem:[%s8154_s4 + $0xa0] sm:$0xff]  ;;  %v779_v27 = vld [vmem:[%s8154_s4 + $0xa8] sm:$0xff]  ;;  %v811_v29 = vpack.c.bf16 %v777_v23, %v776_v22  ;;  %v806_v30 = vpack.c.bf16 %v767_v25, %v766_v24  ;;  %v768_v32 = vld [vmem:[%s8154_s4 + $0x50] sm:$0xff] }
  0x53   : > { %6911 = vmatprep.mubr.msk.bf16.mxu1 %vm832_vm1, %v810_v19  ;;  %v812_v31 = vpack.c.bf16 %v779_v27, %v778_v26  ;;  %v769_v33 = vld [vmem:[%s8154_s4 + $0x58] sm:$0xff]  ;;  %v780_v34 = vld [vmem:[%s8154_s4 + $0xb0] sm:$0xff]  ;;  %v782_v36 = vld [vmem:[%s8154_s4 + $0xc0] sm:$0xff] }
  0x54   : > { %v781_v35 = vld [vmem:[%s8154_s4 + $0xb8] sm:$0xff]  ;;  %v783_v37 = vld [vmem:[%s8154_s4 + $0xc8] sm:$0xff]  ;;  %v807_v38 = vpack.c.bf16 %v769_v33, %v768_v32  ;;  %v784_v41 = vld [vmem:[%s8154_s4 + $0xd0] sm:$0xff] }
  0x55   : > { %v813_v39 = vpack.c.bf16 %v781_v35, %v780_v34  ;;  %v814_v40 = vpack.c.bf16 %v783_v37, %v782_v36  ;;  %v785_v42 = vld [vmem:[%s8154_s4 + $0xd8] sm:$0xff]  ;;  %v786_v43 = vld [vmem:[%s8154_s4 + $0xe0] sm:$0xff]  ;;  %v787_v44 = vld [vmem:[%s8154_s4 + $0xe8] sm:$0xff] }
  0x56   : > { %v815_v45 = vpack.c.bf16 %v785_v42, %v784_v41  ;;  %v816_v46 = vpack.c.bf16 %v787_v44, %v786_v43  ;;  %v788_v47 = vld [vmem:[%s8154_s4 + $0xf0] sm:$0xff]  ;;  %v789_v48 = vld [vmem:[%s8154_s4 + $0xf8] sm:$0xff]  ;;  %v790_v49 = vld [vmem:[%s8154_s4 + $0x100] sm:$0xff] }
  0x57   : > { %v791_v50 = vld [vmem:[%s8154_s4 + $0x108] sm:$0xff]  ;;  %v817_v51 = vpack.c.bf16 %v789_v48, %v788_v47  ;;  %v792_v53 = vld [vmem:[%s8154_s4 + $0x110] sm:$0xff]  ;;  %v793_v54 = vld [vmem:[%s8154_s4 + $0x118] sm:$0xff] }
  0x58   : > { %6900 = vmatmul.mubr.msk.bf16.gmra.mrb[4].mxu0 %vm832_vm1, %v805_v28  ;;  %v818_v52 = vpack.c.bf16 %v791_v50, %v790_v49  ;;  %v794_v55 = vld [vmem:[%s8154_s4 + $0x120] sm:$0xff]  ;;  %v795_v56 = vld [vmem:[%s8154_s4 + $0x128] sm:$0xff]  ;;  %v819_v57 = vpack.c.bf16 %v793_v54, %v792_v53  ;;  %v796_v59 = vld [vmem:[%s8154_s4 + $0x130] sm:$0xff] }
  0x59   : > { %6912 = vmatmul.mubr.msk.bf16.gmra.mrb[4].mxu1 %vm832_vm1, %v811_v29  ;;  %6903 = vmatprep.mubr.msk.bf16.mxu0 %vm832_vm1, %v806_v30  ;;  %v820_v58 = vpack.c.bf16 %v795_v56, %v794_v55  ;;  %v797_v60 = vld [vmem:[%s8154_s4 + $0x138] sm:$0xff]  ;;  %v798_v61 = vld [vmem:[%s8154_s4 + $0x140] sm:$0xff]  ;;  %v799_v62 = vld [vmem:[%s8154_s4 + $0x148] sm:$0xff] }
  0x5a   : > { %6915 = vmatprep.mubr.msk.bf16.mxu1 %vm832_vm1, %v812_v31  ;;  %v821_v63 = vpack.c.bf16 %v797_v60, %v796_v59  ;;  %v822_v0 = vpack.c.bf16 %v799_v62, %v798_v61  ;;  %v800_v1 = vld [vmem:[%s8154_s4 + $0x150] sm:$0xff]  ;;  %v801_v2 = vld [vmem:[%s8154_s4 + $0x158] sm:$0xff]  ;;  %v8233_v8 = vld [vmem:[%s9928_s7] ss:$0 sm:$0xff] }
  0x5b   : > { %v823_v3 = vpack.c.bf16 %v801_v2, %v800_v1  ;;  %v7410_v5 = vld [vmem:[%s9927_s27 + $0x4] ss:$12 sps:$4 sm:$0xff]   ;;  %v7411_v6 = vld [vmem:[%s9927_s27 + $0x8] ss:$12 sps:$4 sm:$0xff]  }
  0x60   : > { %6904 = vmatmul.mubr.msk.bf16.gmra.mrb[8].mxu0 %vm832_vm1, %v807_v38 }
  0x61   : > { %6916 = vmatmul.mubr.msk.bf16.gmra.mrb[8].mxu1 %vm832_vm1, %v813_v39  ;;  %6951 = vmatprep.mubr.msk.bf16.mxu0 %vm1552_vm2, %v7411_v6 }
  0x62   : > { %6919 = vmatprep.mubr.msk.bf16.mxu1 %vm832_vm1, %v814_v40 }
  0x69   : > { %6920 = vmatmul.mubr.msk.bf16.gmra.mrb[12].mxu1 %vm832_vm1, %v815_v45 }
  0x6a   : > { %6923 = vmatprep.mubr.msk.bf16.mxu1 %vm832_vm1, %v816_v46 }
  0x71   : > { %6924 = vmatmul.mubr.msk.bf16.gmra.mrb[16].mxu1 %vm832_vm1, %v817_v51 }
  0x72   : > { %6927 = vmatprep.mubr.msk.bf16.mxu1 %vm832_vm1, %v818_v52 }
  0x79   : > { %6928 = vmatmul.mubr.msk.bf16.gmra.mrb[20].mxu1 %vm832_vm1, %v819_v57 }
  0x7a   : > { %6931 = vmatprep.mubr.msk.bf16.mxu1 %vm832_vm1, %v820_v58 }
  0x81   : > { %6932 = vmatmul.mubr.msk.bf16.gmra.mrb[24].mxu1 %vm832_vm1, %v821_v63 }
  0x82   : > { %6935 = vmatprep.mubr.msk.bf16.mxu1 %vm832_vm1, %v822_v0 }
  0x89   : > { %6936 = vmatmul.mubr.msk.bf16.gmra.mrb[28].mxu1 %vm832_vm1, %v823_v3 }
  0x8a   : > { %1651 = vmatprep.mubr.bf16.mxu1 %v7410_v5 }
 0x123   : > { %v6897_v7 = vpop.f32.mrb[0].mxu0 }
 0x124   : > { %v937_v9 = vpop.f32.mrb[1].mxu0  ;;  %v6909_v10 = vpop.f32.mrb[0].mxu1  ;;  %v946_v14 = vadd.f32 %v6897_v7, %v8233_v8 }
 0x125   : > { %v6898_v11 = vpop.f32.mrb[2].mxu0  ;;  %v8236_v12 = vadd.f32 %v6909_v10, %v8233_v8  ;;  %v985_v13 = vpop.f32.mrb[1].mxu1  ;;  %v938_v19 = vadd.f32 %v8233_v8, %v937_v9 }
 0x126   : > { %v949_v15 = vadd.f32 %v6898_v11, %v8233_v8  ;;  %v940_v16 = vpop.f32.mrb[3].mxu0  ;;  %v8241_v17 = vadd.f32 %v8233_v8, %v985_v13  ;;  %v6910_v18 = vpop.f32.mrb[2].mxu1 }
 0x127   : > { %v941_v20 = vadd.f32 %v8233_v8, %v940_v16  ;;  %v8246_v21 = vadd.f32 %v6910_v18, %v8233_v8  ;;  %v988_v22 = vpop.f32.mrb[3].mxu1 }
 0x128   : > { %v1201_v23 = vpack.c.bf16 %v949_v15, %v946_v14  ;;  %v8249_v24 = vadd.f32 %v8233_v8, %v988_v22 }
 0x129   : > { %v1200_v25 = vpack.c.bf16 %v941_v20, %v938_v19  ;;  %v1207_v26 = vpack.c.bf16 %v8246_v21, %v8236_v12 }
 0x12a   : > { %v1206_v27 = vpack.c.bf16 %v8249_v24, %v8241_v17 }
 0x12b   : > { %v6901_v28 = vpop.f32.mrb[4].mxu0  ;;  %1620 = vmatpush1.bf16.msra.mxu1 %v1200_v25 }
 0x12c   : > { %v953_v29 = vpop.f32.mrb[5].mxu0  ;;  %1621 = vmatprep.subr.bf16.mxu1 %v7945_v4  ;;  %v6913_v30 = vpop.f32.mrb[4].mxu1  ;;  %v962_v34 = vadd.f32 %v6901_v28, %v8233_v8 }
 0x12d   : > { %v6902_v31 = vpop.f32.mrb[6].mxu0  ;;  %v8257_v32 = vadd.f32 %v6913_v30, %v8233_v8  ;;  %v1001_v33 = vpop.f32.mrb[5].mxu1  ;;  %v954_v39 = vadd.f32 %v8233_v8, %v953_v29 }
 0x12e   : > { %v965_v35 = vadd.f32 %v6902_v31, %v8233_v8  ;;  %v956_v36 = vpop.f32.mrb[7].mxu0  ;;  %v8262_v37 = vadd.f32 %v8233_v8, %v1001_v33  ;;  %v6914_v38 = vpop.f32.mrb[6].mxu1 }
 0x12f   : > { %v957_v40 = vadd.f32 %v8233_v8, %v956_v36  ;;  %1622 = vmatpush1.bf16.msra.mxu1 %v1201_v23  ;;  %v8267_v41 = vadd.f32 %v6914_v38, %v8233_v8  ;;  %v1004_v42 = vpop.f32.mrb[7].mxu1 }
 0x130   : > { %v1203_v43 = vpack.c.bf16 %v965_v35, %v962_v34  ;;  %1623 = vmatprep.subr.bf16.mxu1 %v7945_v4  ;;  %v1005_v44 = vadd.f32 %v8233_v8, %v1004_v42 }
 0x131   : > { %v1202_v45 = vpack.c.bf16 %v957_v40, %v954_v39  ;;  %v1209_v46 = vpack.c.bf16 %v8267_v41, %v8257_v32 }
 0x132   : > { %v1208_v47 = vpack.c.bf16 %v1005_v44, %v8262_v37 }
 0x133   : > { %v6905_v48 = vpop.f32.mrb[8].mxu0  ;;  %1624 = vmatpush1.bf16.msra.mxu1 %v1202_v45 }
 0x134   : > { %v969_v49 = vpop.f32.mrb[9].mxu0  ;;  %1625 = vmatprep.subr.bf16.mxu1 %v7945_v4  ;;  %v6917_v50 = vpop.f32.mrb[8].mxu1  ;;  %v978_v54 = vadd.f32 %v6905_v48, %v8233_v8 }
 0x135   : > { %v6906_v51 = vpop.f32.mrb[10].mxu0  ;;  %v8276_v52 = vadd.f32 %v6917_v50, %v8233_v8  ;;  %v1017_v53 = vpop.f32.mrb[9].mxu1  ;;  %v970_v59 = vadd.f32 %v8233_v8, %v969_v49 }
 0x136   : > { %v981_v55 = vadd.f32 %v6906_v51, %v8233_v8  ;;  %v972_v56 = vpop.f32.mrb[11].mxu0  ;;  %v1018_v57 = vadd.f32 %v8233_v8, %v1017_v53  ;;  %v6918_v58 = vpop.f32.mrb[10].mxu1 }
 0x137   : > { %v973_v60 = vadd.f32 %v8233_v8, %v972_v56  ;;  %1626 = vmatpush1.bf16.msra.mxu1 %v1203_v43  ;;  %v1029_v61 = vadd.f32 %v6918_v58, %v8233_v8  ;;  %v1020_v62 = vpop.f32.mrb[11].mxu1  ;;  %v7408_v56 = vld [vmem:[%s9927_s27] ss:$12 sps:$4 sm:$0xff]   ;;  %v7416_v58 = vld [vmem:[%s9927_s27 + $0x38] ss:$12 sps:$4 sm:$0xff]  }
 0x138   : > { %v1205_v63 = vpack.c.bf16 %v981_v55, %v978_v54  ;;  %1627 = vmatprep.subr.bf16.mxu1 %v7945_v4  ;;  %v1021_v0 = vadd.f32 %v8233_v8, %v1020_v62  ;;  %v7424_v62 = vld [vmem:[%s9927_s27 + $0x68] ss:$12 sps:$4 sm:$0xff]  }
 0x139   : > { %v1204_v1 = vpack.c.bf16 %v973_v60, %v970_v59  ;;  %v1211_v2 = vpack.c.bf16 %v1029_v61, %v8276_v52  ;;  %v7415_v59 = vld [vmem:[%s9927_s27 + $0x18] ss:$12 sps:$4 sm:$0xff]   ;;  %v7417_v60 = vld [vmem:[%s9927_s27 + $0x34] ss:$12 sps:$4 sm:$0xff]   ;;  %v7419_v61 = vld [vmem:[%s9927_s27 + $0x50] ss:$12 sps:$4 sm:$0xff]  }
 0x13a   : > { %v1210_v3 = vpack.c.bf16 %v1021_v0, %v1018_v57  ;;  %v7412_v57 = vld [vmem:[%s9927_s27 + $0x20] ss:$12 sps:$4 sm:$0xff]  }
 0x13b   : > { %1628 = vmatpush1.bf16.msra.mxu1 %v1204_v1  ;;  %v7421_v0 = vld [vmem:[%s9927_s27 + $0x4c] ss:$12 sps:$4 sm:$0xff]  }
 0x13c   : > { %1629 = vmatprep.subr.bf16.mxu1 %v7945_v4  ;;  %v6921_v5 = vpop.f32.mrb[12].mxu1  ;;  %v7427_v1 = vld [vmem:[%s9927_s27 + $0x80] ss:$12 sps:$4 sm:$0xff]  }
 0x13d   : > { %v8289_v6 = vadd.f32 %v6921_v5, %v8233_v8  ;;  %v1033_v7 = vpop.f32.mrb[13].mxu1  ;;  %v7425_v5 = vld [vmem:[%s9927_s27 + $0x64] ss:$12 sps:$4 sm:$0xff]  }
 0x13e   : > { %v1034_v9 = vadd.f32 %v8233_v8, %v1033_v7  ;;  %v6922_v10 = vpop.f32.mrb[14].mxu1  ;;  %v7440_v7 = vld [vmem:[%s9927_s27 + $0xc8] ss:$12 sps:$4 sm:$0xff]  }
 0x13f   : > { %1630 = vmatpush1.bf16.msra.mxu1 %v1205_v63  ;;  %v8293_v11 = vadd.f32 %v6922_v10, %v8233_v8  ;;  %v1036_v13 = vpop.f32.mrb[15].mxu1  ;;  %v7420_v63 = vld [vmem:[%s9927_s27 + $0x30] ss:$12 sps:$4 sm:$0xff]  }
 0x140   : > { %1631 = vmatprep.subr.bf16.mxu1 %v7945_v4  ;;  %v1037_v14 = vadd.f32 %v8233_v8, %v1036_v13  ;;  %v7429_v10 = vld [vmem:[%s9927_s27 + $0x7c] ss:$12 sps:$4 sm:$0xff]   ;;  %v7448_v13 = vld [vmem:[%s9927_s27 + $0xf8] ss:$12 sps:$4 sm:$0xff]  }
 0x141   : > { %v1213_v15 = vpack.c.bf16 %v8293_v11, %v8289_v6  ;;  %v7435_v6 = vld [vmem:[%s9927_s27 + $0xb0] ss:$12 sps:$4 sm:$0xff]   ;;  %v7443_v11 = vld [vmem:[%s9927_s27 + $0xe0] ss:$12 sps:$4 sm:$0xff]  }
 0x142   : > { %v1212_v16 = vpack.c.bf16 %v1037_v14, %v1034_v9  ;;  %v7428_v9 = vld [vmem:[%s9927_s27 + $0x60] ss:$12 sps:$4 sm:$0xff]   ;;  %v7431_v14 = vld [vmem:[%s9927_s27 + $0x78] ss:$12 sps:$4 sm:$0xff]  }
 0x143   : > { %1632 = vmatpush1.bf16.msra.mxu1 %v1206_v27 }
 0x144   : > { %1633 = vmatprep.subr.bf16.mxu1 %v7945_v4  ;;  %v6925_v18 = vpop.f32.mrb[16].mxu1 }
 0x145   : > { %v8304_v19 = vadd.f32 %v6925_v18, %v8233_v8  ;;  %v1049_v20 = vpop.f32.mrb[17].mxu1  ;;  %v7456_v18 = vld [vmem:[%s9927_s27 + $0x128] ss:$12 sps:$4 sm:$0xff]  }
 0x146   : > { %v1050_v22 = vadd.f32 %v8233_v8, %v1049_v20  ;;  %v6926_v23 = vpop.f32.mrb[18].mxu1  ;;  %v7437_v20 = vld [vmem:[%s9927_s27 + $0xac] ss:$12 sps:$4 sm:$0xff]  }
 0x147   : > { %1634 = vmatpush1.bf16.msra.mxu1 %v1207_v26  ;;  %v1061_v25 = vadd.f32 %v6926_v23, %v8233_v8  ;;  %v1052_v28 = vpop.f32.mrb[19].mxu1  ;;  %v7464_v23 = vld [vmem:[%s9927_s27 + $0x158] ss:$12 sps:$4 sm:$0xff]  }
 0x148   : > { %v1053_v17 = vadd.f32 %v8233_v8, %v1052_v28  ;;  %1635 = vmatprep.subr.bf16.mxu1 %v7945_v4  ;;  %v7441_v28 = vld [vmem:[%s9927_s27 + $0xc4] ss:$12 sps:$4 sm:$0xff]  }
 0x149   : > { %v1215_v24 = vpack.c.bf16 %v1061_v25, %v8304_v19  ;;  %v7436_v19 = vld [vmem:[%s9927_s27 + $0x90] ss:$12 sps:$4 sm:$0xff]   ;;  %v7439_v25 = vld [vmem:[%s9927_s27 + $0xa8] ss:$12 sps:$4 sm:$0xff]  }
 0x14a   : > { %v1214_v27 = vpack.c.bf16 %v1053_v17, %v1050_v22  ;;  %v7459_v22 = vld [vmem:[%s9927_s27 + $0x140] ss:$12 sps:$4 sm:$0xff]   ;;  %v7467_v17 = vld [vmem:[%s9927_s27 + $0x170] ss:$12 sps:$4 sm:$0xff]  }
 0x14b   : > { %1636 = vmatpush1.bf16.msra.mxu1 %v1208_v47 }
 0x14c   : > { %v6929_v29 = vpop.f32.mrb[20].mxu1  ;;  %1637 = vmatprep.subr.bf16.mxu1 %v7945_v4 }
 0x14d   : > { %v1074_v30 = vadd.f32 %v6929_v29, %v8233_v8  ;;  %v1065_v31 = vpop.f32.mrb[21].mxu1  ;;  %v7445_v29 = vld [vmem:[%s9927_s27 + $0xdc] ss:$12 sps:$4 sm:$0xff]  }
 0x14e   : > { %v1066_v12 = vadd.f32 %v8233_v8, %v1065_v31  ;;  %v6930_v21 = vpop.f32.mrb[22].mxu1  ;;  %v7480_v31 = vld [vmem:[%s9927_s27 + $0x1b8] ss:$12 sps:$4 sm:$0xff]  }
 0x14f   : > { %v1077_v26 = vadd.f32 %v6930_v21, %v8233_v8  ;;  %v1068_v32 = vpop.f32.mrb[23].mxu1  ;;  %1638 = vmatpush1.bf16.msra.mxu1 %v1209_v46  ;;  %v7449_v21 = vld [vmem:[%s9927_s27 + $0xf4] ss:$12 sps:$4 sm:$0xff]  }
 0x150   : > { %v1069_v33 = vadd.f32 %v8233_v8, %v1068_v32  ;;  %1639 = vmatprep.subr.bf16.mxu1 %v7945_v4  ;;  %v7488_v32 = vld [vmem:[%s9927_s27 + $0x1e8] ss:$12 sps:$4 sm:$0xff]  }
 0x151   : > { %v1217_v34 = vpack.c.bf16 %v1077_v26, %v1074_v30  ;;  %v7475_v30 = vld [vmem:[%s9927_s27 + $0x1a0] ss:$12 sps:$4 sm:$0xff]   ;;  %v7483_v26 = vld [vmem:[%s9927_s27 + $0x1d0] ss:$12 sps:$4 sm:$0xff]  }
 0x152   : > { %v1216_v35 = vpack.c.bf16 %v1069_v33, %v1066_v12  ;;  %v7447_v12 = vld [vmem:[%s9927_s27 + $0xd8] ss:$12 sps:$4 sm:$0xff]   ;;  %v7452_v33 = vld [vmem:[%s9927_s27 + $0xf0] ss:$12 sps:$4 sm:$0xff]  }
 0x153   : > { %1640 = vmatpush1.bf16.msra.mxu1 %v1210_v3  ;;  %v7423_v3 = vld [vmem:[%s9927_s27 + $0x48] ss:$12 sps:$4 sm:$0xff]  }
 0x154   : > { %v6933_v36 = vpop.f32.mrb[24].mxu1  ;;  %6939 = vmatprep.subr.bf16.mxu0 %v1216_v35  ;;  %1641 = vmatprep.subr.bf16.mxu1 %v7945_v4 }
 0x155   : > { %v1090_v37 = vadd.f32 %v6933_v36, %v8233_v8  ;;  %v1081_v38 = vpop.f32.mrb[25].mxu1  ;;  %6940 = vmatpush3.bf16.msra.mxu0 %v1216_v35  ;;  %v7491_v35 = vld [vmem:[%s9927_s27 + $0x200] ss:$12 sps:$4 sm:$0xff]  }
 0x156   : > { %v1082_v39 = vadd.f32 %v8233_v8, %v1081_v38  ;;  %v6934_v40 = vpop.f32.mrb[26].mxu1  ;;  %6941 = vmatprep.subr.bf16.mxu0 %v1217_v34  ;;  %v7496_v36 = vld [vmem:[%s9929_s0] sm:$0xff]  }
 0x157   : > { %v1093_v41 = vadd.f32 %v6934_v40, %v8233_v8  ;;  %v1084_v42 = vpop.f32.mrb[27].mxu1  ;;  %1642 = vmatpush1.bf16.msra.mxu1 %v1211_v2  ;;  %v7432_v2 = vld [vmem:[%s9927_s27 + $0x98] ss:$12 sps:$4 sm:$0xff]   ;;  %v7498_v40 = vld [vmem:[%s9929_s0 + $0x10] sm:$0xff]  }
 0x158   : > { %v1085_v43 = vadd.f32 %v8233_v8, %v1084_v42  ;;  %1643 = vmatprep.subr.bf16.mxu1 %v7945_v4  ;;  %v7457_v38 = vld [vmem:[%s9927_s27 + $0x124] ss:$12 sps:$4 sm:$0xff]   ;;  %v7461_v42 = vld [vmem:[%s9927_s27 + $0x13c] ss:$12 sps:$4 sm:$0xff]  }
 0x159   : > { %v1219_v44 = vpack.c.bf16 %v1093_v41, %v1090_v37  ;;  %6942 = vmatpush3.bf16.msra.mxu0 %v1217_v34  ;;  %v7453_v34 = vld [vmem:[%s9927_s27 + $0x10c] ss:$12 sps:$4 sm:$0xff]   ;;  %v7455_v37 = vld [vmem:[%s9927_s27 + $0x108] ss:$12 sps:$4 sm:$0xff]  }
 0x15a   : > { %v1218_v45 = vpack.c.bf16 %v1085_v43, %v1082_v39  ;;  %v7497_v39 = vld [vmem:[%s9929_s0 + $0x8] sm:$0xff]   ;;  %v7499_v43 = vld [vmem:[%s9929_s0 + $0x18] sm:$0xff]   ;;  %s9877_s0 = smov 32  }
 0x15b   : > { %1644 = vmatpush1.bf16.msra.mxu1 %v1212_v16  ;;  %v7451_v16 = vld [vmem:[%s9927_s27 + $0x110] ss:$12 sps:$4 sm:$0xff]   ;;  %v7460_v41 = vld [vmem:[%s9927_s27 + $0x120] ss:$12 sps:$4 sm:$0xff]  }
 0x15c   : > { %v6937_v46 = vpop.f32.mrb[28].mxu1  ;;  %6943 = vmatprep.subr.bf16.mxu0 %v1218_v45  ;;  %1645 = vmatprep.subr.bf16.mxu1 %v7945_v4 }
 0x15d   : > { %v1106_v47 = vadd.f32 %v6937_v46, %v8233_v8  ;;  %v1097_v48 = vpop.f32.mrb[29].mxu1  ;;  %6944 = vmatpush3.bf16.msra.mxu0 %v1218_v45  ;;  %v7465_v45 = vld [vmem:[%s9927_s27 + $0x154] ss:$12 sps:$4 sm:$0xff]   ;;  %v7468_v46 = vld [vmem:[%s9927_s27 + $0x150] ss:$12 sps:$4 sm:$0xff]  }
 0x15e   : > { %v1098_v49 = vadd.f32 %v8233_v8, %v1097_v48  ;;  %v6938_v50 = vpop.f32.mrb[30].mxu1  ;;  %6945 = vmatprep.subr.bf16.mxu0 %v1219_v44  ;;  %v7471_v48 = vld [vmem:[%s9927_s27 + $0x168] ss:$12 sps:$4 sm:$0xff]  }
 0x15f   : > { %v1109_v51 = vadd.f32 %v6938_v50, %v8233_v8  ;;  %v1100_v52 = vpop.f32.mrb[31].mxu1  ;;  %1646 = vmatpush1.bf16.msra.mxu1 %v1213_v15  ;;  %v7433_v15 = vld [vmem:[%s9927_s27 + $0x94] ss:$12 sps:$4 sm:$0xff]  }
 0x160   : > { %v1101_v53 = vadd.f32 %v8233_v8, %v1100_v52  ;;  %1647 = vmatprep.subr.bf16.mxu1 %v7945_v4  ;;  %v7413_v8 = vld [vmem:[%s9927_s27 + $0x1c] ss:$12 sps:$4 sm:$0xff]   ;;  %v7476_v50 = vld [vmem:[%s9927_s27 + $0x180] ss:$12 sps:$4 sm:$0xff]   ;;  %v7479_v52 = vld [vmem:[%s9927_s27 + $0x198] ss:$12 sps:$4 sm:$0xff]  }
 0x161   : > { %v1221_v54 = vpack.c.bf16 %v1109_v51, %v1106_v47  ;;  %6946 = vmatpush3.bf16.msra.mxu0 %v1219_v44  ;;  %v7463_v44 = vld [vmem:[%s9927_s27 + $0x138] ss:$12 sps:$4 sm:$0xff]   ;;  %v7477_v51 = vld [vmem:[%s9927_s27 + $0x19c] ss:$12 sps:$4 sm:$0xff]  }
 0x162   : > { %v1220_v55 = vpack.c.bf16 %v1101_v53, %v1098_v49  ;;  %v7469_v47 = vld [vmem:[%s9927_s27 + $0x16c] ss:$12 sps:$4 sm:$0xff]   ;;  %v7473_v49 = vld [vmem:[%s9927_s27 + $0x184] ss:$12 sps:$4 sm:$0xff]   ;;  %v7481_v53 = vld [vmem:[%s9927_s27 + $0x1b4] ss:$12 sps:$4 sm:$0xff]  }
 0x163   : > { %1648 = vmatpush1.bf16.msra.mxu1 %v1214_v27  ;;  %v7444_v27 = vld [vmem:[%s9927_s27 + $0xc0] ss:$12 sps:$4 sm:$0xff]  }
 0x164   : > { %6947 = vmatprep.subr.bf16.mxu0 %v1220_v55  ;;  %1649 = vmatprep.subr.bf16.mxu1 %v7945_v4 }
 0x165   : > { %6948 = vmatpush3.bf16.msra.mxu0 %v1220_v55  ;;  %v7485_v55 = vld [vmem:[%s9927_s27 + $0x1cc] ss:$12 sps:$4 sm:$0xff]  }
 0x166   : > { %6949 = vmatprep.subr.bf16.mxu0 %v1221_v54 }
 0x167   : > { %1650 = vmatpush1.bf16.msra.mxu1 %v1215_v24  ;;  %v7472_v24 = vld [vmem:[%s9927_s27 + $0x188] ss:$12 sps:$4 sm:$0xff]  }
 0x169   : > { %6950 = vmatpush3.bf16.msra.mxu0 %v1221_v54  ;;  %v7484_v54 = vld [vmem:[%s9927_s27 + $0x1b0] ss:$12 sps:$4 sm:$0xff]  }
 0x16a   : > { %1652 = vmatmul.mubr.bf16.vlgmr.msra.gmra.mrb[32].mxu1 %v7408_v56  ;;  %6995 = vmatprep.subr.bf16.mxu0 %v7496_v36  ;;  %v7487_v56 = vld [vmem:[%s9927_s27 + $0x1c8] ss:$12 sps:$4 sm:$0xff]  }
 0x16b   : > { %1659 = vmatprep.mubr.bf16.mxu1 %v7413_v8  ;;  %v7489_v8 = vld [vmem:[%s9927_s27 + $0x1e4] ss:$12 sps:$4 sm:$0xff]  }
 0x16c   : > { %6952 = vmatmul.mubr.msk.bf16.vlgmr.msra.gmra.mrb[12].mxu0 %vm1552_vm2, %v7412_v57  ;;  %v7492_v57 = vld [vmem:[%s9927_s27 + $0x1e0] ss:$12 sps:$4 sm:$0xff]  }
 0x16d   : > { %6955 = vmatprep.mubr.msk.bf16.mxu0 %vm1552_vm2, %v7416_v58  ;;  %6996 = vmatpush3.bf16.msra.mxu0 %v7496_v36  ;;  %v7493_v58 = vld [vmem:[%s9927_s27 + $0x1fc] ss:$12 sps:$4 sm:$0xff]  }
 0x16e   : > { %6997 = vmatprep.subr.bf16.mxu0 %v7497_v39 }
 0x171   : > { %6998 = vmatpush3.bf16.msra.mxu0 %v7497_v39 }
 0x172   : > { %1660 = vmatmul.mubr.bf16.gmra.mrb[36].mxu1 %v7415_v59  ;;  %6999 = vmatprep.subr.bf16.mxu0 %v7498_v40  ;;  %v7495_v59 = vld [vmem:[%s9927_s27 + $0x1f8] ss:$12 sps:$4 sm:$0xff]   ;;  %s9892_s27 = sadd.s32 3, %s8970_s6 }
 0x173   : > { %1667 = vmatprep.mubr.bf16.mxu1 %v7417_v60  ;;  %s3800_s7 = sld [smem:[#allocation3 + %s9892_s27]] }
 0x174   : > { %6956 = vmatmul.mubr.msk.bf16.gmra.mrb[16].mxu0 %vm1552_vm2, %v7419_v61  ;;  %s3808_s27 = sld [smem:[#allocation3 + %s3807_s25]] }
 0x175   : > { %6959 = vmatprep.mubr.msk.bf16.mxu0 %vm1552_vm2, %v7424_v62  ;;  %7000 = vmatpush3.bf16.msra.mxu0 %v7498_v40 }
 0x176   : > { %7001 = vmatprep.subr.bf16.mxu0 %v7499_v43 }
 0x179   : > { %7002 = vmatpush3.bf16.msra.mxu0 %v7499_v43 }
 0x17a   : > { %1668 = vmatmul.mubr.bf16.gmra.mrb[40].mxu1 %v7420_v63 }
 0x17b   : > { %1675 = vmatprep.mubr.bf16.mxu1 %v7421_v0 }
 0x17c   : > { %6960 = vmatmul.mubr.msk.bf16.gmra.mrb[20].mxu0 %vm1552_vm2, %v7427_v1 }
 0x17d   : > { %6963 = vmatprep.mubr.msk.bf16.mxu0 %vm1552_vm2, %v7432_v2 }
 0x182   : > { %1676 = vmatmul.mubr.bf16.gmra.mrb[44].mxu1 %v7423_v3 }
 0x183   : > { %1683 = vmatprep.mubr.bf16.mxu1 %v7425_v5 }
 0x184   : > { %6964 = vmatmul.mubr.msk.bf16.gmra.mrb[24].mxu0 %vm1552_vm2, %v7435_v6 }
 0x185   : > { %6967 = vmatprep.mubr.msk.bf16.mxu0 %vm1552_vm2, %v7440_v7 }
 0x18a   : > { %1684 = vmatmul.mubr.bf16.gmra.mrb[48].mxu1 %v7428_v9 }
 0x18b   : > { %1691 = vmatprep.mubr.bf16.mxu1 %v7429_v10 }
 0x18c   : > { %6968 = vmatmul.mubr.msk.bf16.gmra.mrb[28].mxu0 %vm1552_vm2, %v7443_v11 }
 0x18d   : > { %6971 = vmatprep.mubr.msk.bf16.mxu0 %vm1552_vm2, %v7448_v13 }
 0x192   : > { %1692 = vmatmul.mubr.bf16.gmra.mrb[52].mxu1 %v7431_v14 }
 0x193   : > { %1699 = vmatprep.mubr.bf16.mxu1 %v7433_v15 }
 0x194   : > { %6972 = vmatmul.mubr.msk.bf16.gmra.mrb[32].mxu0 %vm1552_vm2, %v7451_v16 }
 0x195   : > { %6975 = vmatprep.mubr.msk.bf16.mxu0 %vm1552_vm2, %v7456_v18 }
 0x19a   : > { %1700 = vmatmul.mubr.bf16.gmra.mrb[56].mxu1 %v7436_v19 }
 0x19b   : > { %1707 = vmatprep.mubr.bf16.mxu1 %v7437_v20 }
 0x19c   : > { %6976 = vmatmul.mubr.msk.bf16.gmra.mrb[36].mxu0 %vm1552_vm2, %v7459_v22 }
 0x19d   : > { %6979 = vmatprep.mubr.msk.bf16.mxu0 %vm1552_vm2, %v7464_v23 }
 0x1a2   : > { %1708 = vmatmul.mubr.bf16.gmra.mrb[60].mxu1 %v7439_v25 }
 0x1a3   : > { %1715 = vmatprep.mubr.bf16.mxu1 %v7441_v28 }
 0x1a4   : > { %6980 = vmatmul.mubr.msk.bf16.gmra.mrb[40].mxu0 %vm1552_vm2, %v7467_v17 }
 0x1a5   : > { %6983 = vmatprep.mubr.msk.bf16.mxu0 %vm1552_vm2, %v7472_v24 }
 0x1aa   : > { %1716 = vmatmul.mubr.bf16.gmra.mrb[64].mxu1 %v7444_v27 }
 0x1ab   : > { %1723 = vmatprep.mubr.bf16.mxu1 %v7445_v29 }
 0x1ac   : > { %6984 = vmatmul.mubr.msk.bf16.gmra.mrb[44].mxu0 %vm1552_vm2, %v7475_v30 }
 0x1ad   : > { %6987 = vmatprep.mubr.msk.bf16.mxu0 %vm1552_vm2, %v7480_v31 }
 0x1b2   : > { %1724 = vmatmul.mubr.bf16.gmra.mrb[68].mxu1 %v7447_v12 }
 0x1b3   : > { %1731 = vmatprep.mubr.bf16.mxu1 %v7449_v21 }
 0x1b4   : > { %6988 = vmatmul.mubr.msk.bf16.gmra.mrb[48].mxu0 %vm1552_vm2, %v7483_v26 }
 0x1b5   : > { %6991 = vmatprep.mubr.msk.bf16.mxu0 %vm1552_vm2, %v7488_v32 }
 0x1ba   : > { %1732 = vmatmul.mubr.bf16.gmra.mrb[72].mxu1 %v7452_v33 }
 0x1bb   : > { %1739 = vmatprep.mubr.bf16.mxu1 %v7453_v34 }
 0x1bc   : > { %6992 = vmatmul.mubr.msk.bf16.gmra.mrb[52].mxu0 %vm1552_vm2, %v7491_v35 }
 0x1c2   : > { %1740 = vmatmul.mubr.bf16.gmra.mrb[76].mxu1 %v7455_v37 }
 0x1c3   : > { %1747 = vmatprep.mubr.bf16.mxu1 %v7457_v38 }
 0x1ca   : > { %1748 = vmatmul.mubr.bf16.gmra.mrb[80].mxu1 %v7460_v41 }
 0x1cb   : > { %1755 = vmatprep.mubr.bf16.mxu1 %v7461_v42 }
 0x1d2   : > { %1756 = vmatmul.mubr.bf16.gmra.mrb[84].mxu1 %v7463_v44 }
 0x1d3   : > { %1763 = vmatprep.mubr.bf16.mxu1 %v7465_v45 }
 0x1da   : > { %1764 = vmatmul.mubr.bf16.gmra.mrb[88].mxu1 %v7468_v46 }
 0x1db   : > { %1771 = vmatprep.mubr.bf16.mxu1 %v7469_v47 }
 0x1e2   : > { %1772 = vmatmul.mubr.bf16.gmra.mrb[92].mxu1 %v7471_v48 }
 0x1e3   : > { %1779 = vmatprep.mubr.bf16.mxu1 %v7473_v49 }
 0x1ea   : > { %1780 = vmatmul.mubr.bf16.gmra.mrb[96].mxu1 %v7476_v50 }
 0x1eb   : > { %1787 = vmatprep.mubr.bf16.mxu1 %v7477_v51 }
 0x1f2   : > { %1788 = vmatmul.mubr.bf16.gmra.mrb[100].mxu1 %v7479_v52 }
 0x1f3   : > { %1795 = vmatprep.mubr.bf16.mxu1 %v7481_v53 }
 0x1fa   : > { %1796 = vmatmul.mubr.bf16.gmra.mrb[104].mxu1 %v7484_v54 }
 0x1fb   : > { %1803 = vmatprep.mubr.bf16.mxu1 %v7485_v55 }
 0x202   : > { %1804 = vmatmul.mubr.bf16.gmra.mrb[108].mxu1 %v7487_v56 }
 0x203   : > { %1811 = vmatprep.mubr.bf16.mxu1 %v7489_v8 }
 0x20a   : > { %1812 = vmatmul.mubr.bf16.gmra.mrb[112].mxu1 %v7492_v57 }
 0x20b   : > { %1819 = vmatprep.mubr.bf16.mxu1 %v7493_v58 }
 0x212   : > { %1820 = vmatmul.mubr.bf16.gmra.mrb[116].mxu1 %v7495_v59 }
 0x23d   : > { %v1653_v60 = vpop.f32.mrb[32].mxu1 }
 0x23e   : > { %v1655_v61 = vpop.f32.mrb[33].mxu1 }
 0x23f   : > { %v6953_v62 = vpop.f32.mrb[12].mxu0  ;;  %v1656_v63 = vpop.f32.mrb[34].mxu1 }
 0x240   : > { %v1862_v0 = vpop.f32.mrb[13].mxu0  ;;  %v1658_v1 = vpop.f32.mrb[35].mxu1 }
 0x241   : > { %v1863_v2 = vadd.f32 %v1862_v0, %v1653_v60  ;;  %v6954_v3 = vpop.f32.mrb[14].mxu0 }
 0x242   : > { %v1865_v5 = vpop.f32.mrb[15].mxu0 }
 0x243   : > { %v1866_v6 = vadd.f32 %v1865_v5, %v1656_v63  ;;  %v2037_v7 = vmax.f32 %v1863_v2, 0.0 }
 0x245   : > { %v2038_v9 = vmax.f32 %v1866_v6, 0.0  ;;  %v1661_v10 = vpop.f32.mrb[36].mxu1 }
 0x246   : > { %v1871_v11 = vadd.f32 %v6953_v62, %v1661_v10  ;;  %v1663_v13 = vpop.f32.mrb[37].mxu1 }
 0x247   : > { %v2081_v14 = vpack.c.bf16 %v2038_v9, %v2037_v7  ;;  %v1664_v15 = vpop.f32.mrb[38].mxu1  ;;  %v6957_v16 = vpop.f32.mrb[16].mxu0 }
 0x248   : > { %v1874_v18 = vadd.f32 %v6954_v3, %v1664_v15  ;;  %v1666_v19 = vpop.f32.mrb[39].mxu1  ;;  %v1878_v20 = vpop.f32.mrb[17].mxu0  ;;  %v2039_v23 = vmax.f32 %v1871_v11, 0.0 }
 0x249   : > { %7003 = vmatprep.mubr.msk.bf16.mxu0 %vm2142_vm3, %v2081_v14  ;;  %v6958_v22 = vpop.f32.mrb[18].mxu0 }
 0x24a   : > { %v2040_v25 = vmax.f32 %v1874_v18, 0.0  ;;  %v1881_v28 = vpop.f32.mrb[19].mxu0 }
 0x24c   : > { %v2082_v17 = vpack.c.bf16 %v2040_v25, %v2039_v23 }
 0x24d   : > { %v1669_v24 = vpop.f32.mrb[40].mxu1 }
 0x24e   : > { %v1879_v27 = vadd.f32 %v1878_v20, %v1669_v24  ;;  %v1671_v29 = vpop.f32.mrb[41].mxu1  ;;  %7004 = vmatmul.mubr.msk.bf16.vlgmr.msra.gmra.mrb[56].mxu0 %vm2142_vm3, %v2082_v17 }
 0x24f   : > { %v1672_v30 = vpop.f32.mrb[42].mxu1  ;;  %v6961_v31 = vpop.f32.mrb[20].mxu0 }
 0x250   : > { %v1882_v12 = vadd.f32 %v1881_v28, %v1672_v30  ;;  %v1674_v21 = vpop.f32.mrb[43].mxu1  ;;  %v1894_v26 = vpop.f32.mrb[21].mxu0  ;;  %v2041_v33 = vmax.f32 %v1879_v27, 0.0 }
 0x251   : > { %v6962_v32 = vpop.f32.mrb[22].mxu0 }
 0x252   : > { %v2042_v34 = vmax.f32 %v1882_v12, 0.0  ;;  %v1897_v35 = vpop.f32.mrb[23].mxu0 }
 0x254   : > { %v2083_v36 = vpack.c.bf16 %v2042_v34, %v2041_v33 }
 0x255   : > { %v1677_v37 = vpop.f32.mrb[44].mxu1 }
 0x256   : > { %v1887_v38 = vadd.f32 %v6957_v16, %v1677_v37  ;;  %v1679_v39 = vpop.f32.mrb[45].mxu1  ;;  %7007 = vmatprep.mubr.msk.bf16.mxu0 %vm2142_vm3, %v2083_v36 }
 0x257   : > { %v1680_v40 = vpop.f32.mrb[46].mxu1  ;;  %v6965_v41 = vpop.f32.mrb[24].mxu0 }
 0x258   : > { %v1890_v42 = vadd.f32 %v6958_v22, %v1680_v40  ;;  %v1682_v43 = vpop.f32.mrb[47].mxu1  ;;  %v1910_v44 = vpop.f32.mrb[25].mxu0  ;;  %v2043_v46 = vmax.f32 %v1887_v38, 0.0 }
 0x259   : > { %v6966_v45 = vpop.f32.mrb[26].mxu0 }
 0x25a   : > { %v2044_v47 = vmax.f32 %v1890_v42, 0.0  ;;  %v1913_v48 = vpop.f32.mrb[27].mxu0 }
 0x25c   : > { %v2084_v49 = vpack.c.bf16 %v2044_v47, %v2043_v46 }
 0x25d   : > { %v1685_v50 = vpop.f32.mrb[48].mxu1 }
 0x25e   : > { %v1895_v51 = vadd.f32 %v1894_v26, %v1685_v50  ;;  %v1687_v52 = vpop.f32.mrb[49].mxu1  ;;  %7008 = vmatmul.mubr.msk.bf16.gmra.mrb[60].mxu0 %vm2142_vm3, %v2084_v49 }
 0x25f   : > { %v1688_v53 = vpop.f32.mrb[50].mxu1  ;;  %v8562_v54 = vpop.f32.mrb[28].mxu0 }
 0x260   : > { %v1898_v55 = vadd.f32 %v1897_v35, %v1688_v53  ;;  %v1690_v56 = vpop.f32.mrb[51].mxu1  ;;  %v1926_v8 = vpop.f32.mrb[29].mxu0  ;;  %v2045_v58 = vmax.f32 %v1895_v51, 0.0 }
 0x261   : > { %v8564_v57 = vpop.f32.mrb[30].mxu0 }
 0x262   : > { %v2046_v59 = vmax.f32 %v1898_v55, 0.0  ;;  %v1929_v60 = vpop.f32.mrb[31].mxu0 }
 0x264   : > { %v2085_v61 = vpack.c.bf16 %v2046_v59, %v2045_v58 }
 0x265   : > { %v1693_v62 = vpop.f32.mrb[52].mxu1 }
 0x266   : > { %v1903_v63 = vadd.f32 %v6961_v31, %v1693_v62  ;;  %v1695_v0 = vpop.f32.mrb[53].mxu1  ;;  %7011 = vmatprep.mubr.msk.bf16.mxu0 %vm2142_vm3, %v2085_v61 }
 0x267   : > { %v1696_v1 = vpop.f32.mrb[54].mxu1  ;;  %v8567_v2 = vpop.f32.mrb[32].mxu0 }
 0x268   : > { %v1906_v3 = vadd.f32 %v6962_v32, %v1696_v1  ;;  %v1698_v5 = vpop.f32.mrb[55].mxu1  ;;  %v8569_v6 = vpop.f32.mrb[33].mxu0  ;;  %v2047_v9 = vmax.f32 %v1903_v63, 0.0 }
 0x269   : > { %v8571_v7 = vpop.f32.mrb[34].mxu0 }
 0x26a   : > { %v2048_v10 = vmax.f32 %v1906_v3, 0.0  ;;  %v8573_v11 = vpop.f32.mrb[35].mxu0 }
 0x26c   : > { %v2086_v13 = vpack.c.bf16 %v2048_v10, %v2047_v9 }
 0x26d   : > { %v1701_v14 = vpop.f32.mrb[56].mxu1 }
 0x26e   : > { %v1911_v15 = vadd.f32 %v1910_v44, %v1701_v14  ;;  %v1703_v16 = vpop.f32.mrb[57].mxu1  ;;  %7012 = vmatmul.mubr.msk.bf16.gmra.mrb[64].mxu0 %vm2142_vm3, %v2086_v13 }
 0x26f   : > { %v1704_v18 = vpop.f32.mrb[58].mxu1  ;;  %v8576_v19 = vpop.f32.mrb[36].mxu0 }
 0x270   : > { %v1914_v20 = vadd.f32 %v1913_v48, %v1704_v18  ;;  %v1706_v22 = vpop.f32.mrb[59].mxu1  ;;  %v8578_v23 = vpop.f32.mrb[37].mxu0  ;;  %v2049_v28 = vmax.f32 %v1911_v15, 0.0 }
 0x271   : > { %v8580_v25 = vpop.f32.mrb[38].mxu0 }
 0x272   : > { %v2050_v17 = vmax.f32 %v1914_v20, 0.0  ;;  %v8582_v24 = vpop.f32.mrb[39].mxu0 }
 0x274   : > { %v2087_v27 = vpack.c.bf16 %v2050_v17, %v2049_v28 }
 0x275   : > { %v1709_v29 = vpop.f32.mrb[60].mxu1 }
 0x276   : > { %v1919_v30 = vadd.f32 %v6965_v41, %v1709_v29  ;;  %v1711_v31 = vpop.f32.mrb[61].mxu1  ;;  %7015 = vmatprep.mubr.msk.bf16.mxu0 %vm2142_vm3, %v2087_v27 }
 0x277   : > { %v1712_v12 = vpop.f32.mrb[62].mxu1  ;;  %v8585_v21 = vpop.f32.mrb[40].mxu0 }
 0x278   : > { %v1922_v26 = vadd.f32 %v6966_v45, %v1712_v12  ;;  %v1714_v32 = vpop.f32.mrb[63].mxu1  ;;  %v8587_v33 = vpop.f32.mrb[41].mxu0  ;;  %v2051_v35 = vmax.f32 %v1919_v30, 0.0 }
 0x279   : > { %v8589_v34 = vpop.f32.mrb[42].mxu0 }
 0x27a   : > { %v2052_v36 = vmax.f32 %v1922_v26, 0.0  ;;  %v8591_v37 = vpop.f32.mrb[43].mxu0 }
 0x27c   : > { %v2088_v38 = vpack.c.bf16 %v2052_v36, %v2051_v35 }
 0x27d   : > { %v1717_v39 = vpop.f32.mrb[64].mxu1 }
 0x27e   : > { %v1927_v40 = vadd.f32 %v1926_v8, %v1717_v39  ;;  %v1719_v41 = vpop.f32.mrb[65].mxu1  ;;  %7016 = vmatmul.mubr.msk.bf16.gmra.mrb[68].mxu0 %vm2142_vm3, %v2088_v38 }
 0x27f   : > { %v1720_v42 = vpop.f32.mrb[66].mxu1  ;;  %v8594_v43 = vpop.f32.mrb[44].mxu0 }
 0x280   : > { %v1930_v44 = vadd.f32 %v1929_v60, %v1720_v42  ;;  %v1722_v45 = vpop.f32.mrb[67].mxu1  ;;  %v8596_v46 = vpop.f32.mrb[45].mxu0  ;;  %v2053_v48 = vmax.f32 %v1927_v40, 0.0 }
 0x281   : > { %v8598_v47 = vpop.f32.mrb[46].mxu0 }
 0x282   : > { %v2054_v49 = vmax.f32 %v1930_v44, 0.0  ;;  %v8600_v50 = vpop.f32.mrb[47].mxu0 }
 0x284   : > { %v2089_v51 = vpack.c.bf16 %v2054_v49, %v2053_v48 }
 0x285   : > { %v1725_v52 = vpop.f32.mrb[68].mxu1 }
 0x286   : > { %v1935_v53 = vadd.f32 %v8562_v54, %v1725_v52  ;;  %v1727_v55 = vpop.f32.mrb[69].mxu1  ;;  %7019 = vmatprep.mubr.msk.bf16.mxu0 %vm2142_vm3, %v2089_v51 }
 0x287   : > { %v1728_v56 = vpop.f32.mrb[70].mxu1  ;;  %v8604_v8 = vpop.f32.mrb[48].mxu0 }
 0x288   : > { %v1938_v58 = vadd.f32 %v8564_v57, %v1728_v56  ;;  %v1730_v59 = vpop.f32.mrb[71].mxu1  ;;  %v8607_v60 = vpop.f32.mrb[49].mxu0  ;;  %v2055_v62 = vmax.f32 %v1935_v53, 0.0 }
 0x289   : > { %v8609_v61 = vpop.f32.mrb[50].mxu0 }
 0x28a   : > { %v2056_v63 = vmax.f32 %v1938_v58, 0.0  ;;  %v8611_v0 = vpop.f32.mrb[51].mxu0 }
 0x28c   : > { %v2090_v1 = vpack.c.bf16 %v2056_v63, %v2055_v62 }
 0x28d   : > { %v1733_v3 = vpop.f32.mrb[72].mxu1 }
 0x28e   : > { %v1943_v54 = vadd.f32 %v8569_v6, %v1733_v3  ;;  %v1735_v5 = vpop.f32.mrb[73].mxu1  ;;  %7020 = vmatmul.mubr.msk.bf16.gmra.mrb[72].mxu0 %vm2142_vm3, %v2090_v1 }
 0x28f   : > { %v1736_v9 = vpop.f32.mrb[74].mxu1  ;;  %v8615_v10 = vpop.f32.mrb[52].mxu0 }
 0x290   : > { %v1946_v57 = vadd.f32 %v8573_v11, %v1736_v9  ;;  %v1738_v13 = vpop.f32.mrb[75].mxu1  ;;  %v8618_v14 = vpop.f32.mrb[53].mxu0  ;;  %v2057_v16 = vmax.f32 %v1943_v54, 0.0 }
 0x291   : > { %v8620_v15 = vpop.f32.mrb[54].mxu0 }
 0x292   : > { %v2058_v18 = vmax.f32 %v1946_v57, 0.0  ;;  %v8622_v20 = vpop.f32.mrb[55].mxu0 }
 0x294   : > { %v2091_v22 = vpack.c.bf16 %v2058_v18, %v2057_v16 }
 0x295   : > { %v1741_v28 = vpop.f32.mrb[76].mxu1 }
 0x296   : > { %v1951_v6 = vadd.f32 %v8567_v2, %v1741_v28  ;;  %v1743_v17 = vpop.f32.mrb[77].mxu1  ;;  %7023 = vmatprep.mubr.msk.bf16.mxu0 %vm2142_vm3, %v2091_v22 }
 0x297   : > { %v1744_v27 = vpop.f32.mrb[78].mxu1 }
 0x298   : > { %v1954_v29 = vadd.f32 %v8571_v7, %v1744_v27  ;;  %v1746_v11 = vpop.f32.mrb[79].mxu1  ;;  %v2059_v30 = vmax.f32 %v1951_v6, 0.0 }
 0x29a   : > { %v2060_v31 = vmax.f32 %v1954_v29, 0.0 }
 0x29c   : > { %v2092_v12 = vpack.c.bf16 %v2060_v31, %v2059_v30 }
 0x29d   : > { %v1749_v26 = vpop.f32.mrb[80].mxu1 }
 0x29e   : > { %v1959_v32 = vadd.f32 %v8578_v23, %v1749_v26  ;;  %v1751_v35 = vpop.f32.mrb[81].mxu1  ;;  %7024 = vmatmul.mubr.msk.bf16.gmra.mrb[76].mxu0 %vm2142_vm3, %v2092_v12 }
 0x29f   : > { %v1752_v36 = vpop.f32.mrb[82].mxu1 }
 0x2a0   : > { %v1962_v38 = vadd.f32 %v8582_v24, %v1752_v36  ;;  %v1754_v2 = vpop.f32.mrb[83].mxu1  ;;  %v2061_v39 = vmax.f32 %v1959_v32, 0.0 }
 0x2a2   : > { %v2062_v40 = vmax.f32 %v1962_v38, 0.0 }
 0x2a4   : > { %v2093_v41 = vpack.c.bf16 %v2062_v40, %v2061_v39 }
 0x2a5   : > { %v1757_v42 = vpop.f32.mrb[84].mxu1 }
 0x2a6   : > { %v1967_v7 = vadd.f32 %v8576_v19, %v1757_v42  ;;  %v1759_v44 = vpop.f32.mrb[85].mxu1  ;;  %7027 = vmatprep.mubr.msk.bf16.mxu0 %vm2142_vm3, %v2093_v41 }
 0x2a7   : > { %v1760_v45 = vpop.f32.mrb[86].mxu1 }
 0x2a8   : > { %v1970_v48 = vadd.f32 %v8580_v25, %v1760_v45  ;;  %v1762_v23 = vpop.f32.mrb[87].mxu1  ;;  %v2063_v49 = vmax.f32 %v1967_v7, 0.0 }
 0x2aa   : > { %v2064_v51 = vmax.f32 %v1970_v48, 0.0 }
 0x2ac   : > { %v2094_v52 = vpack.c.bf16 %v2064_v51, %v2063_v49 }
 0x2ad   : > { %v1765_v53 = vpop.f32.mrb[88].mxu1 }
 0x2ae   : > { %v1975_v24 = vadd.f32 %v8587_v33, %v1765_v53  ;;  %v1767_v55 = vpop.f32.mrb[89].mxu1  ;;  %7028 = vmatmul.mubr.msk.bf16.gmra.mrb[80].mxu0 %vm2142_vm3, %v2094_v52 }
 0x2af   : > { %v1768_v56 = vpop.f32.mrb[90].mxu1 }
 0x2b0   : > { %v1978_v58 = vadd.f32 %v8591_v37, %v1768_v56  ;;  %v1770_v19 = vpop.f32.mrb[91].mxu1  ;;  %v2065_v59 = vmax.f32 %v1975_v24, 0.0 }
 0x2b2   : > { %v2066_v62 = vmax.f32 %v1978_v58, 0.0 }
 0x2b4   : > { %v2095_v63 = vpack.c.bf16 %v2066_v62, %v2065_v59 }
 0x2b5   : > { %v1773_v1 = vpop.f32.mrb[92].mxu1 }
 0x2b6   : > { %v1983_v25 = vadd.f32 %v8585_v21, %v1773_v1  ;;  %v1775_v3 = vpop.f32.mrb[93].mxu1  ;;  %7031 = vmatprep.mubr.msk.bf16.mxu0 %vm2142_vm3, %v2095_v63 }
 0x2b7   : > { %v1776_v54 = vpop.f32.mrb[94].mxu1 }
 0x2b8   : > { %v1986_v5 = vadd.f32 %v8589_v34, %v1776_v54  ;;  %v1778_v33 = vpop.f32.mrb[95].mxu1  ;;  %v2067_v9 = vmax.f32 %v1983_v25, 0.0 }
 0x2ba   : > { %v2068_v57 = vmax.f32 %v1986_v5, 0.0 }
 0x2bc   : > { %v2096_v13 = vpack.c.bf16 %v2068_v57, %v2067_v9 }
 0x2bd   : > { %v1781_v16 = vpop.f32.mrb[96].mxu1 }
 0x2be   : > { %v1991_v37 = vadd.f32 %v8596_v46, %v1781_v16  ;;  %v1783_v18 = vpop.f32.mrb[97].mxu1  ;;  %7032 = vmatmul.mubr.msk.bf16.gmra.mrb[84].mxu0 %vm2142_vm3, %v2096_v13 }
 0x2bf   : > { %v1784_v22 = vpop.f32.mrb[98].mxu1 }
 0x2c0   : > { %v1994_v28 = vadd.f32 %v8600_v50, %v1784_v22  ;;  %v1786_v21 = vpop.f32.mrb[99].mxu1  ;;  %v2069_v6 = vmax.f32 %v1991_v37, 0.0 }
 0x2c2   : > { %v2070_v17 = vmax.f32 %v1994_v28, 0.0 }
 0x2c4   : > { %v2097_v27 = vpack.c.bf16 %v2070_v17, %v2069_v6 }
 0x2c5   : > { %v1789_v29 = vpop.f32.mrb[100].mxu1 }
 0x2c6   : > { %v1999_v34 = vadd.f32 %v8594_v43, %v1789_v29  ;;  %v1791_v11 = vpop.f32.mrb[101].mxu1  ;;  %7035 = vmatprep.mubr.msk.bf16.mxu0 %vm2142_vm3, %v2097_v27 }
 0x2c7   : > { %v1792_v30 = vpop.f32.mrb[102].mxu1 }
 0x2c8   : > { %v2002_v31 = vadd.f32 %v8598_v47, %v1792_v30  ;;  %v1794_v46 = vpop.f32.mrb[103].mxu1  ;;  %v2071_v12 = vmax.f32 %v1999_v34, 0.0 }
 0x2ca   : > { %v2072_v26 = vmax.f32 %v2002_v31, 0.0 }
 0x2cc   : > { %v2098_v32 = vpack.c.bf16 %v2072_v26, %v2071_v12 }
 0x2cd   : > { %v1797_v35 = vpop.f32.mrb[104].mxu1 }
 0x2ce   : > { %v2007_v50 = vadd.f32 %v8607_v60, %v1797_v35  ;;  %v1799_v36 = vpop.f32.mrb[105].mxu1  ;;  %7036 = vmatmul.mubr.msk.bf16.gmra.mrb[88].mxu0 %vm2142_vm3, %v2098_v32 }
 0x2cf   : > { %v1800_v38 = vpop.f32.mrb[106].mxu1 }
 0x2d0   : > { %v2010_v2 = vadd.f32 %v8611_v0, %v1800_v38  ;;  %v1802_v43 = vpop.f32.mrb[107].mxu1  ;;  %v2073_v39 = vmax.f32 %v2007_v50, 0.0 }
 0x2d2   : > { %v2074_v40 = vmax.f32 %v2010_v2, 0.0 }
 0x2d4   : > { %v2099_v41 = vpack.c.bf16 %v2074_v40, %v2073_v39 }
 0x2d5   : > { %v1805_v42 = vpop.f32.mrb[108].mxu1 }
 0x2d6   : > { %v2015_v47 = vadd.f32 %v8604_v8, %v1805_v42  ;;  %v1807_v7 = vpop.f32.mrb[109].mxu1  ;;  %7039 = vmatprep.mubr.msk.bf16.mxu0 %vm2142_vm3, %v2099_v41 }
 0x2d7   : > { %v1808_v44 = vpop.f32.mrb[110].mxu1 }
 0x2d8   : > { %v2018_v45 = vadd.f32 %v8609_v61, %v1808_v44  ;;  %v1810_v60 = vpop.f32.mrb[111].mxu1  ;;  %v2075_v48 = vmax.f32 %v2015_v47, 0.0 }
 0x2da   : > { %v2076_v23 = vmax.f32 %v2018_v45, 0.0 }
 0x2dc   : > { %v2100_v49 = vpack.c.bf16 %v2076_v23, %v2075_v48 }
 0x2dd   : > { %v1813_v51 = vpop.f32.mrb[112].mxu1 }
 0x2de   : > { %v2023_v0 = vadd.f32 %v8618_v14, %v1813_v51  ;;  %v1815_v52 = vpop.f32.mrb[113].mxu1  ;;  %7040 = vmatmul.mubr.msk.bf16.gmra.mrb[92].mxu0 %vm2142_vm3, %v2100_v49  ;;  %v7500_v51 = vld [vmem:[%s9931_s12] ss:$12 sps:$4 sm:$0xff]  }
 0x2df   : > { %v1816_v53 = vpop.f32.mrb[114].mxu1  ;;  %v7505_v52 = vld [vmem:[%s9931_s12 + $0x1c] ss:$12 sps:$4 sm:$0xff]  }
 0x2e0   : > { %v2026_v24 = vadd.f32 %v8622_v20, %v1816_v53  ;;  %v1818_v8 = vpop.f32.mrb[115].mxu1  ;;  %v2077_v55 = vmax.f32 %v2023_v0, 0.0  ;;  %v8662_v20 = vld [vmem:[%s9930_s20] ss:$0 sm:$0xff]  ;;  %v7502_v0 = vld [vmem:[%s9931_s12 + $0x4] ss:$12 sps:$4 sm:$0xff]  }
 0x2e1   : > { %2753 = vmatprep.subr.bf16.mxu0 %v7502_v0  ;;  %v7503_v8 = vld [vmem:[%s9931_s12 + $0x18] ss:$12 sps:$4 sm:$0xff]   ;;  %s6304_s20 = sshll.u32 %s8719_s8, 4 }
 0x2e2   : > { %v2078_v56 = vmax.f32 %v2026_v24, 0.0  ;;  %2754 = vmatpush1.bf16.msra.mxu0 %v7500_v51  ;;  %s8728_s4 = scalar_lea.vmem [#allocation7], %s6304_s20  ;;  %s9879_s20 = smov 64  }
 0x2e3   : > { %2755 = vmatprep.subr.bf16.mxu0 %v7505_v52  ;;  %9932 = sst [smem:[#allocation22_spill]] %s8728_s4 }
 0x2e4   : > { %v2101_v58 = vpack.c.bf16 %v2078_v56, %v2077_v55 }
 0x2e5   : > { %v1821_v19 = vpop.f32.mrb[116].mxu1 }
 0x2e6   : > { %v2031_v61 = vadd.f32 %v8615_v10, %v1821_v19  ;;  %v1823_v59 = vpop.f32.mrb[117].mxu1  ;;  %7043 = vmatprep.mubr.msk.bf16.mxu0 %vm2142_vm3, %v2101_v58  ;;  %2756 = vmatpush1.bf16.msra.mxu0 %v7503_v8 }
 0x2e7   : > { %v1824_v62 = vpop.f32.mrb[118].mxu1 }
 0x2e8   : > { %v2034_v63 = vadd.f32 %v8620_v15, %v1824_v62  ;;  %v1826_v14 = vpop.f32.mrb[119].mxu1  ;;  %v2079_v1 = vmax.f32 %v2031_v61, 0.0 }
 0x2ea   : > { %v2080_v25 = vmax.f32 %v2034_v63, 0.0 }
 0x2ec   : > { %v2102_v3 = vpack.c.bf16 %v2080_v25, %v2079_v1 }
 0x2ee   : > { %7044 = vmatmul.mubr.msk.bf16.gmra.mrb[96].mxu0 %vm2142_vm3, %v2102_v3 }
 0x2ef   : > { %2785 = vmatprep.mubr.bf16.mxu0 %v7945_v4 }
 0x321   : > { %v7005_v10 = vpop.f32.mrb[56].mxu0 }
 0x322   : > { %v2252_v54 = vadd.f32 %v7005_v10, %v8662_v20  ;;  %v2243_v5 = vpop.f32.mrb[57].mxu0 }
 0x323   : > { %v2244_v33 = vadd.f32 %v8662_v20, %v2243_v5  ;;  %v7006_v15 = vpop.f32.mrb[58].mxu0 }
 0x324   : > { %v2255_v9 = vadd.f32 %v7006_v15, %v8662_v20  ;;  %v2246_v57 = vpop.f32.mrb[59].mxu0 }
 0x325   : > { %vm2418_vm4 = vcmp.gt.f32.partialorder %v2252_v54, %v2244_v33  ;;  %v2422_v13 = vmax.f32 %v2244_v33, %v2252_v54  ;;  %v2247_v16 = vadd.f32 %v8662_v20, %v2246_v57 }
 0x326   : > { %v2420_v6 = vsel %vm2418_vm4, 1, %v7945_v4 }
 0x327   : > { %vm2419_vm5 = vcmp.gt.f32.partialorder %v2255_v9, %v2247_v16  ;;  %v2423_v37 = vmax.f32 %v2247_v16, %v2255_v9 }
 0x328   : > { %v2421_v11 = vsel %vm2419_vm5, 1, %v7945_v4 }
 0x331   : > { %v7009_v18 = vpop.f32.mrb[60].mxu0 }
 0x332   : > { %v2259_v22 = vpop.f32.mrb[61].mxu0  ;;  %v2268_v27 = vadd.f32 %v7009_v18, %v8662_v20 }
 0x333   : > { %v2260_v28 = vadd.f32 %v8662_v20, %v2259_v22  ;;  %v7010_v21 = vpop.f32.mrb[62].mxu0 }
 0x334   : > { %v2262_v17 = vpop.f32.mrb[63].mxu0  ;;  %v2271_v31 = vadd.f32 %v7010_v21, %v8662_v20 }
 0x335   : > { %vm2424_vm6 = vcmp.gt.f32.partialorder %v2260_v28, %v2422_v13  ;;  %v2428_v29 = vmax.f32 %v2422_v13, %v2260_v28  ;;  %v2263_v34 = vadd.f32 %v8662_v20, %v2262_v17 }
 0x336   : > { %v2426_v30 = vsel %vm2424_vm6, 2, %v2420_v6 }
 0x337   : > { %vm2430_vm7 = vcmp.gt.f32.partialorder %v2268_v27, %v2428_v29  ;;  %vm2425_vm8 = vcmp.gt.f32.partialorder %v2263_v34, %v2423_v37  ;;  %v2429_v46 = vmax.f32 %v2423_v37, %v2263_v34  ;;  %v2434_v12 = vmax.f32 %v2428_v29, %v2268_v27 }
 0x338   : > { %v2427_v26 = vsel %vm2425_vm8, 2, %v2421_v11  ;;  %v2432_v32 = vsel %vm2430_vm7, 3, %v2426_v30 }
 0x339   : > { %vm2431_vm9 = vcmp.gt.f32.partialorder %v2271_v31, %v2429_v46  ;;  %v2435_v35 = vmax.f32 %v2429_v46, %v2271_v31 }
 0x33a   : > { %v2433_v50 = vsel %vm2431_vm9, 3, %v2427_v26 }
 0x341   : > { %v7013_v36 = vpop.f32.mrb[64].mxu0 }
 0x342   : > { %v2275_v38 = vpop.f32.mrb[65].mxu0  ;;  %v2284_v40 = vadd.f32 %v7013_v36, %v8662_v20 }
 0x343   : > { %v2276_v2 = vadd.f32 %v8662_v20, %v2275_v38  ;;  %v7014_v43 = vpop.f32.mrb[66].mxu0 }
 0x344   : > { %v2278_v39 = vpop.f32.mrb[67].mxu0  ;;  %v2287_v7 = vadd.f32 %v7014_v43, %v8662_v20 }
 0x345   : > { %vm2436_vm10 = vcmp.gt.f32.partialorder %v2276_v2, %v2434_v12  ;;  %v2440_v41 = vmax.f32 %v2434_v12, %v2276_v2  ;;  %v2279_v42 = vadd.f32 %v8662_v20, %v2278_v39 }
 0x346   : > { %v2438_v47 = vsel %vm2436_vm10, 4, %v2432_v32 }
 0x347   : > { %vm2442_vm11 = vcmp.gt.f32.partialorder %v2284_v40, %v2440_v41  ;;  %vm2437_vm12 = vcmp.gt.f32.partialorder %v2279_v42, %v2435_v35  ;;  %v2441_v44 = vmax.f32 %v2435_v35, %v2279_v42  ;;  %v2446_v45 = vmax.f32 %v2440_v41, %v2284_v40 }
 0x348   : > { %v2439_v60 = vsel %vm2437_vm12, 4, %v2433_v50  ;;  %v2444_v48 = vsel %vm2442_vm11, 5, %v2438_v47 }
 0x349   : > { %vm2443_vm13 = vcmp.gt.f32.partialorder %v2287_v7, %v2441_v44  ;;  %v2447_v23 = vmax.f32 %v2441_v44, %v2287_v7 }
 0x34a   : > { %v2445_v49 = vsel %vm2443_vm13, 5, %v2439_v60 }
 0x351   : > { %v7017_v53 = vpop.f32.mrb[68].mxu0 }
 0x352   : > { %v2291_v24 = vpop.f32.mrb[69].mxu0  ;;  %v2300_v19 = vadd.f32 %v7017_v53, %v8662_v20 }
 0x353   : > { %v2292_v55 = vadd.f32 %v8662_v20, %v2291_v24  ;;  %v7018_v56 = vpop.f32.mrb[70].mxu0 }
 0x354   : > { %v2294_v58 = vpop.f32.mrb[71].mxu0  ;;  %v2303_v63 = vadd.f32 %v7018_v56, %v8662_v20 }
 0x355   : > { %vm2448_vm14 = vcmp.gt.f32.partialorder %v2292_v55, %v2446_v45  ;;  %v2452_v61 = vmax.f32 %v2446_v45, %v2292_v55  ;;  %v2295_v59 = vadd.f32 %v8662_v20, %v2294_v58 }
 0x356   : > { %v2450_v62 = vsel %vm2448_vm14, 6, %v2444_v48 }
 0x357   : > { %vm2454_vm15 = vcmp.gt.f32.partialorder %v2300_v19, %v2452_v61  ;;  %vm2449_vm1 = vcmp.gt.f32.partialorder %v2295_v59, %v2447_v23  ;;  %v2453_v14 = vmax.f32 %v2447_v23, %v2295_v59  ;;  %v2458_v1 = vmax.f32 %v2452_v61, %v2300_v19 }
 0x358   : > { %v2451_v25 = vsel %vm2449_vm1, 6, %v2445_v49  ;;  %v2456_v3 = vsel %vm2454_vm15, 7, %v2450_v62 }
 0x359   : > { %vm2455_vm4 = vcmp.gt.f32.partialorder %v2303_v63, %v2453_v14  ;;  %v2459_v10 = vmax.f32 %v2453_v14, %v2303_v63 }
 0x35a   : > { %v2457_v54 = vsel %vm2455_vm4, 7, %v2451_v25 }
 0x361   : > { %v7021_v5 = vpop.f32.mrb[72].mxu0 }
 0x362   : > { %v2307_v33 = vpop.f32.mrb[73].mxu0  ;;  %v2316_v13 = vadd.f32 %v7021_v5, %v8662_v20 }
 0x363   : > { %v2308_v15 = vadd.f32 %v8662_v20, %v2307_v33  ;;  %v7022_v9 = vpop.f32.mrb[74].mxu0 }
 0x364   : > { %v2310_v57 = vpop.f32.mrb[75].mxu0  ;;  %v2319_v22 = vadd.f32 %v7022_v9, %v8662_v20 }
 0x365   : > { %vm2460_vm5 = vcmp.gt.f32.partialorder %v2308_v15, %v2458_v1  ;;  %v2464_v16 = vmax.f32 %v2458_v1, %v2308_v15  ;;  %v2311_v37 = vadd.f32 %v8662_v20, %v2310_v57 }
 0x366   : > { %v2462_v18 = vsel %vm2460_vm5, 8, %v2456_v3 }
 0x367   : > { %vm2466_vm6 = vcmp.gt.f32.partialorder %v2316_v13, %v2464_v16  ;;  %vm2461_vm7 = vcmp.gt.f32.partialorder %v2311_v37, %v2459_v10  ;;  %v2465_v28 = vmax.f32 %v2459_v10, %v2311_v37  ;;  %v2470_v21 = vmax.f32 %v2464_v16, %v2316_v13 }
 0x368   : > { %v2463_v6 = vsel %vm2461_vm7, 8, %v2457_v54  ;;  %v2468_v17 = vsel %vm2466_vm6, 9, %v2462_v18 }
 0x369   : > { %vm2467_vm8 = vcmp.gt.f32.partialorder %v2319_v22, %v2465_v28  ;;  %v2471_v27 = vmax.f32 %v2465_v28, %v2319_v22 }
 0x36a   : > { %v2469_v29 = vsel %vm2467_vm8, 9, %v2463_v6 }
 0x371   : > { %v7025_v34 = vpop.f32.mrb[76].mxu0 }
 0x372   : > { %v2323_v11 = vpop.f32.mrb[77].mxu0  ;;  %v2332_v12 = vadd.f32 %v7025_v34, %v8662_v20 }
 0x373   : > { %v2324_v30 = vadd.f32 %v8662_v20, %v2323_v11  ;;  %v7026_v31 = vpop.f32.mrb[78].mxu0 }
 0x374   : > { %v2326_v46 = vpop.f32.mrb[79].mxu0  ;;  %v2335_v50 = vadd.f32 %v7026_v31, %v8662_v20 }
 0x375   : > { %vm2472_vm9 = vcmp.gt.f32.partialorder %v2324_v30, %v2470_v21  ;;  %v2476_v26 = vmax.f32 %v2470_v21, %v2324_v30  ;;  %v2327_v32 = vadd.f32 %v8662_v20, %v2326_v46 }
 0x376   : > { %v2474_v35 = vsel %vm2472_vm9, 10, %v2468_v17 }
 0x377   : > { %vm2478_vm10 = vcmp.gt.f32.partialorder %v2332_v12, %v2476_v26  ;;  %vm2473_vm11 = vcmp.gt.f32.partialorder %v2327_v32, %v2471_v27  ;;  %v2477_v36 = vmax.f32 %v2471_v27, %v2327_v32  ;;  %v2482_v38 = vmax.f32 %v2476_v26, %v2332_v12 }
 0x378   : > { %v2475_v2 = vsel %vm2473_vm11, 10, %v2469_v29  ;;  %v2480_v43 = vsel %vm2478_vm10, 11, %v2474_v35 }
 0x379   : > { %vm2479_vm12 = vcmp.gt.f32.partialorder %v2335_v50, %v2477_v36  ;;  %v2483_v39 = vmax.f32 %v2477_v36, %v2335_v50 }
 0x37a   : > { %v2481_v40 = vsel %vm2479_vm12, 11, %v2475_v2 }
 0x381   : > { %v7029_v41 = vpop.f32.mrb[80].mxu0 }
 0x382   : > { %v2339_v42 = vpop.f32.mrb[81].mxu0  ;;  %v2348_v45 = vadd.f32 %v7029_v41, %v8662_v20 }
 0x383   : > { %v2340_v47 = vadd.f32 %v8662_v20, %v2339_v42  ;;  %v7030_v7 = vpop.f32.mrb[82].mxu0 }
 0x384   : > { %v2342_v44 = vpop.f32.mrb[83].mxu0  ;;  %v2351_v49 = vadd.f32 %v7030_v7, %v8662_v20 }
 0x385   : > { %vm2484_vm13 = vcmp.gt.f32.partialorder %v2340_v47, %v2482_v38  ;;  %v2488_v60 = vmax.f32 %v2482_v38, %v2340_v47  ;;  %v2343_v48 = vadd.f32 %v8662_v20, %v2342_v44 }
 0x386   : > { %v2486_v23 = vsel %vm2484_vm13, 12, %v2480_v43 }
 0x387   : > { %vm2490_vm14 = vcmp.gt.f32.partialorder %v2348_v45, %v2488_v60  ;;  %vm2485_vm15 = vcmp.gt.f32.partialorder %v2343_v48, %v2483_v39  ;;  %v2489_v51 = vmax.f32 %v2483_v39, %v2343_v48  ;;  %v2494_v0 = vmax.f32 %v2488_v60, %v2348_v45 }
 0x388   : > { %v2487_v52 = vsel %vm2485_vm15, 12, %v2481_v40  ;;  %v2492_v53 = vsel %vm2490_vm14, 13, %v2486_v23 }
 0x389   : > { %vm2491_vm1 = vcmp.gt.f32.partialorder %v2351_v49, %v2489_v51  ;;  %v2495_v24 = vmax.f32 %v2489_v51, %v2351_v49 }
 0x38a   : > { %v2493_v8 = vsel %vm2491_vm1, 13, %v2487_v52 }
 0x391   : > { %v7033_v55 = vpop.f32.mrb[84].mxu0 }
 0x392   : > { %v2355_v56 = vpop.f32.mrb[85].mxu0  ;;  %v2364_v59 = vadd.f32 %v7033_v55, %v8662_v20 }
 0x393   : > { %v2356_v58 = vadd.f32 %v8662_v20, %v2355_v56  ;;  %v7034_v19 = vpop.f32.mrb[86].mxu0 }
 0x394   : > { %v2358_v61 = vpop.f32.mrb[87].mxu0  ;;  %v2367_v1 = vadd.f32 %v7034_v19, %v8662_v20  ;;  %v7508_v19 = vld [vmem:[%s9931_s12 + $0x34] ss:$12 sps:$4 sm:$0xff]  }
 0x395   : > { %vm2496_vm4 = vcmp.gt.f32.partialorder %v2356_v58, %v2494_v0  ;;  %v2500_v62 = vmax.f32 %v2494_v0, %v2356_v58  ;;  %v2359_v63 = vadd.f32 %v8662_v20, %v2358_v61  ;;  %v7506_v61 = vld [vmem:[%s9931_s12 + $0x30] ss:$12 sps:$4 sm:$0xff]   ;;  %2757 = vmatprep.subr.bf16.mxu0 %v7508_v19 }
 0x396   : > { %v2498_v14 = vsel %vm2496_vm4, 14, %v2492_v53  ;;  %2758 = vmatpush1.bf16.msra.mxu0 %v7506_v61 }
 0x397   : > { %vm2502_vm5 = vcmp.gt.f32.partialorder %v2364_v59, %v2500_v62  ;;  %vm2497_vm6 = vcmp.gt.f32.partialorder %v2359_v63, %v2495_v24  ;;  %v2501_v25 = vmax.f32 %v2495_v24, %v2359_v63  ;;  %v2506_v3 = vmax.f32 %v2500_v62, %v2364_v59  ;;  %v7511_v59 = vld [vmem:[%s9931_s12 + $0x4c] ss:$12 sps:$4 sm:$0xff]   ;;  %v7509_v62 = vld [vmem:[%s9931_s12 + $0x48] ss:$12 sps:$4 sm:$0xff]   ;;  %v7514_v63 = vld [vmem:[%s9931_s12 + $0x64] ss:$12 sps:$4 sm:$0xff]  }
 0x398   : > { %v2499_v10 = vsel %vm2497_vm6, 14, %v2493_v8  ;;  %v2504_v54 = vsel %vm2502_vm5, 15, %v2498_v14  ;;  %2759 = vmatprep.subr.bf16.mxu0 %v7511_v59  ;;  %v7512_v14 = vld [vmem:[%s9931_s12 + $0x60] ss:$12 sps:$4 sm:$0xff]  }
 0x399   : > { %vm2503_vm7 = vcmp.gt.f32.partialorder %v2367_v1, %v2501_v25  ;;  %v2507_v5 = vmax.f32 %v2501_v25, %v2367_v1  ;;  %v7517_v1 = vld [vmem:[%s9931_s12 + $0x7c] ss:$12 sps:$4 sm:$0xff]   ;;  %v7515_v25 = vld [vmem:[%s9931_s12 + $0x78] ss:$12 sps:$4 sm:$0xff]  }
 0x39a   : > { %v2505_v33 = vsel %vm2503_vm7, 15, %v2499_v10  ;;  %2760 = vmatpush1.bf16.msra.mxu0 %v7509_v62  ;;  %v7518_v10 = vld [vmem:[%s9931_s12 + $0x90] ss:$12 sps:$4 sm:$0xff]   ;;  %vm7947_vm7 = vmmov 0  }
 0x39b   : > { %2761 = vmatprep.subr.bf16.mxu0 %v7514_v63 }
 0x39e   : > { %2762 = vmatpush1.bf16.msra.mxu0 %v7512_v14 }
 0x39f   : > { %2763 = vmatprep.subr.bf16.mxu0 %v7517_v1 }
 0x3a1   : > { %v7037_v15 = vpop.f32.mrb[88].mxu0 }
 0x3a2   : > { %v2371_v9 = vpop.f32.mrb[89].mxu0  ;;  %v2380_v37 = vadd.f32 %v7037_v15, %v8662_v20  ;;  %2764 = vmatpush1.bf16.msra.mxu0 %v7515_v25 }
 0x3a3   : > { %v2372_v57 = vadd.f32 %v8662_v20, %v2371_v9  ;;  %v7038_v13 = vpop.f32.mrb[90].mxu0 }
 0x3a4   : > { %v2374_v16 = vpop.f32.mrb[91].mxu0  ;;  %v2383_v21 = vadd.f32 %v7038_v13, %v8662_v20 }
 0x3a5   : > { %vm2508_vm8 = vcmp.gt.f32.partialorder %v2372_v57, %v2506_v3  ;;  %v2512_v18 = vmax.f32 %v2506_v3, %v2372_v57  ;;  %v2375_v22 = vadd.f32 %v8662_v20, %v2374_v16  ;;  %v7520_v3 = vld [vmem:[%s9931_s12 + $0x94] ss:$12 sps:$4 sm:$0xff]  }
 0x3a6   : > { %v2510_v28 = vsel %vm2508_vm8, 16, %v2504_v54  ;;  %2765 = vmatprep.subr.bf16.mxu0 %v7520_v3  ;;  %v7521_v54 = vld [vmem:[%s9931_s12 + $0xa8] ss:$12 sps:$4 sm:$0xff]   ;;  %vm2846_vm8 = vcmask 261120  }
 0x3a7   : > { %vm2514_vm9 = vcmp.gt.f32.partialorder %v2380_v37, %v2512_v18  ;;  %vm2509_vm10 = vcmp.gt.f32.partialorder %v2375_v22, %v2507_v5  ;;  %v2513_v6 = vmax.f32 %v2507_v5, %v2375_v22  ;;  %v2518_v17 = vmax.f32 %v2512_v18, %v2380_v37  ;;  %2766 = vmatpush1.bf16.msra.mxu0 %v7518_v10  ;;  %v7523_v5 = vld [vmem:[%s9931_s12 + $0xac] ss:$12 sps:$4 sm:$0xff]  }
 0x3a8   : > { %v2511_v27 = vsel %vm2509_vm10, 16, %v2505_v33  ;;  %v2516_v29 = vsel %vm2514_vm9, 17, %v2510_v28  ;;  %v7946_v33 = vmov 0.0   ;;  %2767 = vmatprep.subr.bf16.mxu0 %v7523_v5  ;;  %v2549_v37 = vlaneseq }
 0x3a9   : > { %vm2515_vm11 = vcmp.gt.f32.partialorder %v2383_v21, %v2513_v6  ;;  %v2519_v34 = vmax.f32 %v2513_v6, %v2383_v21  ;;  %7067 = vmatprep.subr.bf16.mxu1 %v7946_v33  ;;  %7069 = vmatprep.mubr.msk.bf16.mxu1 %vm7947_vm7, %v7946_v33  ;;  %v8785_v6 = vld [vmem:[%s9849_s11] sm:$0xff]  ;;  %vm2894_vm9 = vcmask 130048   ;;  %vm3840_vm10 = vcmask 1040384  }
 0x3aa   : > { %v2517_v11 = vsel %vm2515_vm11, 17, %v2511_v27  ;;  %v8779_v22 = vshrl.u32 %v2549_v37, 7  ;;  %vm3842_vm11 = vcmask 1041408  }
 0x3ab   : > { %2768 = vmatpush1.bf16.msra.mxu0 %v7521_v54 }
 0x3ac   : > { %7047 = vmatprep.subr.bf16.mxu0 %v7946_v33  ;;  %v2620_v28 = vsub.s32 0, %v8779_v22 }
 0x3ae   : > { %v2621_v27 = vrot.slane %v8785_v6, %v2620_v28 }
 0x3b1   : > { %v7041_v30 = vpop.f32.mrb[92].mxu0 }
 0x3b2   : > { %v2387_v31 = vpop.f32.mrb[93].mxu0  ;;  %v2396_v32 = vadd.f32 %v7041_v30, %v8662_v20 }
 0x3b3   : > { %v2388_v46 = vadd.f32 %v8662_v20, %v2387_v31  ;;  %v7042_v12 = vpop.f32.mrb[94].mxu0  ;;  %v7524_v31 = vld [vmem:[%s9931_s12 + $0x8] ss:$12 sps:$4 sm:$0xff]  }
 0x3b4   : > { %v2390_v26 = vpop.f32.mrb[95].mxu0  ;;  %v2399_v38 = vadd.f32 %v7042_v12, %v8662_v20  ;;  %v7525_v12 = vld [vmem:[%s9931_s12 + $0x20] ss:$12 sps:$4 sm:$0xff]  }
 0x3b5   : > { %vm2520_vm12 = vcmp.gt.f32.partialorder %v2388_v46, %v2518_v17  ;;  %v2524_v35 = vmax.f32 %v2518_v17, %v2388_v46  ;;  %v2391_v50 = vadd.f32 %v8662_v20, %v2390_v26  ;;  %v7526_v26 = vld [vmem:[%s9931_s12 + $0x38] ss:$12 sps:$4 sm:$0xff]  }
 0x3b6   : > { %v2522_v36 = vsel %vm2520_vm12, 18, %v2516_v29  ;;  %vm3845_vm12 = vcmask 1043456  }
 0x3b7   : > { %vm2526_vm13 = vcmp.gt.f32.partialorder %v2396_v32, %v2524_v35  ;;  %vm2521_vm14 = vcmp.gt.f32.partialorder %v2391_v50, %v2519_v34  ;;  %v2525_v2 = vmax.f32 %v2519_v34, %v2391_v50  ;;  %v2530_v43 = vmax.f32 %v2524_v35, %v2396_v32  ;;  %v7527_v32 = vld [vmem:[%s9931_s12 + $0x50] ss:$12 sps:$4 sm:$0xff]   ;;  %v7528_v35 = vld [vmem:[%s9931_s12 + $0x68] ss:$12 sps:$4 sm:$0xff]   ;;  %v7529_v50 = vld [vmem:[%s9931_s12 + $0x80] ss:$12 sps:$4 sm:$0xff]  }
 0x3b8   : > { %v2523_v39 = vsel %vm2521_vm14, 18, %v2517_v11  ;;  %v2528_v40 = vsel %vm2526_vm13, 19, %v2522_v36  ;;  %v7530_v36 = vld [vmem:[%s9931_s12 + $0x98] ss:$12 sps:$4 sm:$0xff]   ;;  %vm3847_vm13 = vcmask 1044480   ;;  %vm3849_vm14 = vcmask 1045504  }
 0x3b9   : > { %vm2527_vm15 = vcmp.gt.f32.partialorder %v2399_v38, %v2525_v2  ;;  %v2531_v41 = vmax.f32 %v2525_v2, %v2399_v38  ;;  %v7531_v38 = vld [vmem:[%s9931_s12 + $0xb0] ss:$12 sps:$4 sm:$0xff]  }
 0x3ba   : > { %v2529_v42 = vsel %vm2527_vm15, 19, %v2523_v39  ;;  %vm3851_vm15 = vcmask 1046528  }
 0x3c1   : > { %v7045_v47 = vpop.f32.mrb[96].mxu0 }
 0x3c2   : > { %v2403_v7 = vpop.f32.mrb[97].mxu0  ;;  %v2412_v48 = vadd.f32 %v7045_v47, %v8662_v20 }
 0x3c3   : > { %v2404_v44 = vadd.f32 %v8662_v20, %v2403_v7  ;;  %v7046_v45 = vpop.f32.mrb[98].mxu0 }
 0x3c4   : > { %v2406_v60 = vpop.f32.mrb[99].mxu0  ;;  %v2415_v0 = vadd.f32 %v7046_v45, %v8662_v20 }
 0x3c5   : > { %vm2532_vm1 = vcmp.gt.f32.partialorder %v2404_v44, %v2530_v43  ;;  %v2536_v23 = vmax.f32 %v2530_v43, %v2404_v44  ;;  %v2407_v49 = vadd.f32 %v8662_v20, %v2406_v60 }
 0x3c6   : > { %v2534_v51 = vsel %vm2532_vm1, 20, %v2528_v40  ;;  %vm4172_vm1 = vcmask 64512  }
 0x3c7   : > { %vm2538_vm4 = vcmp.gt.f32.partialorder %v2412_v48, %v2536_v23  ;;  %vm2533_vm5 = vcmp.gt.f32.partialorder %v2407_v49, %v2531_v41  ;;  %v2537_v52 = vmax.f32 %v2531_v41, %v2407_v49  ;;  %v8726_v53 = vmax.f32 %v2536_v23, %v2412_v48  ;;  %v2546_v23 = vld [vmem:[%s751_s3] sm:$0x1] }
 0x3c8   : > { %v2540_v24 = vsel %vm2538_vm4, 21, %v2534_v51  ;;  %v2535_v8 = vsel %vm2533_vm5, 20, %v2529_v42  ;;  %v2547_v49 = vsub.f32 1.0, %v2546_v23  ;;  %vm6087_vm4 = vcmp.eq.s32.totalorder %v8779_v22, 2 }
 0x3c9   : > { %2544 = vst [vmem:[%s8728_s4] sm:$0xff] %v2540_v24  ;;  %vm2539_vm6 = vcmp.gt.f32.partialorder %v2415_v0, %v2537_v52  ;;  %v8731_v55 = vmax.f32 %v2537_v52, %v2415_v0  ;;  %v2603_v56 = vmul.f32 %v8726_v53, %v8726_v53  ;;  %vm6091_vm5 = vcmp.eq.s32.totalorder %v8779_v22, 3 }
 0x3ca   : > { %v2541_v58 = vsel %vm2539_vm6, 21, %v2535_v8  ;;  %v2548_v51 = vmul.f32 -1e+09, %v2547_v49  ;;  %vm6095_vm6 = vcmp.eq.s32.totalorder %v8779_v22, 4 }
 0x3cb   : > { %2545 = vst [vmem:[%s8728_s4 + $0x8] sm:$0xff] %v2541_v58  ;;  %2605 = vadd.xlane.f32.xlu0 %v2603_v56  ;;  %v2604_v20 = vmul.f32 %v8731_v55, %v8731_v55  ;;  %s9939_s4 = sld [smem:[#allocation35_spill]] }
 0x3cc   : > { %v8839_v0 = vrot.slane %v2548_v51, %v2620_v28 }
 0x3cf   : > { %2607 = vadd.xlane.f32.xlu0 %v2604_v20 }
 0x458   : > { %v2606_v15 = vpop.xlane.xlu0 %2605 }
 0x459   : > { %v2610_v9 = vmul.f32 0.0078125, %v2606_v15 }
 0x45b   : > { %v2612_v57 = vadd.f32 1e-06, %v2610_v9 }
 0x45c   : > { %v2608_v13 = vpop.xlane.xlu0 %2607 }
 0x45d   : > { %7732 = vrsqrt.f32 %v2612_v57  ;;  %v2611_v16 = vmul.f32 0.0078125, %v2608_v13 }
 0x45f   : > { %v2613_v18 = vadd.f32 1e-06, %v2611_v16 }
 0x461   : > { %7734 = vrsqrt.f32 %v2613_v18 }
 0x467   : > { %v7733_v21 = vpop.eup %7732 }
 0x468   : > { %v2616_v17 = vmul.f32 %v7733_v21, %v8726_v53 }
 0x46a   : > { %v2622_v11 = vmul.f32 %v2621_v27, %v2616_v17 }
 0x46b   : > { %v7735_v29 = vpop.eup %7734 }
 0x46c   : > { %v2617_v34 = vmul.f32 %v7735_v29, %v8731_v55 }
 0x46e   : > { %v2623_v30 = vmul.f32 %v2621_v27, %v2617_v34 }
 0x470   : > { %v2624_v46 = vpack.c.bf16 %v2623_v30, %v2622_v11 }
 0x472   : > { %2786 = vmatmul.mubr.bf16.vlgmr.msra.gmra.mrb[100].mxu0 %v2624_v46 }
 0x473   : > { %7048 = vmatpush3.bf16.msra.mxu0 %v7524_v31  ;;  %7063 = vmatprep.mubr.msk.bf16.mxu0 %vm7947_vm7, %v7946_v33 }
 0x474   : > { %7049 = vmatprep.subr.bf16.mxu0 %v7946_v33 }
 0x477   : > { %7050 = vmatpush3.bf16.msra.mxu0 %v7525_v12 }
 0x478   : > { %7051 = vmatprep.subr.bf16.mxu0 %v7946_v33 }
 0x47b   : > { %7052 = vmatpush3.bf16.msra.mxu0 %v7526_v26 }
 0x47c   : > { %7053 = vmatprep.subr.bf16.mxu0 %v7946_v33 }
 0x47f   : > { %7054 = vmatpush3.bf16.msra.mxu0 %v7527_v32 }
 0x480   : > { %7055 = vmatprep.subr.bf16.mxu0 %v7946_v33 }
 0x483   : > { %7056 = vmatpush3.bf16.msra.mxu0 %v7528_v35 }
 0x484   : > { %7057 = vmatprep.subr.bf16.mxu0 %v7946_v33 }
 0x487   : > { %7058 = vmatpush3.bf16.msra.mxu0 %v7529_v50 }
 0x488   : > { %7059 = vmatprep.subr.bf16.mxu0 %v7946_v33 }
 0x48b   : > { %7060 = vmatpush3.bf16.msra.mxu0 %v7530_v36 }
 0x48c   : > { %7061 = vmatprep.subr.bf16.mxu0 %v7946_v33 }
 0x48f   : > { %7062 = vmatpush3.bf16.msra.mxu0 %v7531_v38 }
 0x490   : > { %7091 = vmatprep.subr.bf16.mxu0 %v7946_v33 }
 0x492   : > { %7064 = vmatmul.mubr.bf16.vlgmr.msra.gmra.mrb[104].mxu0 %v2624_v46 }
 0x493   : > { %7093 = vmatprep.mubr.msk.bf16.mxu0 %vm7947_vm7, %v7946_v33 }
 0x545   : > { %v2787_v2 = vpop.f32.mrb[100].mxu0 }
 0x546   : > { %v2789_v43 = vpop.f32.mrb[101].mxu0 }
 0x547   : > { %v2791_v39 = vpop.f32.mrb[102].mxu0 }
 0x548   : > { %v2837_v40 = vpack.c.bf16 %v2791_v39, %v2787_v2  ;;  %v2793_v41 = vpop.f32.mrb[103].mxu0 }
 0x549   : > { %v2838_v42 = vpack.c.bf16 %v2793_v41, %v2789_v43 }
 0x54b   : > { %v2851_v47 = vsel %vm2846_vm8, %v2838_v42, 0 }
 0x54c   : > { %7068 = vmatpush3.bf16.xpose.msra.mxu1 %v2851_v47 }
 0x54d   : > { %7073 = vmatprep.subr.bf16.mxu1 %v7946_v33 }
 0x553   : > { %7070 = vmatmul.mubr.msk.bf16.vlgmr.msra.gmra.mrb[120].mxu1 %vm2846_vm8, %v2837_v40 }
 0x554   : > { %7075 = vmatprep.mubr.msk.bf16.mxu1 %vm7947_vm7, %v7946_v33 }
 0x565   : > { %v2830_v7 = vpop.f32.mrb[104].mxu0 }
 0x566   : > { %v7065_v44 = vpop.f32.mrb[105].mxu0 }
 0x567   : > { %v2833_v45 = vpop.f32.mrb[106].mxu0 }
 0x568   : > { %v8831_v60 = vpack.c.bf16 %v2833_v45, %v2830_v7  ;;  %v7066_v48 = vpop.f32.mrb[107].mxu0 }
 0x56a   : > { %7074 = vmatpush3.bf16.msra.mxu1 %v8831_v60 }
 0x56b   : > { %7079 = vmatprep.subr.bf16.mxu1 %v7946_v33 }
 0x626   : > { %v2887_v52 = vpop.f32.mrb[120].mxu1 }
 0x627   : > { %v2888_v24 = vadd.f32 %v2887_v52, %v8839_v0  ;;  %v7071_v8 = vpop.f32.mrb[121].mxu1 }
 0x628   : > { %v2890_v56 = vpop.f32.mrb[122].mxu1 }
 0x629   : > { %v2891_v58 = vadd.f32 %v2890_v56, %v8839_v0  ;;  %v7072_v20 = vpop.f32.mrb[123].mxu1  ;;  %v2895_v19 = vsel %vm2894_vm9, %v2888_v24, -inf }
 0x62a   : > { %2896 = vmax.xlane.f32.xlu1 %v2895_v19 }
 0x62b   : > { %v2898_v61 = vsel %vm2894_vm9, %v2891_v58, -inf }
 0x62e   : > { %2899 = vmax.xlane.f32.xlu1 %v2898_v61 }
 0x6b7   : > { %v2897_v59 = vpop.xlane.xlu1 %2896 }
 0x6b8   : > { %v2901_v62 = vsub.f32 %v2888_v24, %v2897_v59 }
 0x6ba   : > { %v2903_v63 = vmul.f32 1.442695, %v2901_v62 }
 0x6bb   : > { %v2900_v14 = vpop.xlane.xlu1 %2899 }
 0x6bc   : > { %7736 = vpow2.f32 %v2903_v63  ;;  %v2902_v1 = vsub.f32 %v2891_v58, %v2900_v14 }
 0x6be   : > { %v2905_v25 = vmul.f32 1.442695, %v2902_v1 }
 0x6c0   : > { %7738 = vpow2.f32 %v2905_v25 }
 0x6c6   : > { %v7737_v3 = vpop.eup %7736 }
 0x6c7   : > { %v2907_v10 = vsel %vm2894_vm9, %v7737_v3, 0.0 }
 0x6c8   : > { %2908 = vadd.xlane.f32.xlu0 %v2907_v10 }
 0x6ca   : > { %v7739_v54 = vpop.eup %7738 }
 0x6cb   : > { %v2910_v5 = vsel %vm2894_vm9, %v7739_v54, 0.0 }
 0x6cc   : > { %2911 = vadd.xlane.f32.xlu1 %v2910_v5 }
 0x6dd   : > { %2963 = vrot.lane.b32.xlu1 %v2837_v40, %s9881_s1 }
 0x6de   : > { %2966 = vrot.lane.b32.xlu0 %v2838_v42, %s9881_s1 }
 0x6e1   : > { %3088 = vrot.lane.b32.xlu1 %v2838_v42, %s9879_s20 }
 0x6e2   : > { %3209 = vrot.lane.b32.xlu0 %v2838_v42, %s9877_s0 }
 0x6e5   : > { %3086 = vrot.lane.b32.xlu1 %v2837_v40, %s9879_s20 }
 0x6e9   : > { %3207 = vrot.lane.b32.xlu1 %v2837_v40, %s9877_s0 }
 0x755   : > { %v2909_v15 = vpop.xlane.xlu0 %2908 }
 0x756   : > { %7740 = vrcp.f32 %v2909_v15 }
 0x759   : > { %v2912_v9 = vpop.xlane.xlu1 %2911  ;;  %v2967_v13 = vpop.permute.xlu0 %2966 }
 0x75a   : > { %7742 = vrcp.f32 %v2912_v9  ;;  %v2972_v11 = vsel %vm2846_vm8, %v2967_v13, 0 }
 0x75d   : > { %v2964_v57 = vpop.permute.xlu1 %2963  ;;  %v3210_v29 = vpop.permute.xlu0 %3209 }
 0x75e   : > { %v3215_v31 = vsel %vm2846_vm8, %v3210_v29, 0 }
 0x760   : > { %v7741_v18 = vpop.eup %7740 }
 0x761   : > { %v3089_v16 = vpop.permute.xlu1 %3088  ;;  %v2915_v17 = vmul.f32 %v7741_v18, %v7737_v3 }
 0x762   : > { %v3094_v28 = vsel %vm2846_vm8, %v3089_v16, 0 }
 0x763   : > { %7092 = vmatpush3.bf16.xpose.msra.mxu0 %v3094_v28 }
 0x764   : > { %v7743_v21 = vpop.eup %7742  ;;  %7103 = vmatprep.subr.bf16.mxu0 %v7946_v33 }
 0x765   : > { %v2916_v27 = vmul.f32 %v7743_v21, %v7739_v54  ;;  %v3087_v30 = vpop.permute.xlu1 %3086 }
 0x767   : > { %v2917_v34 = vpack.c.bf16 %v2916_v27, %v2915_v17 }
 0x769   : > { %7076 = vmatmul.mubr.msk.bf16.vlgmr.msra.gmra.mrb[124].mxu1 %vm2894_vm9, %v2917_v34  ;;  %v3208_v46 = vpop.permute.xlu1 %3207 }
 0x76a   : > { %7080 = vmatpush3.bf16.xpose.msra.mxu1 %v2972_v11  ;;  %7094 = vmatmul.mubr.msk.bf16.vlgmr.msra.gmra.mrb[108].mxu0 %vm2846_vm8, %v3087_v30 }
 0x76b   : > { %7104 = vmatpush3.bf16.xpose.msra.mxu0 %v3215_v31  ;;  %7081 = vmatprep.mubr.msk.bf16.mxu1 %vm7947_vm7, %v7946_v33 }
 0x76c   : > { %7105 = vmatprep.mubr.msk.bf16.mxu0 %vm7947_vm7, %v7946_v33  ;;  %7085 = vmatprep.subr.bf16.mxu1 %v7946_v33 }
 0x76d   : > { %7115 = vmatprep.subr.bf16.mxu0 %v7946_v33 }
 0x771   : > { %7082 = vmatmul.mubr.msk.bf16.vlgmr.msra.gmra.mrb[128].mxu1 %vm2846_vm8, %v2964_v57 }
 0x772   : > { %7106 = vmatmul.mubr.msk.bf16.vlgmr.msra.gmra.mrb[112].mxu0 %vm2846_vm8, %v3208_v46  ;;  %7087 = vmatprep.mubr.msk.bf16.mxu1 %vm7947_vm7, %v7946_v33 }
 0x773   : > { %7131 = vmatprep.mubr.msk.bf16.mxu0 %vm7947_vm7, %v7946_v33 }
 0x83c   : > { %v8871_v12 = vpop.f32.mrb[124].mxu1 }
 0x83d   : > { %v7077_v26 = vpop.f32.mrb[125].mxu1  ;;  %v3130_v32 = vpop.f32.mrb[108].mxu0 }
 0x83e   : > { %v8873_v35 = vpop.f32.mrb[126].mxu1  ;;  %v7095_v50 = vpop.f32.mrb[109].mxu0  ;;  %v3131_v7 = vadd.f32 %v3130_v32, %v8839_v0 }
 0x83f   : > { %v7078_v36 = vpop.f32.mrb[127].mxu1  ;;  %v3133_v38 = vpop.f32.mrb[110].mxu0 }
 0x840   : > { %v7096_v2 = vpop.f32.mrb[111].mxu0  ;;  %v3134_v24 = vadd.f32 %v3133_v38, %v8839_v0  ;;  %v3137_v8 = vsel %vm2894_vm9, %v3131_v7, -inf }
 0x842   : > { %v3140_v20 = vsel %vm2894_vm9, %v3134_v24, -inf }
 0x844   : > { %v3008_v43 = vpop.f32.mrb[128].mxu1 }
 0x845   : > { %v3009_v39 = vadd.f32 %v3008_v43, %v8839_v0  ;;  %v7083_v40 = vpop.f32.mrb[129].mxu1  ;;  %v3251_v41 = vpop.f32.mrb[112].mxu0 }
 0x846   : > { %v3011_v42 = vpop.f32.mrb[130].mxu1  ;;  %v7107_v47 = vpop.f32.mrb[113].mxu0  ;;  %v3252_v58 = vadd.f32 %v3251_v41, %v8839_v0 }
 0x847   : > { %v3012_v44 = vadd.f32 %v3011_v42, %v8839_v0  ;;  %v7084_v45 = vpop.f32.mrb[131].mxu1  ;;  %v3254_v48 = vpop.f32.mrb[114].mxu0  ;;  %v3015_v23 = vsel %vm2894_vm9, %v3009_v39, -inf }
 0x848   : > { %v7108_v49 = vpop.f32.mrb[115].mxu0  ;;  %3016 = vmax.xlane.f32.xlu0 %v3015_v23  ;;  %v3255_v51 = vadd.f32 %v3254_v48, %v8839_v0  ;;  %v3258_v19 = vsel %vm2894_vm9, %v3252_v58, -inf }
 0x849   : > { %v3018_v52 = vsel %vm2894_vm9, %v3012_v44, -inf }
 0x84a   : > { %3019 = vmax.xlane.f32.xlu1 %v3018_v52  ;;  %v3261_v56 = vsel %vm2894_vm9, %v3255_v51, -inf }
 0x84c   : > { %3138 = vmax.xlane.f32.xlu0 %v3137_v8 }
 0x84e   : > { %3262 = vmax.xlane.f32.xlu1 %v3261_v56 }
 0x850   : > { %3141 = vmax.xlane.f32.xlu0 %v3140_v20 }
 0x854   : > { %3259 = vmax.xlane.f32.xlu0 %v3258_v19 }
 0x8d5   : > { %v3017_v61 = vpop.xlane.xlu0 %3016 }
 0x8d6   : > { %v3021_v54 = vsub.f32 %v3009_v39, %v3017_v61  ;;  %v7532_v61 = vld [vmem:[%s9934_s13] sm:$0xff]  }
 0x8d7   : > { %v3020_v59 = vpop.xlane.xlu1 %3019  ;;  %7116 = vmatpush3.bf16.msra.mxu0 %v7532_v61 }
 0x8d8   : > { %v3022_v5 = vsub.f32 %v3012_v44, %v3020_v59  ;;  %v3023_v16 = vmul.f32 1.442695, %v3021_v54  ;;  %v7533_v59 = vld [vmem:[%s9934_s13 + $0x8] sm:$0xff]   ;;  %7117 = vmatprep.subr.bf16.mxu0 %v7946_v33 }
 0x8d9   : > { %v3139_v62 = vpop.xlane.xlu0 %3138 }
 0x8da   : > { %v3143_v63 = vsub.f32 %v3131_v7, %v3139_v62  ;;  %v3025_v18 = vmul.f32 1.442695, %v3022_v5  ;;  %v7534_v62 = vld [vmem:[%s9934_s13 + $0x10] sm:$0xff]  }
 0x8db   : > { %v3263_v14 = vpop.xlane.xlu1 %3262  ;;  %7118 = vmatpush3.bf16.msra.mxu0 %v7533_v59 }
 0x8dc   : > { %v3145_v1 = vmul.f32 1.442695, %v3143_v63  ;;  %v3265_v25 = vsub.f32 %v3255_v51, %v3263_v14  ;;  %7119 = vmatprep.subr.bf16.mxu0 %v7946_v33  ;;  %v7535_v63 = vld [vmem:[%s9934_s13 + $0x18] sm:$0xff]   ;;  %v7536_v14 = vld [vmem:[%s9934_s13 + $0x20] sm:$0xff]  }
 0x8dd   : > { %v3142_v3 = vpop.xlane.xlu0 %3141 }
 0x8de   : > { %7744 = vpow2.f32 %v3145_v1  ;;  %v3144_v10 = vsub.f32 %v3134_v24, %v3142_v3  ;;  %v3268_v15 = vmul.f32 1.442695, %v3265_v25  ;;  %v7537_v3 = vld [vmem:[%s9934_s13 + $0x28] sm:$0xff]  }
 0x8df   : > { %7120 = vmatpush3.bf16.msra.mxu0 %v7534_v62 }
 0x8e0   : > { %v3147_v9 = vmul.f32 1.442695, %v3144_v10  ;;  %7121 = vmatprep.subr.bf16.mxu0 %v7946_v33 }
 0x8e1   : > { %v3260_v57 = vpop.xlane.xlu0 %3259 }
 0x8e2   : > { %7746 = vpow2.f32 %v3147_v9  ;;  %v3264_v13 = vsub.f32 %v3252_v58, %v3260_v57 }
 0x8e3   : > { %7748 = vpow2.f32 %v3268_v15  ;;  %7122 = vmatpush3.bf16.msra.mxu0 %v7535_v63  ;;  %v7538_v15 = vld [vmem:[%s9934_s13 + $0x30] sm:$0xff]  }
 0x8e4   : > { %v3266_v28 = vmul.f32 1.442695, %v3264_v13  ;;  %7123 = vmatprep.subr.bf16.mxu0 %v7946_v33  ;;  %v7539_v13 = vld [vmem:[%s9934_s13 + $0x38] sm:$0xff]   ;;  %s9935_s13 = sld [smem:[#allocation31_spill]] }
 0x8e6   : > { %7750 = vpow2.f32 %v3266_v28 }
 0x8e7   : > { %7752 = vpow2.f32 %v3023_v16  ;;  %7124 = vmatpush3.bf16.msra.mxu0 %v7536_v14 }
 0x8e8   : > { %v7745_v21 = vpop.eup %7744  ;;  %7754 = vpow2.f32 %v3025_v18  ;;  %7125 = vmatprep.subr.bf16.mxu0 %v7946_v33 }
 0x8e9   : > { %v3149_v17 = vsel %vm2894_vm9, %v7745_v21, 0.0 }
 0x8ea   : > { %3150 = vadd.xlane.f32.xlu0 %v3149_v17  ;;  %s3805_s23 = scalar_lea.vmem %s9935_s13, %s3804_s28  ;;  %s3813_s2 = scalar_lea.vmem %s9935_s13, %s3812_s24 }
 0x8eb   : > { %7126 = vmatpush3.bf16.msra.mxu0 %v7537_v3  ;;  %v3814_v62 = vld [vmem:[%s3813_s2] sm:$0x1]  ;;  %s9937_s2 = smov 64   ;;  %s9938_s28 = smov 32  }
 0x8ec   : > { %v7747_v27 = vpop.eup %7746  ;;  %7127 = vmatprep.subr.bf16.mxu0 %v7946_v33  ;;  %s9942_s24 = sadd.s32 2, %s8970_s6 }
 0x8ed   : > { %v3152_v29 = vsel %vm2894_vm9, %v7747_v27, 0.0  ;;  %v7749_v34 = vpop.eup %7748 }
 0x8ee   : > { %3153 = vadd.xlane.f32.xlu1 %v3152_v29  ;;  %v3273_v46 = vsel %vm2894_vm9, %v7749_v34, 0.0 }
 0x8ef   : > { %7128 = vmatpush3.bf16.msra.mxu0 %v7538_v15 }
 0x8f0   : > { %v7751_v11 = vpop.eup %7750  ;;  %7129 = vmatprep.subr.bf16.mxu0 %v7946_v33 }
 0x8f1   : > { %v7753_v30 = vpop.eup %7752  ;;  %v3270_v31 = vsel %vm2894_vm9, %v7751_v11, 0.0 }
 0x8f2   : > { %v7755_v26 = vpop.eup %7754  ;;  %3271 = vadd.xlane.f32.xlu0 %v3270_v31  ;;  %3274 = vadd.xlane.f32.xlu1 %v3273_v46  ;;  %v3027_v32 = vsel %vm2894_vm9, %v7753_v30, 0.0 }
 0x8f3   : > { %v3030_v50 = vsel %vm2894_vm9, %v7755_v26, 0.0  ;;  %7130 = vmatpush3.bf16.msra.mxu0 %v7539_v13 }
 0x8f6   : > { %3028 = vadd.xlane.f32.xlu0 %v3027_v32  ;;  %3031 = vadd.xlane.f32.xlu1 %v3030_v50 }
 0x907   : > { %3160 = vrot.lane.b32.xlu1 %v8831_v60, %s9879_s20 }
 0x90b   : > { %3281 = vrot.lane.b32.xlu1 %v8831_v60, %s9877_s0 }
 0x90c   : > { %3039 = vrot.lane.b32.xlu0 %v8831_v60, %s9881_s1 }
 0x977   : > { %v3151_v36 = vpop.xlane.xlu0 %3150 }
 0x97b   : > { %v3154_v38 = vpop.xlane.xlu1 %3153 }
 0x97f   : > { %v3272_v2 = vpop.xlane.xlu0 %3271  ;;  %v3275_v43 = vpop.xlane.xlu1 %3274 }
 0x983   : > { %v3029_v39 = vpop.xlane.xlu0 %3028  ;;  %v3032_v40 = vpop.xlane.xlu1 %3031 }
 0x984   : > { %7756 = vrcp.f32 %v3029_v39 }
 0x985   : > { %7758 = vrcp.f32 %v3032_v40 }
 0x986   : > { %7760 = vrcp.f32 %v3154_v38 }
 0x987   : > { %v3040_v41 = vpop.permute.xlu0 %3039  ;;  %7762 = vrcp.f32 %v3151_v36  ;;  %v3161_v48 = vpop.permute.xlu1 %3160 }
 0x988   : > { %7086 = vmatpush3.bf16.msra.mxu1 %v3040_v41  ;;  %7764 = vrcp.f32 %v3272_v2 }
 0x989   : > { %7097 = vmatprep.subr.bf16.mxu1 %v7946_v33  ;;  %7766 = vrcp.f32 %v3275_v43 }
 0x98b   : > { %v3282_v56 = vpop.permute.xlu1 %3281 }
 0x98e   : > { %v7757_v42 = vpop.eup %7756 }
 0x98f   : > { %v7759_v47 = vpop.eup %7758  ;;  %v3035_v7 = vmul.f32 %v7757_v42, %v7753_v30 }
 0x990   : > { %v3036_v44 = vmul.f32 %v7759_v47, %v7755_v26  ;;  %v7761_v45 = vpop.eup %7760 }
 0x991   : > { %v7763_v23 = vpop.eup %7762  ;;  %v3158_v49 = vmul.f32 %v7761_v45, %v7747_v27  ;;  %v7546_v45 = vld [vmem:[%s9852_s14 + $0x20] ss:$8 sps:$4 sm:$0xff]  }
 0x992   : > { %v3037_v60 = vpack.c.bf16 %v3036_v44, %v3035_v7  ;;  %v3157_v51 = vmul.f32 %v7763_v23, %v7745_v21  ;;  %v7765_v52 = vpop.eup %7764  ;;  %v7545_v7 = vld [vmem:[%s9852_s14 + $0x14] ss:$8 sps:$4 sm:$0xff]   ;;  %v7543_v44 = vld [vmem:[%s9852_s14 + $0x10] ss:$8 sps:$4 sm:$0xff]  }
 0x993   : > { %v7767_v8 = vpop.eup %7766  ;;  %v3278_v58 = vmul.f32 %v7765_v52, %v7751_v11 }
 0x994   : > { %7088 = vmatmul.mubr.msk.bf16.vlgmr.msra.gmra.mrb[132].mxu1 %vm2894_vm9, %v3037_v60  ;;  %v3159_v24 = vpack.c.bf16 %v3158_v49, %v3157_v51  ;;  %v3279_v20 = vmul.f32 %v7767_v8, %v7749_v34  ;;  %v7548_v60 = vld [vmem:[%s9852_s14 + $0x24] ss:$8 sps:$4 sm:$0xff]  }
 0x995   : > { %7098 = vmatpush3.bf16.msra.mxu1 %v3161_v48  ;;  %7099 = vmatprep.mubr.msk.bf16.mxu1 %vm7947_vm7, %v7946_v33 }
 0x996   : > { %7109 = vmatprep.subr.bf16.mxu1 %v7946_v33  ;;  %v3280_v19 = vpack.c.bf16 %v3279_v20, %v3278_v58 }
 0x99c   : > { %7100 = vmatmul.mubr.msk.bf16.vlgmr.msra.gmra.mrb[136].mxu1 %vm2894_vm9, %v3159_v24 }
 0x99d   : > { %7110 = vmatpush3.bf16.msra.mxu1 %v3282_v56  ;;  %7111 = vmatprep.mubr.msk.bf16.mxu1 %vm7947_vm7, %v7946_v33  ;;  %v3806_v56 = vld [vmem:[%s3805_s23] sm:$0x1]  ;;  %s9943_s23 = sadd.s32 3, %s8970_s6 }
 0x9a4   : > { %7112 = vmatmul.mubr.msk.bf16.vlgmr.msra.gmra.mrb[140].mxu1 %vm2894_vm9, %v3280_v19  ;;  %v3829_v19 = vrot.slane %v3806_v56, 4 }
 0x9a5   : > { %3631 = vmatprep.mubr.bf16.mxu1 %v7945_v4 }
 0xa67   : > { %v3079_v1 = vpop.f32.mrb[132].mxu1 }
 0xa68   : > { %v7089_v25 = vpop.f32.mrb[133].mxu1 }
 0xa69   : > { %v3082_v10 = vpop.f32.mrb[134].mxu1  ;;  %v3835_v25 = vrot.slane %v3814_v62, 2  ;;  %v7569_v62 = vld [vmem:[%s9854_s16 + $0x1c] ss:$12 sps:$4 sm:$0xff]  }
 0xa6a   : > { %v7393_v54 = vpack.i.bf16 %v3082_v10, %v3079_v1  ;;  %v7090_v5 = vpop.f32.mrb[135].mxu1 }
 0xa6c   : > { %7394 = vrot.lane.b32.xlu1 %v7393_v54, %s9877_s0  ;;  %s9889_s0 = sadd.s32 2, %s8970_s6 }
 0xa6d   : > { %s3796_s3 = sld [smem:[#allocation3 + %s9889_s0]] }
 0xa6e   : > { %s6092_s0 = sld [smem:[#allocation4 + %s9943_s23]] }
 0xa6f   : > { %v3200_v9 = vpop.f32.mrb[136].mxu1 }
 0xa70   : > { %v7101_v57 = vpop.f32.mrb[137].mxu1 }
 0xa71   : > { %v3203_v16 = vpop.f32.mrb[138].mxu1 }
 0xa72   : > { %v7398_v18 = vpack.i.bf16 %v3203_v16, %v3200_v9  ;;  %v7102_v28 = vpop.f32.mrb[139].mxu1 }
 0xa73   : > { %s3797_s30 = scalar_lea.vmem %s9935_s13, %s3796_s3  ;;  %s6100_s3 = sld [smem:[#allocation4 + %s3807_s25]] }
 0xa74   : > { %7399 = vrot.lane.b32.xlu0 %v7398_v18, %s9879_s20  ;;  %v3798_v23 = vld [vmem:[%s3797_s30] sm:$0x1]  ;;  %s3816_s30 = sld [smem:[#allocation3 + %s3815_s9]]  ;;  %s7335_s25 = smul.u32 24, %s8719_s8 }
 0xa75   : > { %v3823_v24 = vrot.slane %v3798_v23, 6 }
 0xa77   : > { %v3321_v21 = vpop.f32.mrb[140].mxu1 }
 0xa78   : > { %v7113_v17 = vpop.f32.mrb[141].mxu1 }
 0xa79   : > { %v3324_v27 = vpop.f32.mrb[142].mxu1 }
 0xa7a   : > { %v7403_v29 = vpack.i.bf16 %v3324_v27, %v3321_v21  ;;  %v7114_v34 = vpop.f32.mrb[143].mxu1  ;;  %v7554_v27 = vld [vmem:[%s9852_s14 + $0x44] ss:$8 sps:$4 sm:$0xff]  }
 0xa7b   : > { %v7557_v34 = vld [vmem:[%s9852_s14 + $0x54] ss:$8 sps:$4 sm:$0xff]  }
 0xa7c   : > { %7404 = vrot.lane.b32.xlu1 %v7403_v29, %s9881_s1  ;;  %s9887_s1 = sadd.s32 1, %s8970_s6  ;;  %v7552_v29 = vld [vmem:[%s9852_s14 + $0x40] ss:$8 sps:$4 sm:$0xff]  }
 0xa7d   : > { %s3792_s20 = sld [smem:[#allocation3 + %s9887_s1]]  ;;  %s3789_s1 = scalar_lea.vmem %s9935_s13, %s3788_s29 }
 0xa7e   : > { %v3790_v51 = vld [vmem:[%s3789_s1] sm:$0x1]  ;;  %s3809_s1 = scalar_lea.vmem %s9935_s13, %s3808_s27  ;;  %s6080_s29 = sld [smem:[#allocation4 + %s8970_s6]] }
 0xa7f   : > { %v3810_v61 = vld [vmem:[%s3809_s1] sm:$0x1]  ;;  %s6096_s1 = sld [smem:[#allocation4 + %s3803_s26]] }
 0xa80   : > { %v3832_v63 = vrot.slane %v3810_v61, 3  ;;  %v7564_v61 = vld [vmem:[%s9854_s16] ss:$12 sps:$4 sm:$0xff]   ;;  %s9945_s26 = sld [smem:[#allocation16_spill]] }
 0xa83   : > { %s3793_s5 = scalar_lea.vmem %s9935_s13, %s3792_s20  ;;  %s3801_s20 = scalar_lea.vmem %s9935_s13, %s3800_s7 }
 0xa84   : > { %v3794_v48 = vld [vmem:[%s3793_s5] sm:$0x1]  ;;  %s9936_s7 = smov 96   ;;  %s6088_s5 = sld [smem:[#allocation4 + %s9942_s24]] }
 0xa85   : > { %v3820_v49 = vrot.slane %v3794_v48, 7  ;;  %v3802_v52 = vld [vmem:[%s3801_s20] sm:$0x1]  ;;  %s3817_s20 = scalar_lea.vmem %s9935_s13, %s3816_s30  ;;  %s9940_s30 = sld [smem:[#allocation32_spill]] }
 0xa86   : > { %v3826_v58 = vrot.slane %v3802_v52, 5  ;;  %v3818_v1 = vld [vmem:[%s3817_s20] sm:$0x1]  ;;  %s9941_s20 = sadd.s32 1, %s8970_s6  ;;  %s9944_s6 = sld [smem:[#allocation22_spill]] }
 0xa87   : > { %v3841_v8 = vsel %vm3840_vm10, %v3790_v51, %v3820_v49  ;;  %v3838_v10 = vrot.slane %v3818_v1, 1  ;;  %v3514_v49 = vsub.s32 1, %v8779_v22  ;;  %v7572_v1 = vld [vmem:[%s9854_s16 + $0x34] ss:$12 sps:$4 sm:$0xff]   ;;  %s6084_s27 = sld [smem:[#allocation4 + %s9941_s20]]  ;;  %s7337_s12 = smul.u32 384, %s9945_s26 }
 0xa88   : > { %v3843_v20 = vsel %vm3842_vm11, %v3841_v8, %v3823_v24 }
 0xa89   : > { %v3844_v59 = vsel %vm899_vm0, %v3843_v20, %v3826_v58  ;;  %v3515_v24 = vrot.slane %v8785_v6, %v3514_v49 }
 0xa8a   : > { %v3846_v14 = vsel %vm3845_vm12, %v3844_v59, %v3829_v19 }
 0xa8b   : > { %v3848_v3 = vsel %vm3847_vm13, %v3846_v14, %v3832_v63  ;;  %v7567_v14 = vld [vmem:[%s9854_s16 + $0x18] ss:$12 sps:$4 sm:$0xff]  }
 0xa8c   : > { %v3850_v54 = vsel %vm3849_vm14, %v3848_v3, %v3835_v25  ;;  %v7570_v3 = vld [vmem:[%s9854_s16 + $0x30] ss:$12 sps:$4 sm:$0xff]  }
 0xa8d   : > { %v9023_v13 = vsel %vm3851_vm15, %v3850_v54, %v3838_v10  ;;  %v7575_v10 = vld [vmem:[%s9854_s16 + $0x4c] ss:$12 sps:$4 sm:$0xff]   ;;  %v7573_v54 = vld [vmem:[%s9854_s16 + $0x48] ss:$12 sps:$4 sm:$0xff]  }
 0xa8e   : > { %v3901_v17 = vmul.f32 %v9023_v13, %v9023_v13 }
 0xade   : > { %v7395_v11 = vpop.permute.xlu1 %7394 }
 0xadf   : > { %v7397_v31 = vunpack.i.h.bf16 %v7395_v11  ;;  %v7396_v46 = vunpack.i.l.bf16 %v7395_v11  ;;  %v7555_v11 = vld [vmem:[%s9852_s14 + $0x50] ss:$8 sps:$4 sm:$0xff]  }
 0xae1   : > { %v3353_v36 = vsel %vm2846_vm8, %v8873_v35, %v7397_v31  ;;  %v3352_v38 = vsel %vm2846_vm8, %v8871_v12, %v7396_v46  ;;  %v7540_v35 = vld [vmem:[%s9852_s14] ss:$8 sps:$4 sm:$0xff]   ;;  %v7542_v12 = vld [vmem:[%s9852_s14 + $0x4] ss:$8 sps:$4 sm:$0xff]   ;;  %v7563_v46 = vld [vmem:[%s9852_s14 + $0x74] ss:$8 sps:$4 sm:$0xff]  }
 0xae2   : > { %3599 = vmatprep.subr.bf16.mxu1 %v7542_v12  ;;  %v7558_v31 = vld [vmem:[%s9852_s14 + $0x60] ss:$8 sps:$4 sm:$0xff]  }
 0xae3   : > { %3600 = vmatpush1.bf16.msra.mxu1 %v7540_v35  ;;  %v7598_v35 = vld [vmem:[%s9853_s15 + $0x68] sm:$0xff]  }
 0xae4   : > { %3601 = vmatprep.subr.bf16.mxu1 %v7545_v7  ;;  %v7599_v12 = vld [vmem:[%s9853_s15 + $0x28] sm:$0xff]  }
 0xae6   : > { %v7400_v30 = vpop.permute.xlu0 %7399 }
 0xae7   : > { %v7402_v26 = vunpack.i.h.bf16 %v7400_v30  ;;  %v7401_v32 = vunpack.i.l.bf16 %v7400_v30  ;;  %3602 = vmatpush1.bf16.msra.mxu1 %v7543_v44  ;;  %v7560_v30 = vld [vmem:[%s9852_s14 + $0x64] ss:$8 sps:$4 sm:$0xff]  }
 0xae8   : > { %3603 = vmatprep.subr.bf16.mxu1 %v7548_v60 }
 0xae9   : > { %v3355_v39 = vsel %vm2142_vm3, %v3353_v36, %v7402_v26  ;;  %v3354_v40 = vsel %vm2142_vm3, %v3352_v38, %v7401_v32  ;;  %v7561_v26 = vld [vmem:[%s9852_s14 + $0x70] ss:$8 sps:$4 sm:$0xff]   ;;  %v7589_v36 = vld [vmem:[%s9853_s15] sm:$0xff]   ;;  %v7590_v38 = vld [vmem:[%s9853_s15 + $0x48] sm:$0xff]  }
 0xaea   : > { %v7566_v32 = vld [vmem:[%s9854_s16 + $0x4] ss:$12 sps:$4 sm:$0xff]  }
 0xaeb   : > { %3604 = vmatpush1.bf16.msra.mxu1 %v7546_v45 }
 0xaee   : > { %v7405_v50 = vpop.permute.xlu1 %7404 }
 0xaef   : > { %v7407_v2 = vunpack.i.h.bf16 %v7405_v50  ;;  %v7406_v43 = vunpack.i.l.bf16 %v7405_v50  ;;  %v7588_v50 = vld [vmem:[%s9853_s15 + $0x40] sm:$0xff]  }
 0xaf0   : > { %6772 = vmatprep.subr.bf16.mxu0 %v7588_v50 }
 0xaf1   : > { %v3357_v41 = vsel %vm1552_vm2, %v3355_v39, %v7407_v2  ;;  %v3356_v42 = vsel %vm1552_vm2, %v3354_v40, %v7406_v43  ;;  %v7591_v2 = vld [vmem:[%s9853_s15 + $0x8] sm:$0xff]   ;;  %v7592_v43 = vld [vmem:[%s9853_s15 + $0x50] sm:$0xff]   ;;  %v7594_v40 = vld [vmem:[%s9853_s15 + $0x58] sm:$0xff]  }
 0xaf2   : > { %v3358_v47 = vpack.c.bf16 %v3357_v41, %v3356_v42  ;;  %v7593_v39 = vld [vmem:[%s9853_s15 + $0x10] sm:$0xff]   ;;  %v7595_v41 = vld [vmem:[%s9853_s15 + $0x18] sm:$0xff]   ;;  %v7596_v42 = vld [vmem:[%s9853_s15 + $0x60] sm:$0xff]  }
 0xaf4   : > { %7132 = vmatmul.mubr.bf16.vlgmr.msra.gmra.mrb[116].mxu0 %v3358_v47  ;;  %v7597_v47 = vld [vmem:[%s9853_s15 + $0x20] sm:$0xff]  }
 0xaf5   : > { %6773 = vmatpush3.bf16.msra.mxu0 %v7589_v36 }
 0xaf6   : > { %6774 = vmatprep.subr.bf16.mxu0 %v7590_v38 }
 0xaf9   : > { %6775 = vmatpush3.bf16.msra.mxu0 %v7591_v2 }
 0xafa   : > { %6776 = vmatprep.subr.bf16.mxu0 %v7592_v43 }
 0xafd   : > { %6777 = vmatpush3.bf16.msra.mxu0 %v7593_v39 }
 0xafe   : > { %6778 = vmatprep.subr.bf16.mxu0 %v7594_v40 }
 0xb01   : > { %6779 = vmatpush3.bf16.msra.mxu0 %v7595_v41 }
 0xb02   : > { %6780 = vmatprep.subr.bf16.mxu0 %v7596_v42 }
 0xb05   : > { %6781 = vmatpush3.bf16.msra.mxu0 %v7597_v47  ;;  %v7604_v47 = vld [vmem:[%s9854_s16 + $0x8] ss:$12 sps:$4 sm:$0xff]  }
 0xb06   : > { %6782 = vmatprep.subr.bf16.mxu0 %v7598_v35  ;;  %v7605_v35 = vld [vmem:[%s9854_s16 + $0x20] ss:$12 sps:$4 sm:$0xff]  }
 0xb09   : > { %6783 = vmatpush3.bf16.msra.mxu0 %v7599_v12  ;;  %v7606_v12 = vld [vmem:[%s9854_s16 + $0x38] ss:$12 sps:$4 sm:$0xff]  }
 0xbc7   : > { %v3441_v5 = vpop.f32.mrb[116].mxu0 }
 0xbc8   : > { %v9021_v15 = vadd.f32 %v3441_v5, %v8726_v53  ;;  %v7133_v9 = vpop.f32.mrb[117].mxu0  ;;  %v7551_v53 = vld [vmem:[%s9852_s14 + $0x34] ss:$8 sps:$4 sm:$0xff]   ;;  %v7578_v5 = vld [vmem:[%s9854_s16 + $0x64] ss:$12 sps:$4 sm:$0xff]  }
 0xbc9   : > { %v3444_v57 = vpop.f32.mrb[118].mxu0  ;;  %3605 = vmatprep.subr.bf16.mxu1 %v7551_v53  ;;  %v7576_v9 = vld [vmem:[%s9854_s16 + $0x60] ss:$12 sps:$4 sm:$0xff]  }
 0xbca   : > { %v9026_v16 = vadd.f32 %v3444_v57, %v8731_v55  ;;  %v7134_v18 = vpop.f32.mrb[119].mxu0  ;;  %v3498_v28 = vmul.f32 %v9021_v15, %v9021_v15  ;;  %v7549_v55 = vld [vmem:[%s9852_s14 + $0x30] ss:$8 sps:$4 sm:$0xff]   ;;  %v7581_v57 = vld [vmem:[%s9854_s16 + $0x7c] ss:$12 sps:$4 sm:$0xff]  }
 0xbcb   : > { %3606 = vmatpush1.bf16.msra.mxu1 %v7549_v55  ;;  %v3910_v18 = vsub.s32 2, %v8779_v22 }
 0xbcc   : > { %3500 = vadd.xlane.f32.xlu0 %v3498_v28  ;;  %v3499_v21 = vmul.f32 %v9026_v16, %v9026_v16  ;;  %3607 = vmatprep.subr.bf16.mxu1 %v7554_v27  ;;  %v7582_v27 = vld [vmem:[%s9854_s16 + $0x90] ss:$12 sps:$4 sm:$0xff]  }
 0xbcd   : > { %v3911_v55 = vrot.slane %v8785_v6, %v3910_v18  ;;  %v7600_v6 = vld [vmem:[%s9853_s15 + $0x70] sm:$0xff]  }
 0xbce   : > { %3502 = vadd.xlane.f32.xlu1 %v3499_v21  ;;  %v7579_v21 = vld [vmem:[%s9854_s16 + $0x78] ss:$12 sps:$4 sm:$0xff]   ;;  %6784 = vmatprep.subr.bf16.mxu0 %v7600_v6 }
 0xbcf   : > { %3608 = vmatpush1.bf16.msra.mxu1 %v7552_v29  ;;  %v7587_v29 = vld [vmem:[%s9854_s16 + $0xac] ss:$12 sps:$4 sm:$0xff]  }
 0xbd0   : > { %3902 = vadd.xlane.f32.xlu0 %v3901_v17  ;;  %3609 = vmatprep.subr.bf16.mxu1 %v7557_v34  ;;  %v7584_v17 = vld [vmem:[%s9854_s16 + $0x94] ss:$12 sps:$4 sm:$0xff]  }
 0xbd3   : > { %3610 = vmatpush1.bf16.msra.mxu1 %v7555_v11  ;;  %v7585_v11 = vld [vmem:[%s9854_s16 + $0xa8] ss:$12 sps:$4 sm:$0xff]  }
 0xbd4   : > { %3611 = vmatprep.subr.bf16.mxu1 %v7560_v30 }
 0xbd7   : > { %3612 = vmatpush1.bf16.msra.mxu1 %v7558_v31  ;;  %v7601_v31 = vld [vmem:[%s9853_s15 + $0x30] sm:$0xff]  }
 0xbd8   : > { %3613 = vmatprep.subr.bf16.mxu1 %v7563_v46  ;;  %6785 = vmatpush3.bf16.msra.mxu0 %v7601_v31  ;;  %v7602_v46 = vld [vmem:[%s9853_s15 + $0x78] sm:$0xff]  }
 0xbd9   : > { %6786 = vmatprep.subr.bf16.mxu0 %v7602_v46 }
 0xbdb   : > { %3614 = vmatpush1.bf16.msra.mxu1 %v7561_v26  ;;  %v7603_v26 = vld [vmem:[%s9853_s15 + $0x38] sm:$0xff]  }
 0xbdc   : > { %4042 = vmatprep.subr.bf16.mxu1 %v7566_v32  ;;  %6787 = vmatpush3.bf16.msra.mxu0 %v7603_v26 }
 0xbdd   : > { %7135 = vmatprep.subr.bf16.mxu0 %v7946_v33 }
 0xc59   : > { %v3501_v7 = vpop.xlane.xlu0 %3500 }
 0xc5a   : > { %v3504_v44 = vmul.f32 0.0078125, %v3501_v7  ;;  %v7607_v7 = vld [vmem:[%s9854_s16 + $0x50] ss:$12 sps:$4 sm:$0xff]  }
 0xc5b   : > { %v3503_v60 = vpop.xlane.xlu1 %3502 }
 0xc5c   : > { %v3506_v45 = vadd.f32 1e-06, %v3504_v44  ;;  %v3505_v48 = vmul.f32 0.0078125, %v3503_v60  ;;  %v7608_v44 = vld [vmem:[%s9854_s16 + $0x68] ss:$12 sps:$4 sm:$0xff]  }
 0xc5d   : > { %v3903_v19 = vpop.xlane.xlu0 %3902  ;;  %v7609_v60 = vld [vmem:[%s9854_s16 + $0x80] ss:$12 sps:$4 sm:$0xff]  }
 0xc5e   : > { %7768 = vrsqrt.f32 %v3506_v45  ;;  %v3507_v23 = vadd.f32 1e-06, %v3505_v48  ;;  %v3904_v63 = vmul.f32 0.0078125, %v3903_v19  ;;  %v7610_v45 = vld [vmem:[%s9854_s16 + $0x98] ss:$12 sps:$4 sm:$0xff]  }
 0xc60   : > { %7770 = vrsqrt.f32 %v3507_v23  ;;  %v3905_v25 = vadd.f32 1e-06, %v3904_v63 }
 0xc62   : > { %7772 = vrsqrt.f32 %v3905_v25 }
 0xc68   : > { %v7769_v51 = vpop.eup %7768 }
 0xc69   : > { %v3510_v52 = vmul.f32 %v7769_v51, %v9021_v15  ;;  %v7611_v51 = vld [vmem:[%s9854_s16 + $0xb0] ss:$12 sps:$4 sm:$0xff]  }
 0xc6a   : > { %v7771_v8 = vpop.eup %7770 }
 0xc6b   : > { %v3511_v56 = vmul.f32 %v7771_v8, %v9026_v16  ;;  %v3516_v58 = vmul.f32 %v3515_v24, %v3510_v52 }
 0xc6c   : > { %v7773_v28 = vpop.eup %7772 }
 0xc6d   : > { %v3517_v20 = vmul.f32 %v3515_v24, %v3511_v56  ;;  %v3907_v53 = vmul.f32 %v7773_v28, %v9023_v13 }
 0xc6f   : > { %v3518_v59 = vpack.c.bf16 %v3517_v20, %v3516_v58  ;;  %v3912_v34 = vmul.f32 %v3911_v55, %v3907_v53 }
 0xc71   : > { %3632 = vmatmul.mubr.bf16.vlgmr.msra.gmra.mrb[144].mxu1 %v3518_v59  ;;  %v3913_v30 = vpack.c.bf16 %v3912_v34, %v3912_v34 }
 0xc72   : > { %4043 = vmatpush1.bf16.msra.mxu1 %v7564_v61  ;;  %4074 = vmatprep.mubr.bf16.mxu1 %v7945_v4 }
 0xc73   : > { %4044 = vmatprep.subr.bf16.mxu1 %v7569_v62 }
 0xc76   : > { %4045 = vmatpush1.bf16.msra.mxu1 %v7567_v14 }
 0xc77   : > { %4046 = vmatprep.subr.bf16.mxu1 %v7572_v1 }
 0xc7a   : > { %4047 = vmatpush1.bf16.msra.mxu1 %v7570_v3 }
 0xc7b   : > { %4048 = vmatprep.subr.bf16.mxu1 %v7575_v10 }
 0xc7e   : > { %4049 = vmatpush1.bf16.msra.mxu1 %v7573_v54 }
 0xc7f   : > { %4050 = vmatprep.subr.bf16.mxu1 %v7578_v5 }
 0xc82   : > { %4051 = vmatpush1.bf16.msra.mxu1 %v7576_v9 }
 0xc83   : > { %4052 = vmatprep.subr.bf16.mxu1 %v7581_v57  ;;  %v9235_v57 = vand.u32 127, %v2549_v37 }
 0xc85   : > { %vm2553_vm0 = vcmp.ge.s32.totalorder %v8779_v22, %v9235_v57 }
 0xc86   : > { %4053 = vmatpush1.bf16.msra.mxu1 %v7579_v21 }
 0xc87   : > { %4054 = vmatprep.subr.bf16.mxu1 %v7584_v17  ;;  %v7951_v17 = vmov -1e+09  }
 0xc88   : > { %v2554_v53 = vsel %vm2553_vm0, 0.0, %v7951_v17 }
 0xc8a   : > { %4055 = vmatpush1.bf16.msra.mxu1 %v7582_v27 }
 0xc8b   : > { %4056 = vmatprep.subr.bf16.mxu1 %v7587_v29 }
 0xc8e   : > { %4057 = vmatpush1.bf16.msra.mxu1 %v7585_v11 }
 0xc8f   : > { %7155 = vmatprep.subr.bf16.mxu1 %v7946_v33 }
 0xc91   : > { %4075 = vmatmul.mubr.bf16.vlgmr.msra.gmra.mrb[148].mxu1 %v3913_v30 }
 0xc92   : > { %7157 = vmatprep.mubr.msk.bf16.mxu1 %vm7947_vm7, %v7946_v33 }
 0xd44   : > { %v3633_v32 = vpop.f32.mrb[144].mxu1 }
 0xd45   : > { %v3635_v50 = vpop.f32.mrb[145].mxu1  ;;  %v3642_v38 = vmax.f32 %v3633_v32, 0.0 }
 0xd46   : > { %v3637_v36 = vpop.f32.mrb[146].mxu1  ;;  %v3643_v39 = vmax.f32 %v3635_v50, 0.0 }
 0xd47   : > { %v3644_v2 = vmax.f32 %v3637_v36, 0.0  ;;  %v3639_v43 = vpop.f32.mrb[147].mxu1 }
 0xd48   : > { %v3645_v40 = vmax.f32 %v3639_v43, 0.0 }
 0xd49   : > { %v3646_v41 = vpack.c.bf16 %v3644_v2, %v3642_v38 }
 0xd4a   : > { %v3647_v42 = vpack.c.bf16 %v3645_v40, %v3643_v39 }
 0xd4c   : > { %3776 = vmatprep.mubr.bf16.mxu0 %v3647_v42 }
 0xd4d   : > { %3777 = vmatmul.mubr.bf16.vlgmr.msra.gmra.mrb[120].mxu0 %v3646_v41 }
 0xd4e   : > { %7136 = vmatpush3.bf16.msra.mxu0 %v7604_v47  ;;  %7151 = vmatprep.mubr.msk.bf16.mxu0 %vm7947_vm7, %v7946_v33 }
 0xd4f   : > { %7137 = vmatprep.subr.bf16.mxu0 %v7946_v33 }
 0xd52   : > { %7138 = vmatpush3.bf16.msra.mxu0 %v7605_v35 }
 0xd53   : > { %7139 = vmatprep.subr.bf16.mxu0 %v7946_v33 }
 0xd56   : > { %7140 = vmatpush3.bf16.msra.mxu0 %v7606_v12 }
 0xd57   : > { %7141 = vmatprep.subr.bf16.mxu0 %v7946_v33 }
 0xd5a   : > { %7142 = vmatpush3.bf16.msra.mxu0 %v7607_v7 }
 0xd5b   : > { %7143 = vmatprep.subr.bf16.mxu0 %v7946_v33 }
 0xd5e   : > { %7144 = vmatpush3.bf16.msra.mxu0 %v7608_v44 }
 0xd5f   : > { %7145 = vmatprep.subr.bf16.mxu0 %v7946_v33 }
 0xd62   : > { %7146 = vmatpush3.bf16.msra.mxu0 %v7609_v60 }
 0xd63   : > { %7147 = vmatprep.subr.bf16.mxu0 %v7946_v33 }
 0xd64   : > { %v4076_v48 = vpop.f32.mrb[148].mxu1 }
 0xd65   : > { %v4078_v23 = vpop.f32.mrb[149].mxu1  ;;  %v4123_v56 = vpack.c.bf16 %v4076_v48, %v4076_v48 }
 0xd66   : > { %v4124_v49 = vpack.c.bf16 %v4078_v23, %v4078_v23  ;;  %7148 = vmatpush3.bf16.msra.mxu0 %v7610_v45  ;;  %v4080_v52 = vpop.f32.mrb[150].mxu1 }
 0xd67   : > { %7149 = vmatprep.subr.bf16.mxu0 %v7946_v33  ;;  %v4081_v24 = vpop.f32.mrb[151].mxu1 }
 0xd68   : > { %v4130_v8 = vsel %vm2846_vm8, %v4124_v49, 0  ;;  %4235 = vrot.lane.b32.xlu1 %v4124_v49, %s9936_s7 }
 0xd69   : > { %7156 = vmatpush3.bf16.xpose.msra.mxu1 %v4130_v8 }
 0xd6a   : > { %7150 = vmatpush3.bf16.msra.mxu0 %v7611_v51  ;;  %7161 = vmatprep.subr.bf16.mxu1 %v7946_v33 }
 0xd6b   : > { %7179 = vmatprep.subr.bf16.mxu0 %v7946_v33 }
 0xd6c   : > { %4346 = vrot.lane.b32.xlu1 %v4124_v49, %s9937_s2 }
 0xd6d   : > { %7152 = vmatmul.mubr.bf16.vlgmr.msra.gmra.mrb[124].mxu0 %v3913_v30 }
 0xd6e   : > { %7181 = vmatprep.mubr.msk.bf16.mxu0 %vm7947_vm7, %v7946_v33 }
 0xd70   : > { %7158 = vmatmul.mubr.msk.bf16.vlgmr.msra.gmra.mrb[152].mxu1 %vm2846_vm8, %v4123_v56  ;;  %4344 = vrot.lane.b32.xlu1 %v4123_v56, %s9937_s2 }
 0xd71   : > { %7163 = vmatprep.mubr.msk.bf16.mxu1 %vm7947_vm7, %v7946_v33 }
 0xd74   : > { %4456 = vrot.lane.b32.xlu1 %v4124_v49, %s9938_s28 }
 0xdda   : > { %v9217_v58 = vpop.permute.xlu1 %4235 }
 0xddb   : > { %v4241_v7 = vsel %vm2846_vm8, %v9217_v58, 0 }
 0xdde   : > { %v4347_v20 = vpop.permute.xlu1 %4346 }
 0xddf   : > { %v4352_v19 = vsel %vm2846_vm8, %v4347_v20, 0 }
 0xde0   : > { %7180 = vmatpush3.bf16.xpose.msra.mxu0 %v4352_v19 }
 0xde1   : > { %7191 = vmatprep.subr.bf16.mxu0 %v7946_v33 }
 0xde2   : > { %v4345_v61 = vpop.permute.xlu1 %4344 }
 0xde6   : > { %v4457_v59 = vpop.permute.xlu1 %4456 }
 0xde7   : > { %7182 = vmatmul.mubr.msk.bf16.vlgmr.msra.gmra.mrb[128].mxu0 %vm2846_vm8, %v4345_v61  ;;  %v4462_v62 = vsel %vm2846_vm8, %v4457_v59, 0 }
 0xde8   : > { %7192 = vmatpush3.bf16.xpose.msra.mxu0 %v4462_v62  ;;  %7193 = vmatprep.mubr.msk.bf16.mxu0 %vm7947_vm7, %v7946_v33 }
 0xde9   : > { %7203 = vmatprep.subr.bf16.mxu0 %v7946_v33 }
 0xe20   : > { %v6788_v63 = vpop.f32.mrb[120].mxu0 }
 0xe21   : > { %v6789_v14 = vpop.f32.mrb[121].mxu0 }
 0xe22   : > { %v6790_v1 = vadd.f32 %v6789_v14, %v6788_v63  ;;  %v6791_v25 = vpop.f32.mrb[122].mxu0 }
 0xe23   : > { %v6792_v3 = vpop.f32.mrb[123].mxu0 }
 0xe24   : > { %v6793_v10 = vadd.f32 %v6792_v3, %v6791_v25  ;;  %v9227_v54 = vadd.f32 %v6790_v1, %v9021_v15 }
 0xe26   : > { %v9230_v5 = vadd.f32 %v6793_v10, %v9026_v16 }
 0xe28   : > { %v4818_v9 = vpack.c.bf16 %v9230_v5, %v9227_v54  ;;  %v7646_v54 = vld [vmem:[%s9856_s18 + $0x10] sm:$0xff]   ;;  %v7647_v5 = vld [vmem:[%s9856_s18 + $0x18] sm:$0xff]  }
 0xe40   : > { %v4117_v18 = vpop.f32.mrb[124].mxu0 }
 0xe41   : > { %v9239_v28 = vpack.c.bf16 %v4117_v18, %v4117_v18  ;;  %v7153_v21 = vpop.f32.mrb[125].mxu0 }
 0xe42   : > { %v4120_v15 = vpop.f32.mrb[126].mxu0 }
 0xe43   : > { %v7154_v55 = vpop.f32.mrb[127].mxu0  ;;  %v4166_v27 = vpop.f32.mrb[152].mxu1  ;;  %v4189_v16 = vsel %vm3845_vm12, %v9239_v28, 0 }
 0xe44   : > { %v4167_v29 = vadd.f32 %v4166_v27, %v2554_v53  ;;  %7162 = vmatpush3.bf16.msra.mxu1 %v4189_v16  ;;  %v7159_v37 = vpop.f32.mrb[153].mxu1 }
 0xe45   : > { %v4169_v34 = vpop.f32.mrb[154].mxu1  ;;  %7167 = vmatprep.subr.bf16.mxu1 %v7946_v33 }
 0xe46   : > { %v4173_v11 = vsel %vm4172_vm1, %v4167_v29, -inf  ;;  %v7160_v30 = vpop.f32.mrb[155].mxu1 }
 0xe47   : > { %4174 = vmax.xlane.f32.xlu0 %v4173_v11 }
 0xeba   : > { %v4388_v6 = vpop.f32.mrb[128].mxu0 }
 0xebb   : > { %v7183_v31 = vpop.f32.mrb[129].mxu0  ;;  %v4389_v43 = vadd.f32 %v4388_v6, %v2554_v53 }
 0xebc   : > { %v4391_v46 = vpop.f32.mrb[130].mxu0 }
 0xebd   : > { %v7184_v26 = vpop.f32.mrb[131].mxu0  ;;  %v4394_v39 = vsel %vm4172_vm1, %v4389_v43, -inf }
 0xed4   : > { %v4175_v32 = vpop.xlane.xlu0 %4174 }
 0xed5   : > { %v4176_v50 = vsub.f32 %v4167_v29, %v4175_v32 }
 0xed7   : > { %v4177_v36 = vmul.f32 1.442695, %v4176_v50 }
 0xed9   : > { %7774 = vpow2.f32 %v4177_v36 }
 0xee3   : > { %v7775_v38 = vpop.eup %7774 }
 0xee4   : > { %v4179_v2 = vsel %vm4172_vm1, %v7775_v38, 0.0 }
 0xee5   : > { %4180 = vadd.xlane.f32.xlu0 %v4179_v2 }
 0xefb   : > { %4232 = vrot.lane.b32.xlu0 %v4123_v56, %s9936_s7 }
 0xeff   : > { %4454 = vrot.lane.b32.xlu0 %v4123_v56, %s9938_s28 }
 0xf1e   : > { %4395 = vmax.xlane.f32.xlu0 %v4394_v39 }
 0xf72   : > { %v4181_v40 = vpop.xlane.xlu0 %4180 }
 0xf73   : > { %7776 = vrcp.f32 %v4181_v40 }
 0xf76   : > { %v4233_v41 = vpop.permute.xlu0 %4232 }
 0xf7a   : > { %v4455_v42 = vpop.permute.xlu0 %4454 }
 0xf7b   : > { %7194 = vmatmul.mubr.msk.bf16.vlgmr.msra.gmra.mrb[132].mxu0 %vm2846_vm8, %v4455_v42  ;;  %v7613_v42 = vld [vmem:[%s9855_s17 + $0x8] sm:$0xff]  }
 0xf7c   : > { %7219 = vmatprep.mubr.msk.bf16.mxu0 %vm7947_vm7, %v7946_v33 }
 0xf7d   : > { %v7777_v47 = vpop.eup %7776 }
 0xf7e   : > { %v4183_v35 = vmul.f32 %v7777_v47, %v7775_v38  ;;  %v7614_v47 = vld [vmem:[%s9855_s17 + $0x10] sm:$0xff]  }
 0xf80   : > { %v4184_v12 = vpack.c.bf16 %v4183_v35, %v4183_v35  ;;  %v7615_v35 = vld [vmem:[%s9855_s17 + $0x18] sm:$0xff]  }
 0xf82   : > { %7164 = vmatmul.mubr.msk.bf16.vlgmr.msra.gmra.mrb[156].mxu1 %vm4172_vm1, %v4184_v12  ;;  %v7616_v12 = vld [vmem:[%s9855_s17 + $0x20] sm:$0xff]  }
 0xf83   : > { %7168 = vmatpush3.bf16.xpose.msra.mxu1 %v4241_v7  ;;  %7169 = vmatprep.mubr.msk.bf16.mxu1 %vm7947_vm7, %v7946_v33  ;;  %v7617_v7 = vld [vmem:[%s9855_s17 + $0x28] sm:$0xff]  }
 0xf84   : > { %7173 = vmatprep.subr.bf16.mxu1 %v7946_v33 }
 0xf8a   : > { %7170 = vmatmul.mubr.msk.bf16.vlgmr.msra.gmra.mrb[160].mxu1 %vm2846_vm8, %v4233_v41  ;;  %v7612_v41 = vld [vmem:[%s9855_s17] sm:$0xff]  }
 0xf8b   : > { %7175 = vmatprep.mubr.msk.bf16.mxu1 %vm7947_vm7, %v7946_v33  ;;  %7204 = vmatpush3.bf16.msra.mxu0 %v7612_v41 }
 0xf8c   : > { %7205 = vmatprep.subr.bf16.mxu0 %v7946_v33 }
 0xf8f   : > { %7206 = vmatpush3.bf16.msra.mxu0 %v7613_v42 }
 0xf90   : > { %7207 = vmatprep.subr.bf16.mxu0 %v7946_v33 }
 0xf93   : > { %7208 = vmatpush3.bf16.msra.mxu0 %v7614_v47 }
 0xf94   : > { %7209 = vmatprep.subr.bf16.mxu0 %v7946_v33 }
 0xf97   : > { %7210 = vmatpush3.bf16.msra.mxu0 %v7615_v35 }
 0xf98   : > { %7211 = vmatprep.subr.bf16.mxu0 %v7946_v33 }
 0xf9b   : > { %7212 = vmatpush3.bf16.msra.mxu0 %v7616_v12 }
 0xf9c   : > { %7213 = vmatprep.subr.bf16.mxu0 %v7946_v33 }
 0xf9f   : > { %7214 = vmatpush3.bf16.msra.mxu0 %v7617_v7 }
 0xfa0   : > { %7215 = vmatprep.subr.bf16.mxu0 %v7946_v33 }
 0xfab   : > { %v4396_v44 = vpop.xlane.xlu0 %4395 }
 0xfac   : > { %v4397_v45 = vsub.f32 %v4389_v43, %v4396_v44  ;;  %v7618_v44 = vld [vmem:[%s9855_s17 + $0x30] sm:$0xff]  }
 0xfad   : > { %7216 = vmatpush3.bf16.msra.mxu0 %v7618_v44 }
 0xfae   : > { %v4398_v24 = vmul.f32 1.442695, %v4397_v45  ;;  %7217 = vmatprep.subr.bf16.mxu0 %v7946_v33 }
 0xfb0   : > { %7778 = vpow2.f32 %v4398_v24 }
 0xfba   : > { %v7779_v1 = vpop.eup %7778 }
 0xfbb   : > { %v4400_v25 = vsel %vm4172_vm1, %v7779_v1, 0.0 }
0x104e   : > { %v4498_v60 = vpop.f32.mrb[132].mxu0 }
0x104f   : > { %v4499_v48 = vadd.f32 %v4498_v60, %v2554_v53  ;;  %v7195_v23 = vpop.f32.mrb[133].mxu0  ;;  %v7619_v60 = vld [vmem:[%s9855_s17 + $0x38] sm:$0xff]  }
0x1050   : > { %v4501_v49 = vpop.f32.mrb[134].mxu0  ;;  %7218 = vmatpush3.bf16.msra.mxu0 %v7619_v60  ;;  %v4726_v60 = vsub.s32 3, %v8779_v22 }
0x1051   : > { %v7196_v51 = vpop.f32.mrb[135].mxu0  ;;  %v4504_v52 = vsel %vm4172_vm1, %v4499_v48, -inf }
0x1052   : > { %4505 = vmax.xlane.f32.xlu0 %v4504_v52  ;;  %v7622_v51 = vld [vmem:[%s9857_s19 + $0x4] ss:$8 sps:$4 sm:$0xff]  }
0x1053   : > { %4899 = vmatprep.subr.bf16.mxu0 %v7622_v51 }
0x1055   : > { %v9262_v8 = vpop.f32.mrb[156].mxu1 }
0x1056   : > { %v7165_v56 = vpop.f32.mrb[157].mxu1 }
0x1057   : > { %v4228_v58 = vpop.f32.mrb[158].mxu1 }
0x1058   : > { %v7166_v20 = vpop.f32.mrb[159].mxu1 }
0x105d   : > { %v4277_v19 = vpop.f32.mrb[160].mxu1 }
0x105e   : > { %v4278_v61 = vadd.f32 %v4277_v19, %v2554_v53  ;;  %v7171_v59 = vpop.f32.mrb[161].mxu1 }
0x105f   : > { %v4280_v62 = vpop.f32.mrb[162].mxu1 }
0x1060   : > { %v7172_v63 = vpop.f32.mrb[163].mxu1  ;;  %v4283_v14 = vsel %vm4172_vm1, %v4278_v61, -inf }
0x1061   : > { %4284 = vmax.xlane.f32.xlu1 %v4283_v14 }
0x1065   : > { %4401 = vadd.xlane.f32.xlu1 %v4400_v25 }
0x1076   : > { %4296 = vrot.lane.b32.xlu1 %v9239_v28, %s9936_s7 }
0x107a   : > { %4516 = vrot.lane.b32.xlu1 %v9239_v28, %s9938_s28 }
0x10df   : > { %v4506_v3 = vpop.xlane.xlu0 %4505 }
0x10e0   : > { %v4507_v10 = vsub.f32 %v4499_v48, %v4506_v3 }
0x10e2   : > { %v4508_v17 = vmul.f32 1.442695, %v4507_v10  ;;  %v7620_v10 = vld [vmem:[%s9857_s19] ss:$8 sps:$4 sm:$0xff]  }
0x10ee   : > { %v4285_v18 = vpop.xlane.xlu1 %4284 }
0x10ef   : > { %v4286_v21 = vsub.f32 %v4278_v61, %v4285_v18 }
0x10f1   : > { %v4287_v53 = vmul.f32 1.442695, %v4286_v21  ;;  %v7625_v21 = vld [vmem:[%s9857_s19 + $0x14] ss:$8 sps:$4 sm:$0xff]  }
0x10f2   : > { %v4402_v15 = vpop.xlane.xlu1 %4401 }
0x10f3   : > { %7780 = vpow2.f32 %v4287_v53  ;;  %v7626_v53 = vld [vmem:[%s9857_s19 + $0x20] ss:$8 sps:$4 sm:$0xff]  }
0x10f4   : > { %7782 = vpow2.f32 %v4508_v17  ;;  %v7628_v17 = vld [vmem:[%s9857_s19 + $0x24] ss:$8 sps:$4 sm:$0xff]  }
0x10f6   : > { %v4297_v55 = vpop.permute.xlu1 %4296 }
0x10f7   : > { %v4302_v27 = vsel %vm3845_vm12, %v4297_v55, 0  ;;  %v7629_v55 = vld [vmem:[%s9857_s19 + $0x30] ss:$8 sps:$4 sm:$0xff]  }
0x10f8   : > { %7174 = vmatpush3.bf16.msra.mxu1 %v4302_v27  ;;  %v7634_v27 = vld [vmem:[%s9857_s19 + $0x44] ss:$8 sps:$4 sm:$0xff]  }
0x10f9   : > { %7185 = vmatprep.subr.bf16.mxu1 %v7946_v33 }
0x10fd   : > { %v7781_v16 = vpop.eup %7780 }
0x10fe   : > { %v4289_v29 = vsel %vm4172_vm1, %v7781_v16, 0.0  ;;  %v7783_v37 = vpop.eup %7782 }
0x10ff   : > { %4290 = vadd.xlane.f32.xlu0 %v4289_v29  ;;  %v4510_v34 = vsel %vm4172_vm1, %v7783_v37, 0.0  ;;  %v7637_v29 = vld [vmem:[%s9857_s19 + $0x54] ss:$8 sps:$4 sm:$0xff]  }
0x1103   : > { %4511 = vadd.xlane.f32.xlu0 %v4510_v34  ;;  %v7640_v34 = vld [vmem:[%s9857_s19 + $0x64] ss:$8 sps:$4 sm:$0xff]  }
0x1119   : > { %4406 = vrot.lane.b32.xlu0 %v9239_v28, %s9937_s2  ;;  %v4517_v28 = vpop.permute.xlu1 %4516 }
0x111a   : > { %v4522_v43 = vsel %vm3845_vm12, %v4517_v28, 0 }
0x118c   : > { %v4291_v11 = vpop.xlane.xlu0 %4290 }
0x118d   : > { %7784 = vrcp.f32 %v4291_v11  ;;  %v7638_v11 = vld [vmem:[%s9857_s19 + $0x60] ss:$8 sps:$4 sm:$0xff]  }
0x118e   : > { %7786 = vrcp.f32 %v4402_v15  ;;  %v7631_v15 = vld [vmem:[%s9857_s19 + $0x34] ss:$8 sps:$4 sm:$0xff]  }
0x1190   : > { %v4512_v30 = vpop.xlane.xlu0 %4511 }
0x1191   : > { %7788 = vrcp.f32 %v4512_v30  ;;  %v7643_v30 = vld [vmem:[%s9857_s19 + $0x74] ss:$8 sps:$4 sm:$0xff]  }
0x1194   : > { %v4407_v46 = vpop.permute.xlu0 %4406 }
0x1195   : > { %v4412_v50 = vsel %vm3845_vm12, %v4407_v46, 0  ;;  %v7645_v46 = vld [vmem:[%s9856_s18 + $0x8] sm:$0xff]  }
0x1197   : > { %v7785_v6 = vpop.eup %7784 }
0x1198   : > { %v4293_v31 = vmul.f32 %v7785_v6, %v7781_v16  ;;  %v7787_v32 = vpop.eup %7786  ;;  %v7632_v16 = vld [vmem:[%s9857_s19 + $0x40] ss:$8 sps:$4 sm:$0xff]   ;;  %v7641_v6 = vld [vmem:[%s9857_s19 + $0x70] ss:$8 sps:$4 sm:$0xff]  }
0x1199   : > { %v4404_v36 = vmul.f32 %v7787_v32, %v7779_v1 }
0x119a   : > { %v4294_v26 = vpack.c.bf16 %v4293_v31, %v4293_v31  ;;  %v7644_v31 = vld [vmem:[%s9856_s18] sm:$0xff]  }
0x119b   : > { %v4405_v38 = vpack.c.bf16 %v4404_v36, %v4404_v36  ;;  %v7789_v2 = vpop.eup %7788 }
0x119c   : > { %7176 = vmatmul.mubr.msk.bf16.vlgmr.msra.gmra.mrb[164].mxu1 %vm4172_vm1, %v4294_v26  ;;  %v4514_v39 = vmul.f32 %v7789_v2, %v7783_v37  ;;  %v7635_v37 = vld [vmem:[%s9857_s19 + $0x50] ss:$8 sps:$4 sm:$0xff]   ;;  %v7649_v2 = vld [vmem:[%s9856_s18 + $0x28] sm:$0xff]  }
0x119d   : > { %7186 = vmatpush3.bf16.msra.mxu1 %v4412_v50  ;;  %7187 = vmatprep.mubr.msk.bf16.mxu1 %vm7947_vm7, %v7946_v33 }
0x119e   : > { %7197 = vmatprep.subr.bf16.mxu1 %v7946_v33  ;;  %v4515_v40 = vpack.c.bf16 %v4514_v39, %v4514_v39 }
0x11a4   : > { %7188 = vmatmul.mubr.msk.bf16.vlgmr.msra.gmra.mrb[168].mxu1 %vm4172_vm1, %v4405_v38  ;;  %v7648_v38 = vld [vmem:[%s9856_s18 + $0x20] sm:$0xff]  }
0x11a5   : > { %7198 = vmatpush3.bf16.msra.mxu1 %v4522_v43  ;;  %7199 = vmatprep.mubr.msk.bf16.mxu1 %vm7947_vm7, %v7946_v33  ;;  %v7651_v43 = vld [vmem:[%s9856_s18 + $0x38] sm:$0xff]  }
0x11a6   : > { %7223 = vmatprep.subr.bf16.mxu1 %v7946_v33 }
0x11ac   : > { %7200 = vmatmul.mubr.msk.bf16.vlgmr.msra.gmra.mrb[172].mxu1 %vm4172_vm1, %v4515_v40 }
0x11ad   : > { %7239 = vmatprep.mubr.msk.bf16.mxu1 %vm7947_vm7, %v7946_v33  ;;  %7224 = vmatpush3.bf16.msra.mxu1 %v7644_v31 }
0x11ae   : > { %7225 = vmatprep.subr.bf16.mxu1 %v7946_v33 }
0x11b1   : > { %7226 = vmatpush3.bf16.msra.mxu1 %v7645_v46 }
0x11b2   : > { %7227 = vmatprep.subr.bf16.mxu1 %v7946_v33 }
0x11b5   : > { %7228 = vmatpush3.bf16.msra.mxu1 %v7646_v54 }
0x11b6   : > { %7229 = vmatprep.subr.bf16.mxu1 %v7946_v33 }
0x11b9   : > { %7230 = vmatpush3.bf16.msra.mxu1 %v7647_v5 }
0x11ba   : > { %7231 = vmatprep.subr.bf16.mxu1 %v7946_v33 }
0x11bd   : > { %7232 = vmatpush3.bf16.msra.mxu1 %v7648_v38 }
0x11be   : > { %7233 = vmatprep.subr.bf16.mxu1 %v7946_v33 }
0x11c1   : > { %7234 = vmatpush3.bf16.msra.mxu1 %v7649_v2 }
0x11c2   : > { %7235 = vmatprep.subr.bf16.mxu1 %v7946_v33 }
0x126f   : > { %v4338_v45 = vpop.f32.mrb[164].mxu1 }
0x1270   : > { %4565 = vrot.lane.b32.xlu1 %v4338_v45, %s9938_s28  ;;  %v7177_v48 = vpop.f32.mrb[165].mxu1  ;;  %v9425_v45 = vld [vmem:[%s9849_s11] sm:$0xff] }
0x1271   : > { %v4341_v23 = vpop.f32.mrb[166].mxu1  ;;  %v4727_v48 = vrot.slane %v9425_v45, %v4726_v60 }
0x1272   : > { %v7178_v49 = vpop.f32.mrb[167].mxu1 }
0x1277   : > { %v4448_v52 = vpop.f32.mrb[168].mxu1 }
0x1278   : > { %4569 = vrot.lane.b32.xlu1 %v4448_v52, %s9937_s2  ;;  %v7189_v24 = vpop.f32.mrb[169].mxu1 }
0x1279   : > { %v4451_v56 = vpop.f32.mrb[170].mxu1 }
0x127a   : > { %v7190_v58 = vpop.f32.mrb[171].mxu1 }
0x127f   : > { %v4558_v20 = vpop.f32.mrb[172].mxu1 }
0x1280   : > { %4573 = vrot.lane.b32.xlu0 %v4558_v20, %s9936_s7  ;;  %v7201_v19 = vpop.f32.mrb[173].mxu1 }
0x1281   : > { %v4561_v61 = vpop.f32.mrb[174].mxu1 }
0x1282   : > { %v7202_v59 = vpop.f32.mrb[175].mxu1 }
0x12e2   : > { %v4566_v62 = vpop.permute.xlu1 %4565 }
0x12e3   : > { %v4576_v14 = vsel %vm2846_vm8, %v9262_v8, %v4566_v62  ;;  %v7623_v8 = vld [vmem:[%s9857_s19 + $0x10] ss:$8 sps:$4 sm:$0xff]  }
0x12ea   : > { %v4570_v63 = vpop.permute.xlu1 %4569 }
0x12eb   : > { %v4577_v1 = vsel %vm2142_vm3, %v4576_v14, %v4570_v63 }
0x12f2   : > { %v4574_v25 = vpop.permute.xlu0 %4573 }
0x12f3   : > { %v4578_v3 = vsel %vm1552_vm2, %v4577_v1, %v4574_v25 }
0x12f4   : > { %v4579_v18 = vpack.c.bf16 %v4578_v3, %v4578_v3 }
0x12f6   : > { %7220 = vmatmul.mubr.bf16.vlgmr.msra.gmra.mrb[136].mxu0 %v4579_v18 }
0x12f7   : > { %4900 = vmatpush1.bf16.msra.mxu0 %v7620_v10  ;;  %4931 = vmatprep.mubr.bf16.mxu0 %v7945_v4 }
0x12f8   : > { %4901 = vmatprep.subr.bf16.mxu0 %v7625_v21 }
0x12fb   : > { %4902 = vmatpush1.bf16.msra.mxu0 %v7623_v8 }
0x12fc   : > { %4903 = vmatprep.subr.bf16.mxu0 %v7628_v17 }
0x12ff   : > { %4904 = vmatpush1.bf16.msra.mxu0 %v7626_v53 }
0x1300   : > { %4905 = vmatprep.subr.bf16.mxu0 %v7631_v15 }
0x1303   : > { %4906 = vmatpush1.bf16.msra.mxu0 %v7629_v55 }
0x1304   : > { %4907 = vmatprep.subr.bf16.mxu0 %v7634_v27 }
0x1307   : > { %4908 = vmatpush1.bf16.msra.mxu0 %v7632_v16 }
0x1308   : > { %4909 = vmatprep.subr.bf16.mxu0 %v7637_v29 }
0x130b   : > { %4910 = vmatpush1.bf16.msra.mxu0 %v7635_v37 }
0x130c   : > { %4911 = vmatprep.subr.bf16.mxu0 %v7640_v34 }
0x130f   : > { %4912 = vmatpush1.bf16.msra.mxu0 %v7638_v11 }
0x1310   : > { %4913 = vmatprep.subr.bf16.mxu0 %v7643_v30 }
0x1313   : > { %4914 = vmatpush1.bf16.msra.mxu0 %v7641_v6 }
0x1314   : > { %7267 = vmatprep.subr.bf16.mxu0 %v7946_v33 }
0x1316   : > { %4932 = vmatmul.mubr.bf16.vlgmr.msra.gmra.mrb[140].mxu0 %v4818_v9 }
0x1317   : > { %7269 = vmatprep.mubr.msk.bf16.mxu0 %vm7947_vm7, %v7946_v33 }
0x13c9   : > { %v4662_v9 = vpop.f32.mrb[136].mxu0 }
0x13ca   : > { %v9399_v26 = vadd.f32 %v4662_v9, %v9023_v13  ;;  %v7221_v32 = vpop.f32.mrb[137].mxu0  ;;  %v7650_v13 = vld [vmem:[%s9856_s18 + $0x30] sm:$0xff]  }
0x13cb   : > { %v4665_v50 = vpop.f32.mrb[138].mxu0  ;;  %7236 = vmatpush3.bf16.msra.mxu1 %v7650_v13 }
0x13cc   : > { %v7222_v36 = vpop.f32.mrb[139].mxu0  ;;  %v4717_v28 = vmul.f32 %v9399_v26, %v9399_v26  ;;  %7237 = vmatprep.subr.bf16.mxu1 %v7946_v33 }
0x13ce   : > { %4718 = vadd.xlane.f32.xlu1 %v4717_v28 }
0x13cf   : > { %7238 = vmatpush3.bf16.msra.mxu1 %v7651_v43 }
0x13d0   : > { %7243 = vmatprep.subr.bf16.mxu1 %v7946_v33 }
0x13e9   : > { %v4933_v39 = vpop.f32.mrb[140].mxu0 }
0x13ea   : > { %v4935_v40 = vpop.f32.mrb[141].mxu0 }
0x13eb   : > { %v4937_v41 = vpop.f32.mrb[142].mxu0 }
0x13ec   : > { %v4943_v42 = vpack.c.bf16 %v4937_v41, %v4933_v39  ;;  %v4939_v47 = vpop.f32.mrb[143].mxu0 }
0x13ed   : > { %v9419_v35 = vpack.c.bf16 %v4939_v47, %v4935_v40 }
0x13ee   : > { %v4949_v24 = vsel %vm2846_vm8, %v4943_v42, 0 }
0x145b   : > { %v4719_v12 = vpop.xlane.xlu1 %4718 }
0x145c   : > { %v4720_v7 = vmul.f32 0.0078125, %v4719_v12 }
0x145e   : > { %v4721_v44 = vadd.f32 1e-06, %v4720_v7 }
0x1460   : > { %7790 = vrsqrt.f32 %v4721_v44 }
0x146a   : > { %v7791_v23 = vpop.eup %7790 }
0x146b   : > { %v4723_v49 = vmul.f32 %v7791_v23, %v9399_v26 }
0x146d   : > { %v4728_v51 = vmul.f32 %v4727_v48, %v4723_v49 }
0x146f   : > { %v4729_v52 = vpack.c.bf16 %v4728_v51, %v4728_v51 }
0x1471   : > { %7240 = vmatmul.mubr.bf16.vlgmr.msra.gmra.mrb[176].mxu1 %v4729_v52 }
0x1472   : > { %7244 = vmatpush3.bf16.xpose.msra.mxu1 %v4949_v24  ;;  %7245 = vmatprep.mubr.msk.bf16.mxu1 %vm7947_vm7, %v7946_v33 }
0x1473   : > { %7249 = vmatprep.subr.bf16.mxu1 %v7946_v33 }
0x1544   : > { %v4812_v56 = vpop.f32.mrb[176].mxu1 }
0x1545   : > { %v4942_v58 = vpack.c.bf16 %v4812_v56, %v4812_v56  ;;  %v7241_v20 = vpop.f32.mrb[177].mxu1 }
0x1546   : > { %v4815_v19 = vpop.f32.mrb[178].mxu1 }
0x1547   : > { %5047 = vrot.lane.b32.xlu1 %v4942_v58, %s9936_s7  ;;  %v7242_v61 = vpop.f32.mrb[179].mxu1  ;;  %7246 = vmatmul.mubr.msk.bf16.vlgmr.msra.gmra.mrb[180].mxu1 %vm2846_vm8, %v4942_v58 }
0x1548   : > { %7250 = vmatpush3.bf16.msra.mxu1 %v9419_v35  ;;  %7251 = vmatprep.mubr.msk.bf16.mxu1 %vm7947_vm7, %v7946_v33 }
0x1549   : > { %7255 = vmatprep.subr.bf16.mxu1 %v7946_v33 }
0x154b   : > { %5159 = vrot.lane.b32.xlu1 %v4943_v42, %s9937_s2 }
0x154f   : > { %5157 = vrot.lane.b32.xlu1 %v4942_v58, %s9937_s2 }
0x1553   : > { %5265 = vrot.lane.b32.xlu1 %v4942_v58, %s9938_s28 }
0x15b9   : > { %v5048_v59 = vpop.permute.xlu1 %5047 }
0x15bd   : > { %v5160_v62 = vpop.permute.xlu1 %5159 }
0x15be   : > { %v5165_v63 = vsel %vm2846_vm8, %v5160_v62, 0 }
0x15bf   : > { %7268 = vmatpush3.bf16.xpose.msra.mxu0 %v5165_v63 }
0x15c0   : > { %7279 = vmatprep.subr.bf16.mxu0 %v7946_v33 }
0x15c1   : > { %v5158_v14 = vpop.permute.xlu1 %5157 }
0x15c5   : > { %v5266_v32 = vpop.permute.xlu1 %5265 }
0x15c6   : > { %7270 = vmatmul.mubr.msk.bf16.vlgmr.msra.gmra.mrb[144].mxu0 %vm2846_vm8, %v5158_v14 }
0x15c7   : > { %7281 = vmatprep.mubr.msk.bf16.mxu0 %vm7947_vm7, %v7946_v33 }
0x161a   : > { %v4985_v1 = vpop.f32.mrb[180].mxu1 }
0x161b   : > { %v4986_v25 = vadd.f32 %v4985_v1, %v8839_v0  ;;  %v7247_v3 = vpop.f32.mrb[181].mxu1 }
0x161c   : > { %v4988_v10 = vpop.f32.mrb[182].mxu1 }
0x161d   : > { %v7248_v18 = vpop.f32.mrb[183].mxu1  ;;  %v4991_v21 = vsel %vm2894_vm9, %v4986_v25, -inf }
0x161e   : > { %4992 = vmax.xlane.f32.xlu0 %v4991_v21 }
0x1699   : > { %v5201_v8 = vpop.f32.mrb[144].mxu0 }
0x169a   : > { %v5202_v17 = vadd.f32 %v5201_v8, %v8839_v0  ;;  %v7271_v53 = vpop.f32.mrb[145].mxu0 }
0x169b   : > { %v5204_v15 = vpop.f32.mrb[146].mxu0 }
0x169c   : > { %v7272_v55 = vpop.f32.mrb[147].mxu0  ;;  %v5207_v27 = vsel %vm2894_vm9, %v5202_v17, -inf }
0x169d   : > { %5208 = vmax.xlane.f32.xlu1 %v5207_v27 }
0x16ab   : > { %v4993_v16 = vpop.xlane.xlu0 %4992 }
0x16ac   : > { %v4994_v29 = vsub.f32 %v4986_v25, %v4993_v16 }
0x16ae   : > { %v4995_v37 = vmul.f32 1.442695, %v4994_v29 }
0x16b0   : > { %7792 = vpow2.f32 %v4995_v37  ;;  %v7652_v37 = vld [vmem:[%s9939_s4] sm:$0xff]  }
0x16ba   : > { %v7793_v34 = vpop.eup %7792 }
0x16bb   : > { %v4997_v11 = vsel %vm2894_vm9, %v7793_v34, 0.0 }
0x16bc   : > { %4998 = vadd.xlane.f32.xlu0 %v4997_v11  ;;  %v7654_v11 = vld [vmem:[%s9939_s4 + $0x10] sm:$0xff]  }
0x16d2   : > { %5050 = vrot.lane.b32.xlu0 %v4943_v42, %s9936_s7 }
0x16d6   : > { %5267 = vrot.lane.b32.xlu0 %v4943_v42, %s9938_s28 }
0x172a   : > { %v5209_v36 = vpop.xlane.xlu1 %5208 }
0x172b   : > { %v5210_v28 = vsub.f32 %v5202_v17, %v5209_v36 }
0x172d   : > { %v5211_v43 = vmul.f32 1.442695, %v5210_v28 }
0x1749   : > { %v4999_v30 = vpop.xlane.xlu0 %4998 }
0x174a   : > { %7794 = vrcp.f32 %v4999_v30  ;;  %v7655_v30 = vld [vmem:[%s9939_s4 + $0x18] sm:$0xff]  }
0x174b   : > { %7796 = vpow2.f32 %v5211_v43 }
0x174d   : > { %v5051_v6 = vpop.permute.xlu0 %5050 }
0x174e   : > { %v5056_v50 = vsel %vm2846_vm8, %v5051_v6, 0  ;;  %v7656_v6 = vld [vmem:[%s9939_s4 + $0x20] sm:$0xff]  }
0x1751   : > { %v5268_v31 = vpop.permute.xlu0 %5267 }
0x1752   : > { %v5273_v46 = vsel %vm2846_vm8, %v5268_v31, 0  ;;  %v7657_v31 = vld [vmem:[%s9939_s4 + $0x28] sm:$0xff]  }
0x1753   : > { %7280 = vmatpush3.bf16.xpose.msra.mxu0 %v5273_v46  ;;  %v7658_v46 = vld [vmem:[%s9939_s4 + $0x30] sm:$0xff]  }
0x1754   : > { %v7795_v54 = vpop.eup %7794  ;;  %7291 = vmatprep.subr.bf16.mxu0 %v7946_v33 }
0x1755   : > { %v5001_v5 = vmul.f32 %v7795_v54, %v7793_v34  ;;  %v7797_v52 = vpop.eup %7796  ;;  %v7653_v34 = vld [vmem:[%s9939_s4 + $0x8] sm:$0xff]  }
0x1756   : > { %v5213_v24 = vsel %vm2894_vm9, %v7797_v52, 0.0 }
0x1757   : > { %v5002_v9 = vpack.c.bf16 %v5001_v5, %v5001_v5 }
0x1759   : > { %7252 = vmatmul.mubr.msk.bf16.vlgmr.msra.gmra.mrb[184].mxu1 %vm2894_vm9, %v5002_v9 }
0x175a   : > { %7256 = vmatpush3.bf16.xpose.msra.mxu1 %v5056_v50  ;;  %7282 = vmatmul.mubr.msk.bf16.vlgmr.msra.gmra.mrb[148].mxu0 %vm2846_vm8, %v5266_v32  ;;  %v7659_v50 = vld [vmem:[%s9939_s4 + $0x38] sm:$0xff]  }
0x175b   : > { %7257 = vmatprep.mubr.msk.bf16.mxu1 %vm7947_vm7, %v7946_v33  ;;  %7261 = vmatprep.subr.bf16.mxu1 %v7946_v33 }
0x175c   : > { %7307 = vmatprep.mubr.msk.bf16.mxu0 %vm7947_vm7, %v7946_v33  ;;  %7292 = vmatpush3.bf16.msra.mxu0 %v7652_v37  ;;  %v7694_v37 = vld [vmem:[%s9860_s22 + $0x68] sm:$0xff]  }
0x175d   : > { %7293 = vmatprep.subr.bf16.mxu0 %v7946_v33 }
0x1760   : > { %7294 = vmatpush3.bf16.msra.mxu0 %v7653_v34  ;;  %v7695_v34 = vld [vmem:[%s9860_s22 + $0x28] sm:$0xff]  }
0x1761   : > { %7258 = vmatmul.mubr.msk.bf16.vlgmr.msra.gmra.mrb[188].mxu1 %vm2846_vm8, %v5048_v59  ;;  %7295 = vmatprep.subr.bf16.mxu0 %v7946_v33 }
0x1762   : > { %7263 = vmatprep.mubr.msk.bf16.mxu1 %vm7947_vm7, %v7946_v33 }
0x1764   : > { %7296 = vmatpush3.bf16.msra.mxu0 %v7654_v11  ;;  %v7696_v11 = vld [vmem:[%s9860_s22 + $0x70] sm:$0xff]  }
0x1765   : > { %7297 = vmatprep.subr.bf16.mxu0 %v7946_v33 }
0x1768   : > { %7298 = vmatpush3.bf16.msra.mxu0 %v7655_v30 }
0x1769   : > { %7299 = vmatprep.subr.bf16.mxu0 %v7946_v33 }
0x176c   : > { %7300 = vmatpush3.bf16.msra.mxu0 %v7656_v6 }
0x176d   : > { %7301 = vmatprep.subr.bf16.mxu0 %v7946_v33 }
0x1770   : > { %7302 = vmatpush3.bf16.msra.mxu0 %v7657_v31 }
0x1771   : > { %7303 = vmatprep.subr.bf16.mxu0 %v7946_v33 }
0x1774   : > { %7304 = vmatpush3.bf16.msra.mxu0 %v7658_v46  ;;  %v5535_v46 = vsub.s32 4, %v8779_v22 }
0x1775   : > { %7305 = vmatprep.subr.bf16.mxu0 %v7946_v33 }
0x1778   : > { %7306 = vmatpush3.bf16.msra.mxu0 %v7659_v50 }
0x182c   : > { %v9467_v38 = vpop.f32.mrb[184].mxu1 }
0x182d   : > { %v7253_v2 = vpop.f32.mrb[185].mxu1  ;;  %v5309_v13 = vpop.f32.mrb[148].mxu0 }
0x182e   : > { %v5043_v39 = vpop.f32.mrb[186].mxu1  ;;  %v7283_v40 = vpop.f32.mrb[149].mxu0  ;;  %v5310_v48 = vadd.f32 %v5309_v13, %v8839_v0 }
0x182f   : > { %v7254_v41 = vpop.f32.mrb[187].mxu1  ;;  %v5312_v42 = vpop.f32.mrb[150].mxu0 }
0x1830   : > { %v7284_v47 = vpop.f32.mrb[151].mxu0  ;;  %v5315_v51 = vsel %vm2894_vm9, %v5310_v48, -inf }
0x1834   : > { %v5092_v12 = vpop.f32.mrb[188].mxu1 }
0x1835   : > { %v5093_v7 = vadd.f32 %v5092_v12, %v8839_v0  ;;  %v7259_v44 = vpop.f32.mrb[189].mxu1 }
0x1836   : > { %v5095_v60 = vpop.f32.mrb[190].mxu1 }
0x1837   : > { %v7260_v23 = vpop.f32.mrb[191].mxu1  ;;  %v5098_v49 = vsel %vm2894_vm9, %v5093_v7, -inf }
0x1838   : > { %5099 = vmax.xlane.f32.xlu0 %v5098_v49  ;;  %v7660_v23 = vld [vmem:[%s9859_s21] ss:$8 sps:$4 sm:$0xff]   ;;  %v7662_v49 = vld [vmem:[%s9859_s21 + $0x4] ss:$8 sps:$4 sm:$0xff]  }
0x183c   : > { %5316 = vmax.xlane.f32.xlu0 %v5315_v51  ;;  %v7665_v51 = vld [vmem:[%s9859_s21 + $0x14] ss:$8 sps:$4 sm:$0xff]  }
0x1840   : > { %5214 = vadd.xlane.f32.xlu0 %v5213_v24  ;;  %v7666_v24 = vld [vmem:[%s9859_s21 + $0x20] ss:$8 sps:$4 sm:$0xff]  }
0x18c5   : > { %v5100_v56 = vpop.xlane.xlu0 %5099 }
0x18c6   : > { %v5101_v58 = vsub.f32 %v5093_v7, %v5100_v56 }
0x18c8   : > { %v5102_v20 = vmul.f32 1.442695, %v5101_v58 }
0x18c9   : > { %v5317_v19 = vpop.xlane.xlu0 %5316 }
0x18ca   : > { %7798 = vpow2.f32 %v5102_v20  ;;  %v5318_v61 = vsub.f32 %v5310_v48, %v5317_v19 }
0x18cc   : > { %v5319_v59 = vmul.f32 1.442695, %v5318_v61 }
0x18cd   : > { %v5215_v1 = vpop.xlane.xlu0 %5214 }
0x18ce   : > { %7800 = vpow2.f32 %v5319_v59 }
0x18d4   : > { %v7799_v0 = vpop.eup %7798 }
0x18d5   : > { %v5104_v62 = vsel %vm2894_vm9, %v7799_v0, 0.0 }
0x18d6   : > { %5105 = vadd.xlane.f32.xlu0 %v5104_v62  ;;  %v7669_v62 = vld [vmem:[%s9859_s21 + $0x30] ss:$8 sps:$4 sm:$0xff]  }
0x18d8   : > { %v7801_v63 = vpop.eup %7800 }
0x18d9   : > { %v5321_v14 = vsel %vm2894_vm9, %v7801_v63, 0.0 }
0x18da   : > { %5322 = vadd.xlane.f32.xlu1 %v5321_v14  ;;  %v7677_v14 = vld [vmem:[%s9859_s21 + $0x54] ss:$8 sps:$4 sm:$0xff]  }
0x18eb   : > { %5219 = vrot.lane.b32.xlu1 %v9419_v35, %s9937_s2 }
0x18ec   : > { %5111 = vrot.lane.b32.xlu0 %v9419_v35, %s9936_s7 }
0x18ef   : > { %5327 = vrot.lane.b32.xlu1 %v9419_v35, %s9938_s28 }
0x1963   : > { %v5106_v25 = vpop.xlane.xlu0 %5105 }
0x1964   : > { %7802 = vrcp.f32 %v5106_v25  ;;  %v7680_v25 = vld [vmem:[%s9859_s21 + $0x64] ss:$8 sps:$4 sm:$0xff]  }
0x1965   : > { %7804 = vrcp.f32 %v5215_v1  ;;  %v7675_v1 = vld [vmem:[%s9859_s21 + $0x50] ss:$8 sps:$4 sm:$0xff]  }
0x1967   : > { %v5112_v3 = vpop.permute.xlu0 %5111  ;;  %v5323_v10 = vpop.xlane.xlu1 %5322 }
0x1968   : > { %7262 = vmatpush3.bf16.msra.mxu1 %v5112_v3  ;;  %7806 = vrcp.f32 %v5323_v10  ;;  %v7678_v3 = vld [vmem:[%s9859_s21 + $0x60] ss:$8 sps:$4 sm:$0xff]   ;;  %v7683_v10 = vld [vmem:[%s9859_s21 + $0x74] ss:$8 sps:$4 sm:$0xff]  }
0x1969   : > { %7273 = vmatprep.subr.bf16.mxu1 %v7946_v33 }
0x196b   : > { %v5220_v53 = vpop.permute.xlu1 %5219 }
0x196e   : > { %v7803_v18 = vpop.eup %7802 }
0x196f   : > { %v5108_v21 = vmul.f32 %v7803_v18, %v7799_v0  ;;  %v7805_v17 = vpop.eup %7804  ;;  %v5328_v27 = vpop.permute.xlu1 %5327  ;;  %v7671_v0 = vld [vmem:[%s9859_s21 + $0x34] ss:$8 sps:$4 sm:$0xff]   ;;  %v7681_v18 = vld [vmem:[%s9859_s21 + $0x70] ss:$8 sps:$4 sm:$0xff]  }
0x1970   : > { %v5217_v35 = vmul.f32 %v7805_v17, %v7797_v52  ;;  %v7668_v52 = vld [vmem:[%s9859_s21 + $0x24] ss:$8 sps:$4 sm:$0xff]  }
0x1971   : > { %v5109_v8 = vpack.c.bf16 %v5108_v21, %v5108_v21  ;;  %v7684_v21 = vld [vmem:[%s9860_s22 + $0x40] sm:$0xff]   ;;  %v7686_v17 = vld [vmem:[%s9860_s22 + $0x48] sm:$0xff]  }
0x1972   : > { %v5218_v15 = vpack.c.bf16 %v5217_v35, %v5217_v35  ;;  %v7807_v55 = vpop.eup %7806  ;;  %6862 = vmatprep.subr.bf16.mxu0 %v7684_v21  ;;  %v7688_v35 = vld [vmem:[%s9860_s22 + $0x50] sm:$0xff]   ;;  %v7727_v21 = vld [vmem:[%s9940_s30 + $0x98] ss:$12 sps:$4 sm:$0xff]  }
0x1973   : > { %7264 = vmatmul.mubr.msk.bf16.vlgmr.msra.gmra.mrb[192].mxu1 %vm2894_vm9, %v5109_v8  ;;  %v5325_v16 = vmul.f32 %v7807_v55, %v7801_v63  ;;  %v7674_v63 = vld [vmem:[%s9859_s21 + $0x44] ss:$8 sps:$4 sm:$0xff]   ;;  %v7690_v55 = vld [vmem:[%s9860_s22 + $0x58] sm:$0xff]  }
0x1974   : > { %7274 = vmatpush3.bf16.msra.mxu1 %v5220_v53  ;;  %7275 = vmatprep.mubr.msk.bf16.mxu1 %vm7947_vm7, %v7946_v33  ;;  %v7685_v8 = vld [vmem:[%s9860_s22] sm:$0xff]   ;;  %v7687_v53 = vld [vmem:[%s9860_s22 + $0x8] sm:$0xff]  }
0x1975   : > { %7285 = vmatprep.subr.bf16.mxu1 %v7946_v33  ;;  %v5326_v29 = vpack.c.bf16 %v5325_v16, %v5325_v16  ;;  %v7692_v16 = vld [vmem:[%s9860_s22 + $0x60] sm:$0xff]  }
0x197b   : > { %7276 = vmatmul.mubr.msk.bf16.vlgmr.msra.gmra.mrb[196].mxu1 %vm2894_vm9, %v5218_v15  ;;  %v7689_v15 = vld [vmem:[%s9860_s22 + $0x10] sm:$0xff]  }
0x197c   : > { %7286 = vmatpush3.bf16.msra.mxu1 %v5328_v27  ;;  %7287 = vmatprep.mubr.msk.bf16.mxu1 %vm7947_vm7, %v7946_v33  ;;  %v7691_v27 = vld [vmem:[%s9860_s22 + $0x18] sm:$0xff]  }
0x197d   : > { %5619 = vmatprep.subr.bf16.mxu1 %v7662_v49  ;;  %v7710_v49 = vld [vmem:[%s9940_s30 + $0x34] ss:$12 sps:$4 sm:$0xff]  }
0x1983   : > { %7288 = vmatmul.mubr.msk.bf16.vlgmr.msra.gmra.mrb[200].mxu1 %vm2894_vm9, %v5326_v29  ;;  %v7693_v29 = vld [vmem:[%s9860_s22 + $0x20] sm:$0xff]   ;;  %vm6107_vm9 = vcmp.eq.s32.totalorder %v8779_v22, 7 }
0x1984   : > { %5651 = vmatprep.mubr.bf16.mxu1 %v7945_v4  ;;  %5620 = vmatpush1.bf16.msra.mxu1 %v7660_v23  ;;  %v7704_v23 = vld [vmem:[%s9940_s30 + $0x18] ss:$12 sps:$4 sm:$0xff]  }
0x1985   : > { %5621 = vmatprep.subr.bf16.mxu1 %v7665_v51  ;;  %v7708_v51 = vld [vmem:[%s9940_s30 + $0x30] ss:$12 sps:$4 sm:$0xff]  }
0x1a46   : > { %v5151_v54 = vpop.f32.mrb[192].mxu1 }
0x1a47   : > { %5374 = vrot.lane.b32.xlu1 %v5151_v54, %s9938_s28  ;;  %v7265_v5 = vpop.f32.mrb[193].mxu1  ;;  %v5536_v54 = vrot.slane %v9425_v45, %v5535_v46  ;;  %v6089_v46 = vstv %s6088_s5  ;;  %s6108_s28 = sld [smem:[#allocation4 + %s3815_s9]] }
0x1a48   : > { %v5154_v9 = vpop.f32.mrb[194].mxu1 }
0x1a49   : > { %v7266_v32 = vpop.f32.mrb[195].mxu1 }
0x1a4e   : > { %v5259_v36 = vpop.f32.mrb[196].mxu1 }
0x1a4f   : > { %5378 = vrot.lane.b32.xlu0 %v5259_v36, %s9937_s2  ;;  %v7277_v28 = vpop.f32.mrb[197].mxu1  ;;  %v7697_v36 = vld [vmem:[%s9860_s22 + $0x30] sm:$0xff]   ;;  %s6104_s2 = sld [smem:[#allocation4 + %s3811_s10]]  ;;  %s9747_s10 = scalar_lea.vmem [#allocation5], %s7335_s25 }
0x1a50   : > { %v5262_v2 = vpop.f32.mrb[198].mxu1  ;;  %v7698_v28 = vld [vmem:[%s9860_s22 + $0x78] sm:$0xff]   ;;  %s6149_s20 = sshll.u32 %s9747_s10, 4  ;;  %s6150_s20 = int_to_ptr.vmem [resolvable:$true] %s6149_s20 }
0x1a51   : > { %v7278_v13 = vpop.f32.mrb[199].mxu1  ;;  %v7699_v2 = vld [vmem:[%s9860_s22 + $0x38] sm:$0xff]  }
0x1a56   : > { %v5367_v43 = vpop.f32.mrb[200].mxu1 }
0x1a57   : > { %5382 = vrot.lane.b32.xlu1 %v5367_v43, %s9936_s7  ;;  %v7289_v39 = vpop.f32.mrb[201].mxu1  ;;  %s6162_s7 = sshll.u32 %s9944_s6, 4  ;;  %s9758_s7 = int_to_ptr.vmem [resolvable:$true] %s6162_s7 }
0x1a58   : > { %v5370_v40 = vpop.f32.mrb[202].mxu1 }
0x1a59   : > { %v7290_v41 = vpop.f32.mrb[203].mxu1 }
0x1ab9   : > { %v5375_v42 = vpop.permute.xlu1 %5374 }
0x1aba   : > { %v5385_v12 = vsel %vm2846_vm8, %v9467_v38, %v5375_v42  ;;  %v7663_v38 = vld [vmem:[%s9859_s21 + $0x10] ss:$8 sps:$4 sm:$0xff]   ;;  %vm6103_vm8 = vcmp.eq.s32.totalorder %v8779_v22, 6 }
0x1abb   : > { %5622 = vmatpush1.bf16.msra.mxu1 %v7663_v38 }
0x1abc   : > { %5623 = vmatprep.subr.bf16.mxu1 %v7668_v52 }
0x1abf   : > { %5624 = vmatpush1.bf16.msra.mxu1 %v7666_v24 }
0x1ac0   : > { %5625 = vmatprep.subr.bf16.mxu1 %v7671_v0  ;;  %v7714_v0 = vld [vmem:[%s9940_s30 + $0x4c] ss:$12 sps:$4 sm:$0xff]  }
0x1ac1   : > { %v5379_v47 = vpop.permute.xlu0 %5378 }
0x1ac2   : > { %v5386_v7 = vsel %vm2142_vm3, %v5385_v12, %v5379_v47  ;;  %v7700_v12 = vld [vmem:[%s9940_s30] ss:$12 sps:$4 sm:$0xff]   ;;  %vm6083_vm3 = vcmp.eq.s32.totalorder %v8779_v22, 1 }
0x1ac3   : > { %5626 = vmatpush1.bf16.msra.mxu1 %v7669_v62  ;;  %v7712_v62 = vld [vmem:[%s9940_s30 + $0x48] ss:$12 sps:$4 sm:$0xff]  }
0x1ac4   : > { %5627 = vmatprep.subr.bf16.mxu1 %v7674_v63  ;;  %v7716_v63 = vld [vmem:[%s9940_s30 + $0x60] ss:$12 sps:$4 sm:$0xff]  }
0x1ac9   : > { %v5383_v44 = vpop.permute.xlu1 %5382 }
0x1aca   : > { %v5387_v60 = vsel %vm1552_vm2, %v5386_v7, %v5383_v44  ;;  %v7702_v7 = vld [vmem:[%s9940_s30 + $0x4] ss:$12 sps:$4 sm:$0xff]   ;;  %v7703_v44 = vld [vmem:[%s9940_s30 + $0x8] ss:$12 sps:$4 sm:$0xff]   ;;  %vm6079_vm2 = vcmp.eq.s32.totalorder %v8779_v22, 0 }
0x1acb   : > { %v5388_v48 = vpack.c.bf16 %v5387_v60, %v5387_v60  ;;  %v7706_v60 = vld [vmem:[%s9940_s30 + $0x1c] ss:$12 sps:$4 sm:$0xff]  }
0x1acd   : > { %7308 = vmatmul.mubr.bf16.vlgmr.msra.gmra.mrb[152].mxu0 %v5388_v48  ;;  %v7707_v48 = vld [vmem:[%s9940_s30 + $0x20] ss:$12 sps:$4 sm:$0xff]  }
0x1ace   : > { %6863 = vmatpush3.bf16.msra.mxu0 %v7685_v8  ;;  %v7730_v8 = vld [vmem:[%s9940_s30 + $0xac] ss:$12 sps:$4 sm:$0xff]  }
0x1acf   : > { %6864 = vmatprep.subr.bf16.mxu0 %v7686_v17  ;;  %v7728_v17 = vld [vmem:[%s9940_s30 + $0xa8] ss:$12 sps:$4 sm:$0xff]  }
0x1ad2   : > { %6865 = vmatpush3.bf16.msra.mxu0 %v7687_v53  ;;  %v7731_v53 = vld [vmem:[%s9940_s30 + $0xb0] ss:$12 sps:$4 sm:$0xff]  }
0x1ad3   : > { %6866 = vmatprep.subr.bf16.mxu0 %v7688_v35 }
0x1ad6   : > { %6867 = vmatpush3.bf16.msra.mxu0 %v7689_v15 }
0x1ad7   : > { %6868 = vmatprep.subr.bf16.mxu0 %v7690_v55 }
0x1ada   : > { %6869 = vmatpush3.bf16.msra.mxu0 %v7691_v27  ;;  %v5810_v27 = vsub.s32 5, %v8779_v22 }
0x1adb   : > { %6870 = vmatprep.subr.bf16.mxu0 %v7692_v16 }
0x1adc   : > { %v5811_v16 = vrot.slane %v9425_v45, %v5810_v27 }
0x1ade   : > { %6871 = vmatpush3.bf16.msra.mxu0 %v7693_v29 }
0x1adf   : > { %6872 = vmatprep.subr.bf16.mxu0 %v7694_v37 }
0x1ae2   : > { %6873 = vmatpush3.bf16.msra.mxu0 %v7695_v34 }
0x1ae3   : > { %6874 = vmatprep.subr.bf16.mxu0 %v7696_v11 }
0x1ae6   : > { %6875 = vmatpush3.bf16.msra.mxu0 %v7697_v36  ;;  %v6101_v36 = vstv %s6100_s3  ;;  %s7952_s3 = smov [#allocation5]  }
0x1ae7   : > { %6876 = vmatprep.subr.bf16.mxu0 %v7698_v28 }
0x1aea   : > { %6877 = vmatpush3.bf16.msra.mxu0 %v7699_v2  ;;  %v6105_v2 = vstv %s6104_s2  ;;  %s7849_s2 = sshll.u32 %s7952_s3, 4  ;;  %s7850_s2 = int_to_ptr.vmem [resolvable:$false] %s7849_s2 }
0x1aeb   : > { %7311 = vmatprep.subr.bf16.mxu0 %v7946_v33  ;;  %p7852_p10 = scmp.lt.s32.totalorder %s6150_s20, %s7850_s2 }
0x1ba0   : > { %v5471_v56 = vpop.f32.mrb[152].mxu0 }
0x1ba1   : > { %v9549_v58 = vadd.f32 %v5471_v56, %v9399_v26  ;;  %v7309_v20 = vpop.f32.mrb[153].mxu0  ;;  %v7672_v26 = vld [vmem:[%s9859_s21 + $0x40] ss:$8 sps:$4 sm:$0xff]  }
0x1ba2   : > { %v5474_v19 = vpop.f32.mrb[154].mxu0  ;;  %5628 = vmatpush1.bf16.msra.mxu1 %v7672_v26  ;;  %v7718_v26 = vld [vmem:[%s9940_s30 + $0x64] ss:$12 sps:$4 sm:$0xff]  }
0x1ba3   : > { %v7310_v61 = vpop.f32.mrb[155].mxu0  ;;  %v5526_v59 = vmul.f32 %v9549_v58, %v9549_v58  ;;  %5629 = vmatprep.subr.bf16.mxu1 %v7677_v14  ;;  %v7719_v14 = vld [vmem:[%s9940_s30 + $0x68] ss:$12 sps:$4 sm:$0xff]  }
0x1ba5   : > { %5527 = vadd.xlane.f32.xlu0 %v5526_v59  ;;  %v7711_v59 = vld [vmem:[%s9940_s30 + $0x38] ss:$12 sps:$4 sm:$0xff]  }
0x1ba6   : > { %5630 = vmatpush1.bf16.msra.mxu1 %v7675_v1  ;;  %v7722_v1 = vld [vmem:[%s9940_s30 + $0x7c] ss:$12 sps:$4 sm:$0xff]  }
0x1ba7   : > { %5631 = vmatprep.subr.bf16.mxu1 %v7680_v25  ;;  %v7720_v25 = vld [vmem:[%s9940_s30 + $0x78] ss:$12 sps:$4 sm:$0xff]  }
0x1baa   : > { %5632 = vmatpush1.bf16.msra.mxu1 %v7678_v3  ;;  %v7723_v3 = vld [vmem:[%s9940_s30 + $0x80] ss:$12 sps:$4 sm:$0xff]  }
0x1bab   : > { %5633 = vmatprep.subr.bf16.mxu1 %v7683_v10  ;;  %v7726_v10 = vld [vmem:[%s9940_s30 + $0x94] ss:$12 sps:$4 sm:$0xff]  }
0x1bae   : > { %5634 = vmatpush1.bf16.msra.mxu1 %v7681_v18  ;;  %v7724_v18 = vld [vmem:[%s9940_s30 + $0x90] ss:$12 sps:$4 sm:$0xff]  }
0x1baf   : > { %5975 = vmatprep.subr.bf16.mxu1 %v7702_v7 }
0x1c32   : > { %v5528_v30 = vpop.xlane.xlu0 %5527 }
0x1c33   : > { %v5529_v6 = vmul.f32 0.0078125, %v5528_v30 }
0x1c35   : > { %v5530_v31 = vadd.f32 1e-06, %v5529_v6  ;;  %v6085_v6 = vstv %s6084_s27  ;;  %s6660_s27 = sshll.u32 %s9945_s26, 8 }
0x1c37   : > { %7808 = vrsqrt.f32 %v5530_v31 }
0x1c41   : > { %v7809_v5 = vpop.eup %7808 }
0x1c42   : > { %v5532_v9 = vmul.f32 %v7809_v5, %v9549_v58  ;;  %v6093_v5 = vstv %s6092_s0  ;;  %s6126_s0 = scalar_lea.sflag [#allocation6], %s8719_s8 }
0x1c44   : > { %v5537_v32 = vmul.f32 %v5536_v54, %v5532_v9 }
0x1c46   : > { %v5538_v50 = vpack.c.bf16 %v5537_v32, %v5537_v32  ;;  %v6097_v32 = vstv %s6096_s1  ;;  %s7845_s1 = scalar_lea.vmem %s6150_s20, 384 }
0x1c47   : > { %p7846_p7 = scmp.ne.s32.totalorder %s6150_s20, %s7845_s1 }
0x1c48   : > { %5652 = vmatmul.mubr.bf16.vlgmr.msra.gmra.mrb[204].mxu1 %v5538_v50 }
0x1c49   : > { %6007 = vmatprep.mubr.bf16.mxu1 %v7945_v4  ;;  %5976 = vmatpush1.bf16.msra.mxu1 %v7700_v12  ;;  %p7847_p8 = pnand %p7846_p7, %p8130_p1 }
0x1c4a   : > { %5977 = vmatprep.subr.bf16.mxu1 %v7706_v60 }
0x1c4b   : > { %p7848_p9 = pneg %p7847_p8 }
0x1c4d   : > { %5978 = vmatpush1.bf16.msra.mxu1 %v7704_v23 }
0x1c4e   : > { %5979 = vmatprep.subr.bf16.mxu1 %v7710_v49 }
0x1c51   : > { %5980 = vmatpush1.bf16.msra.mxu1 %v7708_v51 }
0x1c52   : > { %5981 = vmatprep.subr.bf16.mxu1 %v7714_v0 }
0x1c55   : > { %5982 = vmatpush1.bf16.msra.mxu1 %v7712_v62 }
0x1c56   : > { %5983 = vmatprep.subr.bf16.mxu1 %v7718_v26 }
0x1c59   : > { %5984 = vmatpush1.bf16.msra.mxu1 %v7716_v63 }
0x1c5a   : > { %5985 = vmatprep.subr.bf16.mxu1 %v7722_v1 }
0x1c5d   : > { %5986 = vmatpush1.bf16.msra.mxu1 %v7720_v25 }
0x1c5e   : > { %5987 = vmatprep.subr.bf16.mxu1 %v7726_v10 }
0x1c61   : > { %5988 = vmatpush1.bf16.msra.mxu1 %v7724_v18 }
0x1c62   : > { %5989 = vmatprep.subr.bf16.mxu1 %v7730_v8 }
0x1c65   : > { %5990 = vmatpush1.bf16.msra.mxu1 %v7728_v17 }
0x1d1b   : > { %v5653_v13 = vpop.f32.mrb[204].mxu1 }
0x1d1c   : > { %v5660_v43 = vmax.f32 %v5653_v13, 0.0  ;;  %v5655_v4 = vpop.f32.mrb[205].mxu1 }
0x1d1d   : > { %v5661_v39 = vmax.f32 %v5655_v4, 0.0  ;;  %v5657_v40 = vpop.f32.mrb[206].mxu1  ;;  %v6112_v4 = vadd.s32 256, %v9235_v57 }
0x1d1e   : > { %v5658_v41 = vpop.f32.mrb[207].mxu1  ;;  %v5662_v47 = vpack.c.bf16 %v5660_v43, %v5660_v43  ;;  %v6109_v43 = vstv %s6108_s28  ;;  %v6111_v40 = vadd.s32 128, %v9235_v57  ;;  %s7851_s28 = scalar_lea.vmem %s7850_s2, 768 }
0x1d1f   : > { %v5663_v42 = vpack.c.bf16 %v5661_v39, %v5661_v39  ;;  %p7853_p11 = scmp.lt.s32.totalorder %s7851_s28, %s7845_s1 }
0x1d21   : > { %5792 = vmatprep.mubr.bf16.mxu0 %v5663_v42  ;;  %p7854_p12 = por %p7853_p11, %p7852_p10 }
0x1d22   : > { %5793 = vmatmul.mubr.bf16.vlgmr.msra.gmra.mrb[156].mxu0 %v5662_v47 }
0x1d23   : > { %7327 = vmatprep.mubr.msk.bf16.mxu0 %vm7947_vm7, %v7946_v33  ;;  %7312 = vmatpush3.bf16.msra.mxu0 %v7703_v44  ;;  %vm6099_vm7 = vcmp.eq.s32.totalorder %v8779_v22, 5  ;;  %p7855_p13 = pnand %p7854_p12, %p7848_p9 }
0x1d24   : > { %7313 = vmatprep.subr.bf16.mxu0 %v7946_v33 }
0x1d27   : > { %7314 = vmatpush3.bf16.msra.mxu0 %v7707_v48 }
0x1d28   : > { %7315 = vmatprep.subr.bf16.mxu0 %v7946_v33 }
0x1d2b   : > { %7316 = vmatpush3.bf16.msra.mxu0 %v7711_v59 }
0x1d2c   : > { %7317 = vmatprep.subr.bf16.mxu0 %v7946_v33 }
0x1df5   : > { %v6878_v38 = vpop.f32.mrb[156].mxu0 }
0x1df6   : > { %v6879_v52 = vpop.f32.mrb[157].mxu0 }
0x1df7   : > { %v6880_v24 = vadd.f32 %v6879_v52, %v6878_v38  ;;  %v6881_v56 = vpop.f32.mrb[158].mxu0 }
0x1df8   : > { %v6882_v20 = vpop.f32.mrb[159].mxu0 }
0x1df9   : > { %v5800_v19 = vadd.f32 %v6880_v24, %v9549_v58  ;;  %v7715_v58 = vld [vmem:[%s9940_s30 + $0x50] ss:$12 sps:$4 sm:$0xff]  }
0x1dfa   : > { %7318 = vmatpush3.bf16.msra.mxu0 %v7715_v58 }
0x1dfb   : > { %v5801_v61 = vmul.f32 %v5800_v19, %v5800_v19  ;;  %7319 = vmatprep.subr.bf16.mxu0 %v7946_v33 }
0x1dfd   : > { %5802 = vadd.xlane.f32.xlu1 %v5801_v61 }
0x1dfe   : > { %7320 = vmatpush3.bf16.msra.mxu0 %v7719_v14 }
0x1dff   : > { %7321 = vmatprep.subr.bf16.mxu0 %v7946_v33 }
0x1e02   : > { %7322 = vmatpush3.bf16.msra.mxu0 %v7723_v3 }
0x1e03   : > { %7323 = vmatprep.subr.bf16.mxu0 %v7946_v33 }
0x1e06   : > { %7324 = vmatpush3.bf16.msra.mxu0 %v7727_v21 }
0x1e07   : > { %7325 = vmatprep.subr.bf16.mxu0 %v7946_v33  ;;  %v6081_v33 = vstv %s6080_s29  ;;  %s9947_s29 = sld [smem:[#allocation36_spill]] }
0x1e08   : > { %v6082_v45 = vsel %vm6079_vm2, %v6081_v33, 0 }
0x1e09   : > { %v6086_v31 = vsel %vm6083_vm3, %v6085_v6, %v6082_v45 }
0x1e0a   : > { %7326 = vmatpush3.bf16.msra.mxu0 %v7731_v53  ;;  %v6090_v54 = vsel %vm6087_vm4, %v6089_v46, %v6086_v31 }
0x1e0b   : > { %v6094_v9 = vsel %vm6091_vm5, %v6093_v5, %v6090_v54 }
0x1e0c   : > { %v6098_v50 = vsel %vm6095_vm6, %v6097_v32, %v6094_v9 }
0x1e0d   : > { %v6102_v28 = vsel %vm6099_vm7, %v6101_v36, %v6098_v50  ;;  %s9766_s23 = scalar_lea.hbm %s9947_s29, %s7337_s12 }
0x1e0e   : > { %v6106_v13 = vsel %vm6103_vm8, %v6105_v2, %v6102_v28 }
0x1e0f   : > { %v6110_v39 = vsel %vm6107_vm9, %v6109_v43, %v6106_v13 }
0x1e10   : > { %vm6113_vm10 = vcmp.eq.s32.totalorder %v9235_v57, %v6110_v39  ;;  %vm6115_vm11 = vcmp.eq.s32.totalorder %v6112_v4, %v6110_v39  ;;  %vm6114_vm12 = vcmp.eq.s32.totalorder %v6111_v40, %v6110_v39 }
0x1e8a   : > { %v5803_v35 = vpop.xlane.xlu1 %5802 }
0x1e8b   : > { %v5804_v15 = vmul.f32 0.0078125, %v5803_v35 }
0x1e8d   : > { %v5805_v55 = vadd.f32 1e-06, %v5804_v15 }
0x1e8f   : > { %7810 = vrsqrt.f32 %v5805_v55 }
0x1e99   : > { %v7811_v29 = vpop.eup %7810 }
0x1e9a   : > { %v5807_v37 = vmul.f32 %v7811_v29, %v5800_v19 }
0x1e9c   : > { %v5812_v34 = vmul.f32 %v5811_v16, %v5807_v37 }
0x1e9e   : > { %v5813_v11 = vmul.f32 0.088388346, %v5812_v34 }
0x1ea0   : > { %v5814_v30 = vpack.c.bf16 %v5813_v11, %v5813_v11 }
0x1ea2   : > { %6008 = vmatmul.mubr.bf16.vlgmr.msra.gmra.mrb[208].mxu1 %v5814_v30  ;;  %7328 = vmatmul.mubr.bf16.vlgmr.msra.gmra.mrb[160].mxu0 %v5814_v30 }
0x1f75   : > { %v6009_v41 = vpop.f32.mrb[208].mxu1  ;;  %v6050_v42 = vpop.f32.mrb[160].mxu0 }
0x1f76   : > { %6056 = vst [vmem:[%s9747_s10] sm:$0xff] %v6009_v41  ;;  %6058 = vst [vmem:[%s9747_s10 + $0x10] sm:$0xff] %v6050_v42  ;;  %v6011_v22 = vpop.f32.mrb[209].mxu1  ;;  %v7329_v47 = vpop.f32.mrb[161].mxu0  ;;  %v6116_v12 = vsel %vm6113_vm10, %v6009_v41, 0.0  ;;  %v6118_v7 = vsel %vm6115_vm11, %v6050_v42, 0.0 }
0x1f77   : > { %6057 = vst [vmem:[%s9747_s10 + $0x8] sm:$0xff] %v6011_v22  ;;  %v6013_v44 = vpop.f32.mrb[210].mxu1  ;;  %v6053_v60 = vpop.f32.mrb[162].mxu0  ;;  %v6059_v48 = vmax.f32 %v6009_v41, %v6011_v22  ;;  %v6117_v57 = vsel %vm6114_vm12, %v6011_v22, 0.0 }
0x1f78   : > { %v6014_v23 = vpop.f32.mrb[211].mxu1  ;;  %v7330_v49 = vpop.f32.mrb[163].mxu0  ;;  %v6119_v51 = vadd.f32 %v6117_v57, %v6116_v12 }
0x1f79   : > { %v6060_v38 = vmax.f32 %v6059_v48, %v6050_v42 }
0x1f7a   : > { %v6120_v52 = vadd.f32 %v6119_v51, %v6118_v7 }
0x1f7b   : > { %6061 = vmax.xlane.f32.xlu0 %v6060_v38 }
0x2008   : > { %v9752_v24 = vpop.xlane.xlu0 %6061 }
0x2009   : > { %v6063_v56 = vsub.f32 %v6009_v41, %v9752_v24  ;;  %v6064_v20 = vsub.f32 %v6011_v22, %v9752_v24  ;;  %v6065_v19 = vsub.f32 %v6050_v42, %v9752_v24 }
0x200b   : > { %v6066_v61 = vmul.f32 1.442695, %v6063_v56  ;;  %v6068_v59 = vmul.f32 1.442695, %v6064_v20  ;;  %v6070_v0 = vmul.f32 1.442695, %v6065_v19 }
0x200d   : > { %7812 = vpow2.f32 %v6066_v61 }
0x200e   : > { %7814 = vpow2.f32 %v6068_v59 }
0x200f   : > { %7816 = vpow2.f32 %v6070_v0 }
0x2017   : > { %v7813_v62 = vpop.eup %7812 }
0x2018   : > { %v7815_v58 = vpop.eup %7814 }
0x2019   : > { %v6072_v26 = vadd.f32 %v7815_v58, %v7813_v62  ;;  %v7817_v63 = vpop.eup %7816 }
0x201b   : > { %v6073_v14 = vadd.f32 %v7817_v63, %v6072_v26 }
0x201d   : > { %6074 = vadd.xlane.f32.xlu0 %v6073_v14 }
0x2021   : > { %6121 = vadd.xlane.f32.xlu0 %v6120_v52 }
0x2022   : > { %7858 = shalt.err (!%p7855_p13)
}
0x2023   : > { %s7859_s25 = scalar_lea.hbm %s9766_s23, 384  ;;  %s7863_s12 = scalar_lea.hbm %s9947_s29, 768 }
0x2024   : > { %p7860_p0 = scmp.ne.s32.totalorder %s9766_s23, %s7859_s25  ;;  %p7864_p5 = scmp.lt.u32.totalorder %s9766_s23, %s9947_s29 }
0x2025   : > { %p7865_p6 = scmp.lt.u32.totalorder %s7863_s12, %s7859_s25  ;;  %p7867_p8 = scmp.lt.u32.totalorder %s7859_s25, %s9766_s23 }
0x2026   : > { %p7861_p3 = pnand %p7860_p0, %p8130_p1 }
0x2027   : > { %p7866_p7 = por %p7865_p6, %p7864_p5 }
0x2028   : > { %p7862_p4 = pneg %p7861_p3 }
0x2029   : > { %p7868_p9 = por %p7867_p8, %p7866_p7 }
0x202b   : > { %p7869_p10 = pnand %p7868_p9, %p7862_p4 }
0x202d   : > { %7872 = shalt.err (!%p7869_p10)
}
0x202e   : > { %7338 = dma.vmem_to_hbm [thread:$0]  (%p8130_p1), %s6150_s20, 384, %s9766_s23, %s6126_s0  }
0x202f   : > { %s9948_s2 = sld [smem:[#allocation37_spill]]  ;;  %s6131_s25 = scalar_lea.sflag [#allocation8], %s8719_s8 }
0x2030   : > { %s7873_s10 = scalar_lea.vmem %s9758_s7, 256  ;;  %s7953_s6 = smov [#allocation7]  }
0x2031   : > { %p7874_p11 = scmp.ne.s32.totalorder %s9758_s7, %s7873_s10  ;;  %s7877_s12 = sshll.u32 %s7953_s6, 4  ;;  %s7878_s12 = int_to_ptr.vmem [resolvable:$false] %s7877_s12 }
0x2032   : > { %s7879_s24 = scalar_lea.vmem %s7878_s12, 512  ;;  %p7880_p0 = scmp.lt.s32.totalorder %s9758_s7, %s7878_s12 }
0x2033   : > { %p7875_p12 = pnand %p7874_p11, %p8130_p1  ;;  %p7881_p3 = scmp.lt.s32.totalorder %s7879_s24, %s7873_s10 }
0x2035   : > { %s9791_s28 = scalar_lea.hbm %s9948_s2, %s6660_s27  ;;  %p7876_p13 = pneg %p7875_p12 }
0x2036   : > { %p7882_p4 = por %p7881_p3, %p7880_p0 }
0x2038   : > { %p7883_p5 = pnand %p7882_p4, %p7876_p13 }
0x203a   : > { %7886 = shalt.err (!%p7883_p5)
}
0x203b   : > { %s7887_s26 = scalar_lea.hbm %s9791_s28, 256  ;;  %s7891_s23 = scalar_lea.hbm %s9948_s2, 512 }
0x203c   : > { %p7888_p6 = scmp.ne.s32.totalorder %s9791_s28, %s7887_s26  ;;  %p7892_p9 = scmp.lt.u32.totalorder %s9791_s28, %s9948_s2 }
0x203d   : > { %p7893_p10 = scmp.lt.u32.totalorder %s7891_s23, %s7887_s26  ;;  %p7895_p12 = scmp.lt.u32.totalorder %s7887_s26, %s9791_s28 }
0x203e   : > { %p7889_p7 = pnand %p7888_p6, %p8130_p1 }
0x203f   : > { %p7894_p11 = por %p7893_p10, %p7892_p9 }
0x2040   : > { %p7890_p8 = pneg %p7889_p7 }
0x2041   : > { %p7896_p13 = por %p7895_p12, %p7894_p11 }
0x2043   : > { %p7897_p0 = pnand %p7896_p13, %p7890_p8 }
0x2045   : > { %7900 = shalt.err (!%p7897_p0)
}
0x2046   : > { %s7954_s1 = smov 128   ;;  %s9949_s3 = sld [smem:[#allocation21_spill]] }
0x2047   : > { %s7955_s10 = smov 8   ;;  %s9950_s26 = sld [smem:[#allocation38_spill]] }
0x2048   : > { %7339 = dma.vmem_to_hbm [thread:$0]  (%p8130_p1), %s9758_s7, 256, %s9791_s28, %s6131_s25, %s7954_s1, %s7954_s1, %s7955_s10  }
0x204c   : > { %s6306_s6 = sshll.u32 %s9949_s3, 3 }
0x204d   : > { %s755_s20 = scalar_lea.vmem %s9950_s26, %s6306_s6 }
0x20aa   : > { %v6075_v1 = vpop.xlane.xlu0 %6074 }
0x20ab   : > { %7818 = vlog2.f32 %v6075_v1 }
0x20ae   : > { %v6122_v18 = vpop.xlane.xlu0 %6121 }
0x20b5   : > { %v7819_v25 = vpop.eup %7818 }
0x20b6   : > { %v6077_v3 = vmul.f32 0.6931472, %v7819_v25 }
0x20b8   : > { %v6078_v10 = vadd.f32 %v6077_v3, %v9752_v24 }
0x20ba   : > { %v6123_v21 = vsub.f32 %v6078_v10, %v6122_v18 }
0x20bc   : > { %6124 = vst [vmem:[%s755_s20] sm:$0xff] %v6123_v21 }
0x20bd PF: > { %s9951_s27 = sld [smem:[#allocation15_spill]]  ;;  %s9952_s23 = sld [smem:[#allocation12_spill]] }
0x20c3   : > { %p7349_p3 = scmp.ge.s32.totalorder %s9951_s27, 2  ;;  %s6180_s8 = sand.u32 1, %s9952_s23  }
0x20c4   : > { %s6181_s7 = scalar_lea.sflag [#allocation6], %s6180_s8 }
0x20c5   : > { %p7343_p1 = pnand %p7349_p3, %p8134_p2 }
0x20c7   : > { %7920 = dma.done.wait (!%p7343_p1), %s6181_s7, 384  }
0x20c8   : > { %7922 = vsyncadd (!%p7343_p1), %s6181_s7, 4294966912  ;;  %s6190_s28 = scalar_lea.sflag [#allocation8], %s6180_s8 }
0x20c9   : > { %7924 = dma.done.wait (!%p7343_p1), %s6190_s28, 256  }
0x20ca   : > { %7926 = vsyncadd (!%p7343_p1), %s6190_s28, 4294967040  ;;  %s9954_s28 = sld [smem:[#allocation17_spill]]  ;;  %s9955_s1 = sld [smem:[#allocation13_spill]] }
0x20cb   : > { %s9956_s5 = sld [smem:[#allocation14_spill]]  ;;  %s9957_s20 = sld [smem:[#allocation18_spill]] }
0x20d0   : > { %p49_p4 = scmp.ge.s32.totalorder %s9954_s28, 4  }
0x20d2   :  { %51 = sbr.rel (!%p49_p4) target bundleno = 44 (0x2c), region = 179 }
0x20d9   :  { %6202 = vsyncpa [#allocation6], 1 }
0x20da   :  { %6204 = vsyncpa [#allocation6 + $0x1], 1 }
0x20db   :  { %6205 = vsyncpa [#allocation8], 1 }
0x20dc   :  { %6207 = vsyncpa [#allocation8 + $0x1], 1 }

</bundles_post_ra>
